<compile_context>
chip_gen: v7x
topology: tpu7x:2x2x1
jax: 0.10.0
libtpu: 0.0.40
codegen_flags: <defaults>
</compile_context>

<pallas_src>
import jax
import jax.numpy as jnp
import numpy as np
from jax.experimental import pallas as pl
from jax.experimental.pallas import tpu as pltpu

EPS = 1e-5


def _attention_kernel(x1_ref, x2_ref,
                      se_ref, te_ref, we_ref,
                      sd_ref, td_ref, wd_ref,
                      sa_ref, ta_ref, wa_ref, ba_ref,
                      out_ref,
                      pad_e, pad_d, col_e, col_d, vbuf):
    """One batch element per grid step. All activations NHWC (C = lane dim)."""
    H2, W2, Ce = x1_ref.shape[1], x1_ref.shape[2], x1_ref.shape[3]
    H, W, Cd = x2_ref.shape[1], x2_ref.shape[2], x2_ref.shape[3]
    D = we_ref.shape[1]
    P2 = H2 * W2                    # encoder pixels (full res)
    P = H * W                       # decoder / output pixels (half res)

    # Zero only the 1-pixel halo of the padded scratch buffers; the interior is
    # fully overwritten below.  Done every step (not just program_id==0) so the
    # "parallel" batch axis stays correct if sharded across TensorCores.
    pad_e[0:1, :, :] = jnp.zeros((1, W2 + 2, Ce), jnp.float32)
    pad_e[H2 + 1:H2 + 2, :, :] = jnp.zeros((1, W2 + 2, Ce), jnp.float32)
    pad_e[:, 0:1, :] = jnp.zeros((H2 + 2, 1, Ce), jnp.float32)
    pad_e[:, W2 + 1:W2 + 2, :] = jnp.zeros((H2 + 2, 1, Ce), jnp.float32)
    pad_d[0:1, :, :] = jnp.zeros((1, W + 2, Cd), jnp.float32)
    pad_d[H + 1:H + 2, :, :] = jnp.zeros((1, W + 2, Cd), jnp.float32)
    pad_d[:, 0:1, :] = jnp.zeros((H + 2, 1, Cd), jnp.float32)
    pad_d[:, W + 1:W + 2, :] = jnp.zeros((H + 2, 1, Cd), jnp.float32)

    # ---------- encoder branch: BN -> ReLU -> conv3x3(p=1) -> maxpool 2x2/2
    a1 = jnp.maximum(x1_ref[0] * se_ref[...] + te_ref[...], 0.0)   # folded BN+ReLU
    pad_e[1:H2 + 1, 1:W2 + 1, :] = a1
    for t in range(9):                                             # build im2col
        dy, dx = t // 3, t % 3
        col_e[:, t * Ce:(t + 1) * Ce] = \
            pad_e[dy:dy + H2, dx:dx + W2, :].reshape(P2, Ce)
    # single fused conv matmul (conv bias folded into attention-BN shift in wrapper)
    acc_e = jnp.dot(col_e[...], we_ref[...],
                    preferred_element_type=jnp.float32)            # (P2, D)
    # 2x2 stride-2 max pool on the VPU:
    #  - vertical pairs: rows 2h / 2h+1 are contiguous W2-row blocks
    acc_e = acc_e.reshape(H, 2 * W2, D)
    v = jnp.maximum(acc_e[:, :W2, :], acc_e[:, W2:, :])            # (H, W2, D)
    #  - horizontal pairs: even/odd columns via sublane-strided pl.ds reads
    vbuf[...] = v.reshape(H * W2, D)
    enc = jnp.maximum(vbuf[pl.ds(0, P, 2), :],
                      vbuf[pl.ds(1, P, 2), :])                     # (P, D)

    # ---------- decoder branch: BN -> ReLU -> conv3x3(p=1)
    a2 = jnp.maximum(x2_ref[0] * sd_ref[...] + td_ref[...], 0.0)
    pad_d[1:H + 1, 1:W + 1, :] = a2
    for t in range(9):
        dy, dx = t // 3, t % 3
        col_d[:, t * Cd:(t + 1) * Cd] = \
            pad_d[dy:dy + H, dx:dx + W, :].reshape(P, Cd)
    dec = jnp.dot(col_d[...], wd_ref[...],
                  preferred_element_type=jnp.float32)              # (P, D)

    # ---------- attention head: BN -> ReLU -> conv1x1 (VPU) -> gate x2
    feat = enc + dec                                               # (P, D)
    fa = jnp.maximum(feat * sa_ref[...] + ta_ref[...], 0.0)
    att = jnp.sum(fa * wa_ref[...], axis=-1, keepdims=True) + ba_ref[...]  # (P, 1)
    out_ref[0] = att * x2_ref[0].reshape(P, Cd)                    # broadcast over Cd


def attention_block_pallas(x1, x2, p):
    """x1: (N, Ce, 2H, 2W) NCHW, x2: (N, Cd, H, W) NCHW. Returns (N, Cd, H, W)."""
    N, Ce, H2, W2 = x1.shape
    _, Cd, H, W = x2.shape
    assert H2 == 2 * H and W2 == 2 * W, "encoder input must be 2x decoder spatial"
    D = p['W_e'].shape[0]

    # ---- parameter glue: fold BN + conv biases, reorder conv weights
    def fold(g, b, m, v):
        s = g / jnp.sqrt(v + EPS)
        return s, b - m * s

    se, te = fold(p['g_e'], p['b_e'], p['m_e'], p['v_e'])
    sd, td = fold(p['g_d'], p['b_d'], p['m_d'], p['v_d'])
    sa, ta = fold(p['g_a'], p['b_a'], p['m_a'], p['v_a'])
    # maxpool(x + c) == maxpool(x) + c for a per-channel constant, so both conv
    # biases commute into the attention-BN shift.
    ta = ta + sa * (p['bias_e'] + p['bias_d'])

    x1n = jnp.transpose(x1, (0, 2, 3, 1)).astype(jnp.float32)      # NHWC
    x2n = jnp.transpose(x2, (0, 2, 3, 1)).astype(jnp.float32)

    # (D, Cin, 3, 3) -> (3, 3, Cin, D) -> (9*Cin, D); row index = (3*dy+dx)*Cin+c
    we = jnp.transpose(p['W_e'], (2, 3, 1, 0)).reshape(9 * Ce, D).astype(jnp.float32)
    wd = jnp.transpose(p['W_d'], (2, 3, 1, 0)).reshape(9 * Cd, D).astype(jnp.float32)
    wa = p['W_a'].reshape(1, D).astype(jnp.float32)
    ba = p['bias_a'].reshape(1, 1).astype(jnp.float32)

    params = [
        se.reshape(1, 1, Ce).astype(jnp.float32),
        te.reshape(1, 1, Ce).astype(jnp.float32),
        we,
        sd.reshape(1, 1, Cd).astype(jnp.float32),
        td.reshape(1, 1, Cd).astype(jnp.float32),
        wd,
        sa.reshape(1, D).astype(jnp.float32),
        ta.reshape(1, D).astype(jnp.float32),
        wa, ba,
    ]

    def _full_spec(a):
        nd = a.ndim
        return pl.BlockSpec(a.shape, lambda b, _nd=nd: (0,) * _nd)

    # TODO(synk): for large images on v7x (64 MiB VMEM, 2 TCs) add a row-block
    # grid axis with a 1-row halo and a lane-dense (padded-C) output slab.
    out_flat = pl.pallas_call(
        _attention_kernel,
        out_shape=jax.ShapeDtypeStruct((N, H * W, Cd), jnp.float32),
        grid=(N,),
        in_specs=[
            pl.BlockSpec((1, H2, W2, Ce), lambda b: (b, 0, 0, 0)),
            pl.BlockSpec((1, H, W, Cd), lambda b: (b, 0, 0, 0)),
        ] + [_full_spec(a) for a in params],
        out_specs=pl.BlockSpec((1, H * W, Cd), lambda b: (b, 0, 0)),
        scratch_shapes=[
            pltpu.VMEM((H2 + 2, W2 + 2, Ce), jnp.float32),   # padded encoder act
            pltpu.VMEM((H + 2, W + 2, Cd), jnp.float32),     # padded decoder act
            pltpu.VMEM((H2 * W2, 9 * Ce), jnp.float32),      # encoder im2col
            pltpu.VMEM((H * W, 9 * Cd), jnp.float32),        # decoder im2col
            pltpu.VMEM((H * W2, D), jnp.float32),            # row-pooled conv out
        ],
        compiler_params=pltpu.CompilerParams(dimension_semantics=("parallel",)),
    )(x1n, x2n, *params)

    return jnp.transpose(out_flat.reshape(N, H, W, Cd), (0, 3, 1, 2))  # NCHW


# ---------------- pure-JAX reference (mirrors the PyTorch forward) ----------------
def attention_block_ref(x1, x2, p):
    def bn(x, g, b, m, v):
        return (x - m[None, :, None, None]) / jnp.sqrt(v + EPS)[None, :, None, None] \
               * g[None, :, None, None] + b[None, :, None, None]

    def conv(x, w, b, pad):
        y = jax.lax.conv_general_dilated(
            x, w, window_strides=(1, 1), padding=[(pad, pad), (pad, pad)],
            dimension_numbers=('NCHW', 'OIHW', 'NCHW'))
        return y + b[None, :, None, None]

    enc = jnp.maximum(bn(x1, p['g_e'], p['b_e'], p['m_e'], p['v_e']), 0.0)
    enc = conv(enc, p['W_e'], p['bias_e'], 1)
    enc = jax.lax.reduce_window(enc, -jnp.inf, jax.lax.max,
                                (1, 1, 2, 2), (1, 1, 2, 2), 'VALID')
    dec = jnp.maximum(bn(x2, p['g_d'], p['b_d'], p['m_d'], p['v_d']), 0.0)
    dec = conv(dec, p['W_d'], p['bias_d'], 1)
    f = enc + dec
    f = jnp.maximum(bn(f, p['g_a'], p['b_a'], p['m_a'], p['v_a']), 0.0)
    att = conv(f, p['W_a'], p['bias_a'], 0)
    return att * x2


if __name__ == "__main__":
    # small shapes: input_encoder Ce=4 at 16x16, input_decoder Cd=6 at 8x8, output_dim D=8
    N, Ce, Cd, D = 2, 4, 6, 8
    H, W = 8, 8
    H2, W2 = 2 * H, 2 * W

    key = jax.random.PRNGKey(0)
    ks = jax.random.split(key, 24)
    nrm = jax.random.normal
    uni = jax.random.uniform

    params = {
        # conv_encoder: BN(Ce) -> ReLU -> Conv2d(Ce, D, 3, pad=1) -> MaxPool2d(2,2)
        'g_e': uni(ks[0], (Ce,), minval=0.5, maxval=1.5),
        'b_e': 0.1 * nrm(ks[1], (Ce,)),
        'm_e': 0.1 * nrm(ks[2], (Ce,)),
        'v_e': uni(ks[3], (Ce,), minval=0.5, maxval=1.5),
        'W_e': 0.1 * nrm(ks[4], (D, Ce, 3, 3)),
        'bias_e': 0.1 * nrm(ks[5], (D,)),
        # conv_decoder: BN(Cd) -> ReLU -> Conv2d(Cd, D, 3, pad=1)
        'g_d': uni(ks[6], (Cd,), minval=0.5, maxval=1.5),
        'b_d': 0.1 * nrm(ks[7], (Cd,)),
        'm_d': 0.1 * nrm(ks[8], (Cd,)),
        'v_d': uni(ks[9], (Cd,), minval=0.5, maxval=1.5),
        'W_d': 0.1 * nrm(ks[10], (D, Cd, 3, 3)),
        'bias_d': 0.1 * nrm(ks[11], (D,)),
        # conv_attn: BN(D) -> ReLU -> Conv2d(D, 1, 1)
        'g_a': uni(ks[12], (D,), minval=0.5, maxval=1.5),
        'b_a': 0.1 * nrm(ks[13], (D,)),
        'm_a': 0.1 * nrm(ks[14], (D,)),
        'v_a': uni(ks[15], (D,), minval=0.5, maxval=1.5),
        'W_a': 0.1 * nrm(ks[16], (1, D, 1, 1)),
        'bias_a': 0.1 * nrm(ks[17], (1,)),
    }

    x1 = nrm(ks[18], (N, Ce, H2, W2), dtype=jnp.float32)   # encoder skip (full res)
    x2 = nrm(ks[19], (N, Cd, H, W), dtype=jnp.float32)     # decoder feature (half res)

    out = jax.block_until_ready(attention_block_pallas(x1, x2, params))
    ref = jax.block_until_ready(attention_block_ref(x1, x2, params))

    # tolerance covers the reference conv's default (bf16-pass) TPU precision
    err = float(jnp.max(jnp.abs(out - ref)))
    if out.shape != ref.shape or not np.isfinite(err) or err > 5e-2:
        raise AssertionError(f"mismatch: shape={out.shape} vs {ref.shape}, max_err={err}")
    print("KERNEL_OK")
</pallas_src>

<mosaic_0001>
module attributes {stable_mosaic.version = 11 : i64} {
  func.func @_attention_kernel(%arg0: i32, %arg1: memref<1x16x16x4xf32, #tpu.memory_space<vmem>>, %arg2: memref<1x8x8x6xf32, #tpu.memory_space<vmem>>, %arg3: memref<1x1x4xf32, #tpu.memory_space<vmem>>, %arg4: memref<1x1x4xf32, #tpu.memory_space<vmem>>, %arg5: memref<36x8xf32, #tpu.memory_space<vmem>>, %arg6: memref<1x1x6xf32, #tpu.memory_space<vmem>>, %arg7: memref<1x1x6xf32, #tpu.memory_space<vmem>>, %arg8: memref<54x8xf32, #tpu.memory_space<vmem>>, %arg9: memref<1x8xf32, #tpu.memory_space<vmem>>, %arg10: memref<1x8xf32, #tpu.memory_space<vmem>>, %arg11: memref<1x8xf32, #tpu.memory_space<vmem>>, %arg12: memref<1x1xf32, #tpu.memory_space<vmem>>, %arg13: memref<1x64x6xf32, #tpu.memory_space<vmem>>, %arg14: memref<18x18x4xf32, #tpu.memory_space<vmem>>, %arg15: memref<10x10x6xf32, #tpu.memory_space<vmem>>, %arg16: memref<256x36xf32, #tpu.memory_space<vmem>>, %arg17: memref<64x54xf32, #tpu.memory_space<vmem>>, %arg18: memref<128x8xf32, #tpu.memory_space<vmem>>) attributes {dimension_semantics = [#tpu.dimension_semantics<parallel>], iteration_bounds = array<i64: 2>, scalar_prefetch = 0 : i64, scratch_operands = 5 : i64, tpu.core_type = #tpu.core_type<tc>, window_params = [{transform_indices = @transform_0, window_bounds = array<i64: 1, 16, 16, 4>}, {transform_indices = @transform_1, window_bounds = array<i64: 1, 8, 8, 6>}, {pipeline_mode = #tpu.pipeline_mode<synchronous>, transform_indices = @transform_2, window_bounds = array<i64: 1, 1, 4>}, {pipeline_mode = #tpu.pipeline_mode<synchronous>, transform_indices = @transform_3, window_bounds = array<i64: 1, 1, 4>}, {pipeline_mode = #tpu.pipeline_mode<synchronous>, transform_indices = @transform_4, window_bounds = array<i64: 36, 8>}, {pipeline_mode = #tpu.pipeline_mode<synchronous>, transform_indices = @transform_5, window_bounds = array<i64: 1, 1, 6>}, {pipeline_mode = #tpu.pipeline_mode<synchronous>, transform_indices = @transform_6, window_bounds = array<i64: 1, 1, 6>}, {pipeline_mode = #tpu.pipeline_mode<synchronous>, transform_indices = @transform_7, window_bounds = array<i64: 54, 8>}, {pipeline_mode = #tpu.pipeline_mode<synchronous>, transform_indices = @transform_8, window_bounds = array<i64: 1, 8>}, {pipeline_mode = #tpu.pipeline_mode<synchronous>, transform_indices = @transform_9, window_bounds = array<i64: 1, 8>}, {pipeline_mode = #tpu.pipeline_mode<synchronous>, transform_indices = @transform_10, window_bounds = array<i64: 1, 8>}, {pipeline_mode = #tpu.pipeline_mode<synchronous>, transform_indices = @transform_11, window_bounds = array<i64: 1, 1>}, {transform_indices = @transform_12, window_bounds = array<i64: 1, 64, 6>}]} {
    %cst = arith.constant 0.000000e+00 : f32
    %0 = vector.broadcast %cst : f32 to vector<1x18x4xf32>
    %c0 = arith.constant 0 : index
    %c0_0 = arith.constant 0 : index
    %c0_1 = arith.constant 0 : index
    %1 = vector.load %arg14[%c0, %c0_0, %c0_1] : memref<18x18x4xf32, #tpu.memory_space<vmem>>, vector<1x18x4xf32>
    tpu.vector_store %arg14[%c0, %c0_0, %c0_1], %0 {strides = array<i32>} : memref<18x18x4xf32, #tpu.memory_space<vmem>>, vector<1x18x4xf32>,
    %cst_2 = arith.constant 0.000000e+00 : f32
    %2 = vector.broadcast %cst_2 : f32 to vector<1x18x4xf32>
    %c17 = arith.constant 17 : index
    %c0_3 = arith.constant 0 : index
    %c0_4 = arith.constant 0 : index
    %3 = vector.load %arg14[%c17, %c0_3, %c0_4] : memref<18x18x4xf32, #tpu.memory_space<vmem>>, vector<1x18x4xf32>
    tpu.vector_store %arg14[%c17, %c0_3, %c0_4], %2 {strides = array<i32>} : memref<18x18x4xf32, #tpu.memory_space<vmem>>, vector<1x18x4xf32>,
    %cst_5 = arith.constant 0.000000e+00 : f32
    %4 = vector.broadcast %cst_5 : f32 to vector<18x1x4xf32>
    %c0_6 = arith.constant 0 : index
    %c0_7 = arith.constant 0 : index
    %c0_8 = arith.constant 0 : index
    %5 = vector.load %arg14[%c0_6, %c0_7, %c0_8] : memref<18x18x4xf32, #tpu.memory_space<vmem>>, vector<18x1x4xf32>
    tpu.vector_store %arg14[%c0_6, %c0_7, %c0_8], %4 {strides = array<i32>} : memref<18x18x4xf32, #tpu.memory_space<vmem>>, vector<18x1x4xf32>,
    %cst_9 = arith.constant 0.000000e+00 : f32
    %6 = vector.broadcast %cst_9 : f32 to vector<18x1x4xf32>
    %c0_10 = arith.constant 0 : index
    %c17_11 = arith.constant 17 : index
    %c0_12 = arith.constant 0 : index
    %7 = vector.load %arg14[%c0_10, %c17_11, %c0_12] : memref<18x18x4xf32, #tpu.memory_space<vmem>>, vector<18x1x4xf32>
    tpu.vector_store %arg14[%c0_10, %c17_11, %c0_12], %6 {strides = array<i32>} : memref<18x18x4xf32, #tpu.memory_space<vmem>>, vector<18x1x4xf32>,
    %cst_13 = arith.constant 0.000000e+00 : f32
    %8 = vector.broadcast %cst_13 : f32 to vector<1x10x6xf32>
    %c0_14 = arith.constant 0 : index
    %c0_15 = arith.constant 0 : index
    %c0_16 = arith.constant 0 : index
    %9 = vector.load %arg15[%c0_14, %c0_15, %c0_16] : memref<10x10x6xf32, #tpu.memory_space<vmem>>, vector<1x10x6xf32>
    tpu.vector_store %arg15[%c0_14, %c0_15, %c0_16], %8 {strides = array<i32>} : memref<10x10x6xf32, #tpu.memory_space<vmem>>, vector<1x10x6xf32>,
    %cst_17 = arith.constant 0.000000e+00 : f32
    %10 = vector.broadcast %cst_17 : f32 to vector<1x10x6xf32>
    %c9 = arith.constant 9 : index
    %c0_18 = arith.constant 0 : index
    %c0_19 = arith.constant 0 : index
    %11 = vector.load %arg15[%c9, %c0_18, %c0_19] : memref<10x10x6xf32, #tpu.memory_space<vmem>>, vector<1x10x6xf32>
    tpu.vector_store %arg15[%c9, %c0_18, %c0_19], %10 {strides = array<i32>} : memref<10x10x6xf32, #tpu.memory_space<vmem>>, vector<1x10x6xf32>,
    %cst_20 = arith.constant 0.000000e+00 : f32
    %12 = vector.broadcast %cst_20 : f32 to vector<10x1x6xf32>
    %c0_21 = arith.constant 0 : index
    %c0_22 = arith.constant 0 : index
    %c0_23 = arith.constant 0 : index
    %13 = vector.load %arg15[%c0_21, %c0_22, %c0_23] : memref<10x10x6xf32, #tpu.memory_space<vmem>>, vector<10x1x6xf32>
    tpu.vector_store %arg15[%c0_21, %c0_22, %c0_23], %12 {strides = array<i32>} : memref<10x10x6xf32, #tpu.memory_space<vmem>>, vector<10x1x6xf32>,
    %cst_24 = arith.constant 0.000000e+00 : f32
    %14 = vector.broadcast %cst_24 : f32 to vector<10x1x6xf32>
    %c0_25 = arith.constant 0 : index
    %c9_26 = arith.constant 9 : index
    %c0_27 = arith.constant 0 : index
    %15 = vector.load %arg15[%c0_25, %c9_26, %c0_27] : memref<10x10x6xf32, #tpu.memory_space<vmem>>, vector<10x1x6xf32>
    tpu.vector_store %arg15[%c0_25, %c9_26, %c0_27], %14 {strides = array<i32>} : memref<10x10x6xf32, #tpu.memory_space<vmem>>, vector<10x1x6xf32>,
    %c0_28 = arith.constant 0 : index
    %c0_29 = arith.constant 0 : index
    %c0_30 = arith.constant 0 : index
    %c0_31 = arith.constant 0 : index
    %16 = vector.load %arg1[%c0_28, %c0_29, %c0_30, %c0_31] : memref<1x16x16x4xf32, #tpu.memory_space<vmem>>, vector<1x16x16x4xf32>
    %17 = vector.shape_cast %16 : vector<1x16x16x4xf32> to vector<16x16x4xf32>
    %c0_32 = arith.constant 0 : index
    %c0_33 = arith.constant 0 : index
    %c0_34 = arith.constant 0 : index
    %18 = vector.load %arg3[%c0_32, %c0_33, %c0_34] : memref<1x1x4xf32, #tpu.memory_space<vmem>>, vector<1x1x4xf32>
    %19 = vector.broadcast %18 : vector<1x1x4xf32> to vector<16x16x4xf32>
    %20 = arith.mulf %17, %19 : vector<16x16x4xf32>
    %c0_35 = arith.constant 0 : index
    %c0_36 = arith.constant 0 : index
    %c0_37 = arith.constant 0 : index
    %21 = vector.load %arg4[%c0_35, %c0_36, %c0_37] : memref<1x1x4xf32, #tpu.memory_space<vmem>>, vector<1x1x4xf32>
    %22 = vector.broadcast %21 : vector<1x1x4xf32> to vector<16x16x4xf32>
    %23 = arith.addf %20, %22 : vector<16x16x4xf32>
    %cst_38 = arith.constant 0.000000e+00 : f32
    %24 = vector.broadcast %cst_38 : f32 to vector<16x16x4xf32>
    %25 = arith.maximumf %23, %24 : vector<16x16x4xf32>
    %c1 = arith.constant 1 : index
    %c1_39 = arith.constant 1 : index
    %c0_40 = arith.constant 0 : index
    %26 = vector.load %arg14[%c1, %c1_39, %c0_40] : memref<18x18x4xf32, #tpu.memory_space<vmem>>, vector<16x16x4xf32>
    tpu.vector_store %arg14[%c1, %c1_39, %c0_40], %25 {strides = array<i32>} : memref<18x18x4xf32, #tpu.memory_space<vmem>>, vector<16x16x4xf32>,
    %c0_41 = arith.constant 0 : index
    %c0_42 = arith.constant 0 : index
    %c0_43 = arith.constant 0 : index
    %27 = vector.load %arg14[%c0_41, %c0_42, %c0_43] : memref<18x18x4xf32, #tpu.memory_space<vmem>>, vector<16x16x4xf32>
    %28 = vector.shape_cast %27 : vector<16x16x4xf32> to vector<256x4xf32>
    %c0_44 = arith.constant 0 : index
    %c0_45 = arith.constant 0 : index
    %29 = vector.load %arg16[%c0_44, %c0_45] : memref<256x36xf32, #tpu.memory_space<vmem>>, vector<256x4xf32>
    tpu.vector_store %arg16[%c0_44, %c0_45], %28 {strides = array<i32>} : memref<256x36xf32, #tpu.memory_space<vmem>>, vector<256x4xf32>,
    %c0_46 = arith.constant 0 : index
    %c1_47 = arith.constant 1 : index
    %c0_48 = arith.constant 0 : index
    %30 = vector.load %arg14[%c0_46, %c1_47, %c0_48] : memref<18x18x4xf32, #tpu.memory_space<vmem>>, vector<16x16x4xf32>
    %31 = vector.shape_cast %30 : vector<16x16x4xf32> to vector<256x4xf32>
    %c0_49 = arith.constant 0 : index
    %c4 = arith.constant 4 : index
    %32 = vector.load %arg16[%c0_49, %c4] : memref<256x36xf32, #tpu.memory_space<vmem>>, vector<256x4xf32>
    tpu.vector_store %arg16[%c0_49, %c4], %31 {strides = array<i32>} : memref<256x36xf32, #tpu.memory_space<vmem>>, vector<256x4xf32>,
    %c0_50 = arith.constant 0 : index
    %c2 = arith.constant 2 : index
    %c0_51 = arith.constant 0 : index
    %33 = vector.load %arg14[%c0_50, %c2, %c0_51] : memref<18x18x4xf32, #tpu.memory_space<vmem>>, vector<16x16x4xf32>
    %34 = vector.shape_cast %33 : vector<16x16x4xf32> to vector<256x4xf32>
    %c0_52 = arith.constant 0 : index
    %c8 = arith.constant 8 : index
    %35 = vector.load %arg16[%c0_52, %c8] : memref<256x36xf32, #tpu.memory_space<vmem>>, vector<256x4xf32>
    tpu.vector_store %arg16[%c0_52, %c8], %34 {strides = array<i32>} : memref<256x36xf32, #tpu.memory_space<vmem>>, vector<256x4xf32>,
    %c1_53 = arith.constant 1 : index
    %c0_54 = arith.constant 0 : index
    %c0_55 = arith.constant 0 : index
    %36 = vector.load %arg14[%c1_53, %c0_54, %c0_55] : memref<18x18x4xf32, #tpu.memory_space<vmem>>, vector<16x16x4xf32>
    %37 = vector.shape_cast %36 : vector<16x16x4xf32> to vector<256x4xf32>
    %c0_56 = arith.constant 0 : index
    %c12 = arith.constant 12 : index
    %38 = vector.load %arg16[%c0_56, %c12] : memref<256x36xf32, #tpu.memory_space<vmem>>, vector<256x4xf32>
    tpu.vector_store %arg16[%c0_56, %c12], %37 {strides = array<i32>} : memref<256x36xf32, #tpu.memory_space<vmem>>, vector<256x4xf32>,
    %c1_57 = arith.constant 1 : index
    %c1_58 = arith.constant 1 : index
    %c0_59 = arith.constant 0 : index
    %39 = vector.load %arg14[%c1_57, %c1_58, %c0_59] : memref<18x18x4xf32, #tpu.memory_space<vmem>>, vector<16x16x4xf32>
    %40 = vector.shape_cast %39 : vector<16x16x4xf32> to vector<256x4xf32>
    %c0_60 = arith.constant 0 : index
    %c16 = arith.constant 16 : index
    %41 = vector.load %arg16[%c0_60, %c16] : memref<256x36xf32, #tpu.memory_space<vmem>>, vector<256x4xf32>
    tpu.vector_store %arg16[%c0_60, %c16], %40 {strides = array<i32>} : memref<256x36xf32, #tpu.memory_space<vmem>>, vector<256x4xf32>,
    %c1_61 = arith.constant 1 : index
    %c2_62 = arith.constant 2 : index
    %c0_63 = arith.constant 0 : index
    %42 = vector.load %arg14[%c1_61, %c2_62, %c0_63] : memref<18x18x4xf32, #tpu.memory_space<vmem>>, vector<16x16x4xf32>
    %43 = vector.shape_cast %42 : vector<16x16x4xf32> to vector<256x4xf32>
    %c0_64 = arith.constant 0 : index
    %c20 = arith.constant 20 : index
    %44 = vector.load %arg16[%c0_64, %c20] : memref<256x36xf32, #tpu.memory_space<vmem>>, vector<256x4xf32>
    tpu.vector_store %arg16[%c0_64, %c20], %43 {strides = array<i32>} : memref<256x36xf32, #tpu.memory_space<vmem>>, vector<256x4xf32>,
    %c2_65 = arith.constant 2 : index
    %c0_66 = arith.constant 0 : index
    %c0_67 = arith.constant 0 : index
    %45 = vector.load %arg14[%c2_65, %c0_66, %c0_67] : memref<18x18x4xf32, #tpu.memory_space<vmem>>, vector<16x16x4xf32>
    %46 = vector.shape_cast %45 : vector<16x16x4xf32> to vector<256x4xf32>
    %c0_68 = arith.constant 0 : index
    %c24 = arith.constant 24 : index
    %47 = vector.load %arg16[%c0_68, %c24] : memref<256x36xf32, #tpu.memory_space<vmem>>, vector<256x4xf32>
    tpu.vector_store %arg16[%c0_68, %c24], %46 {strides = array<i32>} : memref<256x36xf32, #tpu.memory_space<vmem>>, vector<256x4xf32>,
    %c2_69 = arith.constant 2 : index
    %c1_70 = arith.constant 1 : index
    %c0_71 = arith.constant 0 : index
    %48 = vector.load %arg14[%c2_69, %c1_70, %c0_71] : memref<18x18x4xf32, #tpu.memory_space<vmem>>, vector<16x16x4xf32>
    %49 = vector.shape_cast %48 : vector<16x16x4xf32> to vector<256x4xf32>
    %c0_72 = arith.constant 0 : index
    %c28 = arith.constant 28 : index
    %50 = vector.load %arg16[%c0_72, %c28] : memref<256x36xf32, #tpu.memory_space<vmem>>, vector<256x4xf32>
    tpu.vector_store %arg16[%c0_72, %c28], %49 {strides = array<i32>} : memref<256x36xf32, #tpu.memory_space<vmem>>, vector<256x4xf32>,
    %c2_73 = arith.constant 2 : index
    %c2_74 = arith.constant 2 : index
    %c0_75 = arith.constant 0 : index
    %51 = vector.load %arg14[%c2_73, %c2_74, %c0_75] : memref<18x18x4xf32, #tpu.memory_space<vmem>>, vector<16x16x4xf32>
    %52 = vector.shape_cast %51 : vector<16x16x4xf32> to vector<256x4xf32>
    %c0_76 = arith.constant 0 : index
    %c32 = arith.constant 32 : index
    %53 = vector.load %arg16[%c0_76, %c32] : memref<256x36xf32, #tpu.memory_space<vmem>>, vector<256x4xf32>
    tpu.vector_store %arg16[%c0_76, %c32], %52 {strides = array<i32>} : memref<256x36xf32, #tpu.memory_space<vmem>>, vector<256x4xf32>,
    %c0_77 = arith.constant 0 : index
    %c0_78 = arith.constant 0 : index
    %54 = vector.load %arg16[%c0_77, %c0_78] : memref<256x36xf32, #tpu.memory_space<vmem>>, vector<256x36xf32>
    %c0_79 = arith.constant 0 : index
    %c0_80 = arith.constant 0 : index
    %55 = vector.load %arg5[%c0_79, %c0_80] : memref<36x8xf32, #tpu.memory_space<vmem>>, vector<36x8xf32>
    %cst_81 = arith.constant dense<0.000000e+00> : vector<256x8xf32>
    %56 = tpu.matmul %54, %55, %cst_81 {dimension_numbers = #tpu.dot_dimension_numbers<[1], [0], [0], [1], [0, 0, 1, 1], [], []>} : vector<256x36xf32>, vector<36x8xf32>, vector<256x8xf32> -> vector<256x8xf32>
    %57 = vector.shape_cast %56 : vector<256x8xf32> to vector<8x32x8xf32>
    %58 = vector.extract_strided_slice %57 {offsets = [0, 0, 0], sizes = [8, 16, 8], strides = [1, 1, 1]} : vector<8x32x8xf32> to vector<8x16x8xf32>
    %59 = vector.extract_strided_slice %57 {offsets = [0, 16, 0], sizes = [8, 16, 8], strides = [1, 1, 1]} : vector<8x32x8xf32> to vector<8x16x8xf32>
    %60 = arith.maximumf %58, %59 : vector<8x16x8xf32>
    %61 = vector.shape_cast %60 : vector<8x16x8xf32> to vector<128x8xf32>
    %c0_82 = arith.constant 0 : index
    %c0_83 = arith.constant 0 : index
    %62 = vector.load %arg18[%c0_82, %c0_83] : memref<128x8xf32, #tpu.memory_space<vmem>>, vector<128x8xf32>
    tpu.vector_store %arg18[%c0_82, %c0_83], %61 {strides = array<i32>} : memref<128x8xf32, #tpu.memory_space<vmem>>, vector<128x8xf32>,
    %c0_84 = arith.constant 0 : index
    %c0_85 = arith.constant 0 : index
    %63 = tpu.strided_load %arg18[%c0_84, %c0_85] {strides = array<i32: 2, 1>} : memref<128x8xf32, #tpu.memory_space<vmem>>, vector<64x8xf32>
    %c1_86 = arith.constant 1 : index
    %c0_87 = arith.constant 0 : index
    %64 = tpu.strided_load %arg18[%c1_86, %c0_87] {strides = array<i32: 2, 1>} : memref<128x8xf32, #tpu.memory_space<vmem>>, vector<64x8xf32>
    %65 = arith.maximumf %63, %64 : vector<64x8xf32>
    %c0_88 = arith.constant 0 : index
    %c0_89 = arith.constant 0 : index
    %c0_90 = arith.constant 0 : index
    %c0_91 = arith.constant 0 : index
    %66 = vector.load %arg2[%c0_88, %c0_89, %c0_90, %c0_91] : memref<1x8x8x6xf32, #tpu.memory_space<vmem>>, vector<1x8x8x6xf32>
    %67 = vector.shape_cast %66 : vector<1x8x8x6xf32> to vector<8x8x6xf32>
    %c0_92 = arith.constant 0 : index
    %c0_93 = arith.constant 0 : index
    %c0_94 = arith.constant 0 : index
    %68 = vector.load %arg6[%c0_92, %c0_93, %c0_94] : memref<1x1x6xf32, #tpu.memory_space<vmem>>, vector<1x1x6xf32>
    %69 = vector.broadcast %68 : vector<1x1x6xf32> to vector<8x8x6xf32>
    %70 = arith.mulf %67, %69 : vector<8x8x6xf32>
    %c0_95 = arith.constant 0 : index
    %c0_96 = arith.constant 0 : index
    %c0_97 = arith.constant 0 : index
    %71 = vector.load %arg7[%c0_95, %c0_96, %c0_97] : memref<1x1x6xf32, #tpu.memory_space<vmem>>, vector<1x1x6xf32>
    %72 = vector.broadcast %71 : vector<1x1x6xf32> to vector<8x8x6xf32>
    %73 = arith.addf %70, %72 : vector<8x8x6xf32>
    %cst_98 = arith.constant 0.000000e+00 : f32
    %74 = vector.broadcast %cst_98 : f32 to vector<8x8x6xf32>
    %75 = arith.maximumf %73, %74 : vector<8x8x6xf32>
    %c1_99 = arith.constant 1 : index
    %c1_100 = arith.constant 1 : index
    %c0_101 = arith.constant 0 : index
    %76 = vector.load %arg15[%c1_99, %c1_100, %c0_101] : memref<10x10x6xf32, #tpu.memory_space<vmem>>, vector<8x8x6xf32>
    tpu.vector_store %arg15[%c1_99, %c1_100, %c0_101], %75 {strides = array<i32>} : memref<10x10x6xf32, #tpu.memory_space<vmem>>, vector<8x8x6xf32>,
    %c0_102 = arith.constant 0 : index
    %c0_103 = arith.constant 0 : index
    %c0_104 = arith.constant 0 : index
    %77 = vector.load %arg15[%c0_102, %c0_103, %c0_104] : memref<10x10x6xf32, #tpu.memory_space<vmem>>, vector<8x8x6xf32>
    %78 = vector.shape_cast %77 : vector<8x8x6xf32> to vector<64x6xf32>
    %c0_105 = arith.constant 0 : index
    %c0_106 = arith.constant 0 : index
    %79 = vector.load %arg17[%c0_105, %c0_106] : memref<64x54xf32, #tpu.memory_space<vmem>>, vector<64x6xf32>
    tpu.vector_store %arg17[%c0_105, %c0_106], %78 {strides = array<i32>} : memref<64x54xf32, #tpu.memory_space<vmem>>, vector<64x6xf32>,
    %c0_107 = arith.constant 0 : index
    %c1_108 = arith.constant 1 : index
    %c0_109 = arith.constant 0 : index
    %80 = vector.load %arg15[%c0_107, %c1_108, %c0_109] : memref<10x10x6xf32, #tpu.memory_space<vmem>>, vector<8x8x6xf32>
    %81 = vector.shape_cast %80 : vector<8x8x6xf32> to vector<64x6xf32>
    %c0_110 = arith.constant 0 : index
    %c6 = arith.constant 6 : index
    %82 = vector.load %arg17[%c0_110, %c6] : memref<64x54xf32, #tpu.memory_space<vmem>>, vector<64x6xf32>
    tpu.vector_store %arg17[%c0_110, %c6], %81 {strides = array<i32>} : memref<64x54xf32, #tpu.memory_space<vmem>>, vector<64x6xf32>,
    %c0_111 = arith.constant 0 : index
    %c2_112 = arith.constant 2 : index
    %c0_113 = arith.constant 0 : index
    %83 = vector.load %arg15[%c0_111, %c2_112, %c0_113] : memref<10x10x6xf32, #tpu.memory_space<vmem>>, vector<8x8x6xf32>
    %84 = vector.shape_cast %83 : vector<8x8x6xf32> to vector<64x6xf32>
    %c0_114 = arith.constant 0 : index
    %c12_115 = arith.constant 12 : index
    %85 = vector.load %arg17[%c0_114, %c12_115] : memref<64x54xf32, #tpu.memory_space<vmem>>, vector<64x6xf32>
    tpu.vector_store %arg17[%c0_114, %c12_115], %84 {strides = array<i32>} : memref<64x54xf32, #tpu.memory_space<vmem>>, vector<64x6xf32>,
    %c1_116 = arith.constant 1 : index
    %c0_117 = arith.constant 0 : index
    %c0_118 = arith.constant 0 : index
    %86 = vector.load %arg15[%c1_116, %c0_117, %c0_118] : memref<10x10x6xf32, #tpu.memory_space<vmem>>, vector<8x8x6xf32>
    %87 = vector.shape_cast %86 : vector<8x8x6xf32> to vector<64x6xf32>
    %c0_119 = arith.constant 0 : index
    %c18 = arith.constant 18 : index
    %88 = vector.load %arg17[%c0_119, %c18] : memref<64x54xf32, #tpu.memory_space<vmem>>, vector<64x6xf32>
    tpu.vector_store %arg17[%c0_119, %c18], %87 {strides = array<i32>} : memref<64x54xf32, #tpu.memory_space<vmem>>, vector<64x6xf32>,
    %c1_120 = arith.constant 1 : index
    %c1_121 = arith.constant 1 : index
    %c0_122 = arith.constant 0 : index
    %89 = vector.load %arg15[%c1_120, %c1_121, %c0_122] : memref<10x10x6xf32, #tpu.memory_space<vmem>>, vector<8x8x6xf32>
    %90 = vector.shape_cast %89 : vector<8x8x6xf32> to vector<64x6xf32>
    %c0_123 = arith.constant 0 : index
    %c24_124 = arith.constant 24 : index
    %91 = vector.load %arg17[%c0_123, %c24_124] : memref<64x54xf32, #tpu.memory_space<vmem>>, vector<64x6xf32>
    tpu.vector_store %arg17[%c0_123, %c24_124], %90 {strides = array<i32>} : memref<64x54xf32, #tpu.memory_space<vmem>>, vector<64x6xf32>,
    %c1_125 = arith.constant 1 : index
    %c2_126 = arith.constant 2 : index
    %c0_127 = arith.constant 0 : index
    %92 = vector.load %arg15[%c1_125, %c2_126, %c0_127] : memref<10x10x6xf32, #tpu.memory_space<vmem>>, vector<8x8x6xf32>
    %93 = vector.shape_cast %92 : vector<8x8x6xf32> to vector<64x6xf32>
    %c0_128 = arith.constant 0 : index
    %c30 = arith.constant 30 : index
    %94 = vector.load %arg17[%c0_128, %c30] : memref<64x54xf32, #tpu.memory_space<vmem>>, vector<64x6xf32>
    tpu.vector_store %arg17[%c0_128, %c30], %93 {strides = array<i32>} : memref<64x54xf32, #tpu.memory_space<vmem>>, vector<64x6xf32>,
    %c2_129 = arith.constant 2 : index
    %c0_130 = arith.constant 0 : index
    %c0_131 = arith.constant 0 : index
    %95 = vector.load %arg15[%c2_129, %c0_130, %c0_131] : memref<10x10x6xf32, #tpu.memory_space<vmem>>, vector<8x8x6xf32>
    %96 = vector.shape_cast %95 : vector<8x8x6xf32> to vector<64x6xf32>
    %c0_132 = arith.constant 0 : index
    %c36 = arith.constant 36 : index
    %97 = vector.load %arg17[%c0_132, %c36] : memref<64x54xf32, #tpu.memory_space<vmem>>, vector<64x6xf32>
    tpu.vector_store %arg17[%c0_132, %c36], %96 {strides = array<i32>} : memref<64x54xf32, #tpu.memory_space<vmem>>, vector<64x6xf32>,
    %c2_133 = arith.constant 2 : index
    %c1_134 = arith.constant 1 : index
    %c0_135 = arith.constant 0 : index
    %98 = vector.load %arg15[%c2_133, %c1_134, %c0_135] : memref<10x10x6xf32, #tpu.memory_space<vmem>>, vector<8x8x6xf32>
    %99 = vector.shape_cast %98 : vector<8x8x6xf32> to vector<64x6xf32>
    %c0_136 = arith.constant 0 : index
    %c42 = arith.constant 42 : index
    %100 = vector.load %arg17[%c0_136, %c42] : memref<64x54xf32, #tpu.memory_space<vmem>>, vector<64x6xf32>
    tpu.vector_store %arg17[%c0_136, %c42], %99 {strides = array<i32>} : memref<64x54xf32, #tpu.memory_space<vmem>>, vector<64x6xf32>,
    %c2_137 = arith.constant 2 : index
    %c2_138 = arith.constant 2 : index
    %c0_139 = arith.constant 0 : index
    %101 = vector.load %arg15[%c2_137, %c2_138, %c0_139] : memref<10x10x6xf32, #tpu.memory_space<vmem>>, vector<8x8x6xf32>
    %102 = vector.shape_cast %101 : vector<8x8x6xf32> to vector<64x6xf32>
    %c0_140 = arith.constant 0 : index
    %c48 = arith.constant 48 : index
    %103 = vector.load %arg17[%c0_140, %c48] : memref<64x54xf32, #tpu.memory_space<vmem>>, vector<64x6xf32>
    tpu.vector_store %arg17[%c0_140, %c48], %102 {strides = array<i32>} : memref<64x54xf32, #tpu.memory_space<vmem>>, vector<64x6xf32>,
    %c0_141 = arith.constant 0 : index
    %c0_142 = arith.constant 0 : index
    %104 = vector.load %arg17[%c0_141, %c0_142] : memref<64x54xf32, #tpu.memory_space<vmem>>, vector<64x54xf32>
    %c0_143 = arith.constant 0 : index
    %c0_144 = arith.constant 0 : index
    %105 = vector.load %arg8[%c0_143, %c0_144] : memref<54x8xf32, #tpu.memory_space<vmem>>, vector<54x8xf32>
    %cst_145 = arith.constant dense<0.000000e+00> : vector<64x8xf32>
    %106 = tpu.matmul %104, %105, %cst_145 {dimension_numbers = #tpu.dot_dimension_numbers<[1], [0], [0], [1], [0, 0, 1, 1], [], []>} : vector<64x54xf32>, vector<54x8xf32>, vector<64x8xf32> -> vector<64x8xf32>
    %107 = arith.addf %65, %106 : vector<64x8xf32>
    %c0_146 = arith.constant 0 : index
    %c0_147 = arith.constant 0 : index
    %108 = vector.load %arg9[%c0_146, %c0_147] : memref<1x8xf32, #tpu.memory_space<vmem>>, vector<1x8xf32>
    %109 = vector.broadcast %108 : vector<1x8xf32> to vector<64x8xf32>
    %110 = arith.mulf %107, %109 : vector<64x8xf32>
    %c0_148 = arith.constant 0 : index
    %c0_149 = arith.constant 0 : index
    %111 = vector.load %arg10[%c0_148, %c0_149] : memref<1x8xf32, #tpu.memory_space<vmem>>, vector<1x8xf32>
    %112 = vector.broadcast %111 : vector<1x8xf32> to vector<64x8xf32>
    %113 = arith.addf %110, %112 : vector<64x8xf32>
    %cst_150 = arith.constant 0.000000e+00 : f32
    %114 = vector.broadcast %cst_150 : f32 to vector<64x8xf32>
    %115 = arith.maximumf %113, %114 : vector<64x8xf32>
    %c0_151 = arith.constant 0 : index
    %c0_152 = arith.constant 0 : index
    %116 = vector.load %arg11[%c0_151, %c0_152] : memref<1x8xf32, #tpu.memory_space<vmem>>, vector<1x8xf32>
    %117 = vector.broadcast %116 : vector<1x8xf32> to vector<64x8xf32>
    %118 = arith.mulf %115, %117 : vector<64x8xf32>
    %cst_153 = arith.constant dense<0.000000e+00> : vector<64xf32>
    %119 = vector.multi_reduction <add>, %118, %cst_153 [1] : vector<64x8xf32> to vector<64xf32>
    %120 = vector.shape_cast %119 : vector<64xf32> to vector<64x1xf32>
    %c0_154 = arith.constant 0 : index
    %c0_155 = arith.constant 0 : index
    %121 = vector.load %arg12[%c0_154, %c0_155] : memref<1x1xf32, #tpu.memory_space<vmem>>, vector<1x1xf32>
    %122 = vector.broadcast %121 : vector<1x1xf32> to vector<64x1xf32>
    %123 = arith.addf %120, %122 : vector<64x1xf32>
    %c0_156 = arith.constant 0 : index
    %c0_157 = arith.constant 0 : index
    %c0_158 = arith.constant 0 : index
    %c0_159 = arith.constant 0 : index
    %124 = vector.load %arg2[%c0_156, %c0_157, %c0_158, %c0_159] : memref<1x8x8x6xf32, #tpu.memory_space<vmem>>, vector<1x8x8x6xf32>
    %125 = vector.shape_cast %124 : vector<1x8x8x6xf32> to vector<8x8x6xf32>
    %126 = vector.shape_cast %125 : vector<8x8x6xf32> to vector<64x6xf32>
    %127 = vector.broadcast %123 : vector<64x1xf32> to vector<64x6xf32>
    %128 = arith.mulf %127, %126 : vector<64x6xf32>
    %c0_160 = arith.constant 0 : index
    %c0_161 = arith.constant 0 : index
    %c0_162 = arith.constant 0 : index
    %129 = vector.load %arg13[%c0_160, %c0_161, %c0_162] : memref<1x64x6xf32, #tpu.memory_space<vmem>>, vector<1x64x6xf32>
    %130 = vector.shape_cast %129 : vector<1x64x6xf32> to vector<64x6xf32>
    %131 = vector.shape_cast %128 : vector<64x6xf32> to vector<1x64x6xf32>
    tpu.vector_store %arg13[%c0_160, %c0_161, %c0_162], %131 {strides = array<i32>} : memref<1x64x6xf32, #tpu.memory_space<vmem>>, vector<1x64x6xf32>,
    return
  }
  func.func @transform_0(%arg0: i32) -> (i32, i32, i32, i32) {
    %c0_i32 = arith.constant 0 : i32
    %c0_i32_0 = arith.constant 0 : i32
    %c0_i32_1 = arith.constant 0 : i32
    %c0_i32_2 = arith.constant 0 : i32
    return %arg0, %c0_i32, %c0_i32_0, %c0_i32_1 : i32, i32, i32, i32
  }
  func.func @transform_1(%arg0: i32) -> (i32, i32, i32, i32) {
    %c0_i32 = arith.constant 0 : i32
    %c0_i32_0 = arith.constant 0 : i32
    %c0_i32_1 = arith.constant 0 : i32
    %c0_i32_2 = arith.constant 0 : i32
    return %arg0, %c0_i32, %c0_i32_0, %c0_i32_1 : i32, i32, i32, i32
  }
  func.func @transform_2(%arg0: i32) -> (i32, i32, i32) {
    %c0_i32 = arith.constant 0 : i32
    %c0_i32_0 = arith.constant 0 : i32
    %c0_i32_1 = arith.constant 0 : i32
    %c0_i32_2 = arith.constant 0 : i32
    return %c0_i32, %c0_i32_0, %c0_i32_1 : i32, i32, i32
  }
  func.func @transform_3(%arg0: i32) -> (i32, i32, i32) {
    %c0_i32 = arith.constant 0 : i32
    %c0_i32_0 = arith.constant 0 : i32
    %c0_i32_1 = arith.constant 0 : i32
    %c0_i32_2 = arith.constant 0 : i32
    return %c0_i32, %c0_i32_0, %c0_i32_1 : i32, i32, i32
  }
  func.func @transform_4(%arg0: i32) -> (i32, i32) {
    %c0_i32 = arith.constant 0 : i32
    %c0_i32_0 = arith.constant 0 : i32
    %c0_i32_1 = arith.constant 0 : i32
    return %c0_i32, %c0_i32_0 : i32, i32
  }
  func.func @transform_5(%arg0: i32) -> (i32, i32, i32) {
    %c0_i32 = arith.constant 0 : i32
    %c0_i32_0 = arith.constant 0 : i32
    %c0_i32_1 = arith.constant 0 : i32
    %c0_i32_2 = arith.constant 0 : i32
    return %c0_i32, %c0_i32_0, %c0_i32_1 : i32, i32, i32
  }
  func.func @transform_6(%arg0: i32) -> (i32, i32, i32) {
    %c0_i32 = arith.constant 0 : i32
    %c0_i32_0 = arith.constant 0 : i32
    %c0_i32_1 = arith.constant 0 : i32
    %c0_i32_2 = arith.constant 0 : i32
    return %c0_i32, %c0_i32_0, %c0_i32_1 : i32, i32, i32
  }
  func.func @transform_7(%arg0: i32) -> (i32, i32) {
    %c0_i32 = arith.constant 0 : i32
    %c0_i32_0 = arith.constant 0 : i32
    %c0_i32_1 = arith.constant 0 : i32
    return %c0_i32, %c0_i32_0 : i32, i32
  }
  func.func @transform_8(%arg0: i32) -> (i32, i32) {
    %c0_i32 = arith.constant 0 : i32
    %c0_i32_0 = arith.constant 0 : i32
    %c0_i32_1 = arith.constant 0 : i32
    return %c0_i32, %c0_i32_0 : i32, i32
  }
  func.func @transform_9(%arg0: i32) -> (i32, i32) {
    %c0_i32 = arith.constant 0 : i32
    %c0_i32_0 = arith.constant 0 : i32
    %c0_i32_1 = arith.constant 0 : i32
    return %c0_i32, %c0_i32_0 : i32, i32
  }
  func.func @transform_10(%arg0: i32) -> (i32, i32) {
    %c0_i32 = arith.constant 0 : i32
    %c0_i32_0 = arith.constant 0 : i32
    %c0_i32_1 = arith.constant 0 : i32
    return %c0_i32, %c0_i32_0 : i32, i32
  }
  func.func @transform_11(%arg0: i32) -> (i32, i32) {
    %c0_i32 = arith.constant 0 : i32
    %c0_i32_0 = arith.constant 0 : i32
    %c0_i32_1 = arith.constant 0 : i32
    return %c0_i32, %c0_i32_0 : i32, i32
  }
  func.func @transform_12(%arg0: i32) -> (i32, i32, i32) {
    %c0_i32 = arith.constant 0 : i32
    %c0_i32_0 = arith.constant 0 : i32
    %c0_i32_1 = arith.constant 0 : i32
    return %arg0, %c0_i32, %c0_i32_0 : i32, i32, i32
  }
}

</mosaic_0001>

<bundles_post_ra>
// kernel: tpu_custom_call.1
= control target key start
LH: loop header
LB: loop body
LE: loop exit
PB: predicated region body
PF: predicated region fallthrough
CT: control target
= control target key end

     0   :  { %s3921_s23 = smov 0   ;;  %s5459_s0 = inlined_call_operand.vmem [shape: f32[2,16,16,4], index: 0, kind: input, shape index: {}]   ;;  %s5460_s1 = inlined_call_operand.vmem [shape: f32[2,8,8,6], index: 1, kind: input, shape index: {}]   ;;  %s5461_s2 = inlined_call_operand.vmem [shape: f32[1,1,4], index: 2, kind: input, shape index: {}]   ;;  %s5462_s3 = inlined_call_operand.vmem [shape: f32[1,1,4], index: 3, kind: input, shape index: {}]   ;;  %s5463_s4 = inlined_call_operand.vmem [shape: f32[36,8], index: 4, kind: input, shape index: {}]   ;;  %s5464_s5 = inlined_call_operand.vmem [shape: f32[1,1,6], index: 5, kind: input, shape index: {}]   ;;  %s5465_s6 = inlined_call_operand.vmem [shape: f32[1,1,6], index: 6, kind: input, shape index: {}]   ;;  %s5466_s7 = inlined_call_operand.vmem [shape: f32[54,8], index: 7, kind: input, shape index: {}]   ;;  %s5467_s8 = inlined_call_operand.vmem [shape: f32[1,8], index: 8, kind: input, shape index: {}]   ;;  %s5468_s9 = inlined_call_operand.vmem [shape: f32[1,8], index: 9, kind: input, shape index: {}]   ;;  %s5469_s10 = inlined_call_operand.vmem [shape: f32[1,8], index: 10, kind: input, shape index: {}]   ;;  %s5470_s11 = inlined_call_operand.<no memory space> [shape: f32[1,1], index: 11, kind: input, shape index: {}]   ;;  %s5471_s12 = inlined_call_operand.vmem [shape: f32[2,64,6], index: 12, kind: output, shape index: {}]  }
   0x1   :  { %v17_v0 = vstv %s5470_s11 }
   0x2   :  { %18 = vst [vmem:[#allocation7] sm:$0x1] %v17_v0 }
   0x3 LB: > { %s3573_s24 = sadd.s32 4294967295, %s3835_s23   ;;  %p3577_p0 = scmp.ge.s32.totalorder %s3835_s23, 1  ;;  %s3835_s23 = sphi %s3921_s23, %s24_s23  }
   0x4   : > { %p374_p1 = scmp.lt.s32.totalorder %s3835_s23, 3 }
   0x6   : > { %p375_p2 = pnand %p3577_p0, %p374_p1 }
   0x8   : > { %378 = sbr.rel (%p375_p2) target bundleno = 1307 (0x51b), region = 68 }
   0xf   : > { %vm436_vm0 = vcmask 31744   ;;  %vm445_vm1 = vcmask 24576   ;;  %vm439_vm2 = vcmask 25600   ;;  %p3931_p3 = scmp.lt.s32.totalorder %s3573_s24, 1  ;;  %v5472_v1 = vmov 0.0   ;;  %s3838_s15 = smov 4  }
  0x10   : > { %437 = vst.msk [vmem:[#allocation2] sm:$0xff] %vm436_vm0, %v5472_v1  ;;  %438 = vst.msk [vmem:[#allocation2 + $0x8] sm:$0xff] %vm436_vm0, %v5472_v1  ;;  %v4029_v2 = vld [vmem:[%s5461_s2] ss:$0 sm:$0xff]  ;;  %s3839_s16 = smov 8   ;;  %vm909_vm3 = vcmask 64544  }
  0x11   : > { %442 = vst.msk [vmem:[#allocation2 + $0x198] sm:$0xff] %vm436_vm0, %v5472_v1  ;;  %443 = vst.msk [vmem:[#allocation2 + $0x1a0] sm:$0xff] %vm436_vm0, %v5472_v1  ;;  %s5510_s24 = smov (!%p3931_p3, %s3573_s24), 1  ;;  %v4039_v3 = vld [vmem:[%s5462_s3] ss:$0 sm:$0xff]  ;;  %s3840_s17 = smov 12  }
  0x12   : > { %447 = vst.msk [vmem:[#allocation2 + $0x18] sm:$0x1] %vm445_vm1, %v5472_v1  ;;  %448 = vst.msk [vmem:[#allocation2 + $0x30] sm:$0x1] %vm445_vm1, %v5472_v1  ;;  %s3636_s25 = sshll.u32 %s5510_s24, 8  ;;  %vm1102_vm4 = vcmask 97344  }
  0x13   : > { %449 = vst.msk [vmem:[#allocation2 + $0x48] sm:$0x1] %vm445_vm1, %v5472_v1  ;;  %450 = vst.msk [vmem:[#allocation2 + $0x60] sm:$0x1] %vm445_vm1, %v5472_v1  ;;  %s4034_s30 = scalar_lea.vmem %s5459_s0, %s3636_s25  ;;  %s3841_s18 = smov 16   ;;  %vm1295_vm5 = vcmask 130144  }
  0x14   : > { %451 = vst.msk [vmem:[#allocation2 + $0x78] sm:$0x1] %vm445_vm1, %v5472_v1  ;;  %452 = vst.msk [vmem:[#allocation2 + $0x90] sm:$0x1] %vm445_vm1, %v5472_v1  ;;  %v512_v4 = vld [vmem:[%s4034_s30 + $0x10] sm:$0xff]  ;;  %v510_v5 = vld [vmem:[%s4034_s30] sm:$0xff] }
  0x15   : > { %453 = vst.msk [vmem:[#allocation2 + $0xa8] sm:$0x1] %vm445_vm1, %v5472_v1  ;;  %454 = vst.msk [vmem:[#allocation2 + $0xc0] sm:$0x1] %vm445_vm1, %v5472_v1  ;;  %v514_v6 = vld [vmem:[%s4034_s30 + $0x20] sm:$0xff]  ;;  %v551_v7 = vmul.f32 %v4029_v2, %v512_v4  ;;  %v549_v8 = vmul.f32 %v4029_v2, %v510_v5  ;;  %v511_v10 = vld [vmem:[%s4034_s30 + $0x8] sm:$0xff] }
  0x16   : > { %455 = vst.msk [vmem:[#allocation2 + $0xd8] sm:$0x1] %vm445_vm1, %v5472_v1  ;;  %456 = vst.msk [vmem:[#allocation2 + $0xf0] sm:$0x1] %vm445_vm1, %v5472_v1  ;;  %v553_v9 = vmul.f32 %v4029_v2, %v514_v6  ;;  %v516_v11 = vld [vmem:[%s4034_s30 + $0x30] sm:$0xff]  ;;  %v513_v12 = vld [vmem:[%s4034_s30 + $0x18] sm:$0xff]  ;;  %v550_v14 = vmul.f32 %v4029_v2, %v511_v10 }
  0x17   : > { %457 = vst.msk [vmem:[#allocation2 + $0x108] sm:$0x1] %vm445_vm1, %v5472_v1  ;;  %458 = vst.msk [vmem:[#allocation2 + $0x120] sm:$0x1] %vm445_vm1, %v5472_v1  ;;  %v749_v13 = vld [vmem:[#allocation2 + $0x1] sm:$0xff]  ;;  %v555_v15 = vmul.f32 %v4029_v2, %v516_v11  ;;  %v552_v16 = vmul.f32 %v4029_v2, %v513_v12  ;;  %v590_v19 = vadd.f32 %v4039_v3, %v551_v7  ;;  %v520_v28 = vld [vmem:[%s4034_s30 + $0x50] sm:$0xff] }
  0x18   : > { %459 = vst.msk [vmem:[#allocation2 + $0x138] sm:$0x1] %vm445_vm1, %v5472_v1  ;;  %460 = vst.msk [vmem:[#allocation2 + $0x150] sm:$0x1] %vm445_vm1, %v5472_v1  ;;  %v518_v17 = vld [vmem:[%s4034_s30 + $0x40] sm:$0xff]  ;;  %813 = vrot.lane.b32.xlu0 %v749_v13, %s3838_s15  ;;  %v588_v20 = vadd.f32 %v4039_v3, %v549_v8  ;;  %v592_v21 = vadd.f32 %v4039_v3, %v553_v9  ;;  %v515_v23 = vld [vmem:[%s4034_s30 + $0x28] sm:$0xff]  ;;  %v589_v24 = vadd.f32 %v4039_v3, %v550_v14 }
  0x19   : > { %461 = vst.msk [vmem:[#allocation2 + $0x168] sm:$0x1] %vm445_vm1, %v5472_v1  ;;  %462 = vst.msk [vmem:[#allocation2 + $0x180] sm:$0x1] %vm445_vm1, %v5472_v1  ;;  %v557_v22 = vmul.f32 %v4029_v2, %v518_v17  ;;  %v594_v25 = vadd.f32 %v4039_v3, %v555_v15  ;;  %v591_v26 = vadd.f32 %v4039_v3, %v552_v16  ;;  %v517_v29 = vld [vmem:[%s4034_s30 + $0x38] sm:$0xff]  ;;  %v522_v30 = vld [vmem:[%s4034_s30 + $0x60] sm:$0xff] }
  0x1a   : > { %465 = vst.msk [vmem:[#allocation2 + $0x29] sm:$0x1] %vm445_vm1, %v5472_v1  ;;  %466 = vst.msk [vmem:[#allocation2 + $0x41] sm:$0x1] %vm445_vm1, %v5472_v1  ;;  %v554_v27 = vmul.f32 %v4029_v2, %v515_v23  ;;  %v622_v31 = vmax.f32 %v590_v19, 0.0  ;;  %v620_v32 = vmax.f32 %v588_v20, 0.0  ;;  %v559_v44 = vmul.f32 %v4029_v2, %v520_v28 }
  0x1b   : > { %467 = vst.msk [vmem:[#allocation2 + $0x59] sm:$0x1] %vm445_vm1, %v5472_v1  ;;  %468 = vst.msk [vmem:[#allocation2 + $0x71] sm:$0x1] %vm445_vm1, %v5472_v1  ;;  %v624_v33 = vmax.f32 %v592_v21, 0.0  ;;  %v596_v34 = vadd.f32 %v4039_v3, %v557_v22  ;;  %v519_v35 = vld [vmem:[%s4034_s30 + $0x48] sm:$0xff]  ;;  %v556_v45 = vmul.f32 %v4029_v2, %v517_v29  ;;  %v561_v46 = vmul.f32 %v4029_v2, %v522_v30 }
  0x1c   : > { %469 = vst.msk [vmem:[#allocation2 + $0x89] sm:$0x1] %vm445_vm1, %v5472_v1  ;;  %470 = vst.msk [vmem:[#allocation2 + $0xa1] sm:$0x1] %vm445_vm1, %v5472_v1  ;;  %v524_v36 = vld [vmem:[%s4034_s30 + $0x70] sm:$0xff]  ;;  %v521_v37 = vld [vmem:[%s4034_s30 + $0x58] sm:$0xff]  ;;  %v593_v41 = vadd.f32 %v4039_v3, %v554_v27  ;;  %v558_v49 = vmul.f32 %v4029_v2, %v519_v35  ;;  %v598_v52 = vadd.f32 %v4039_v3, %v559_v44 }
  0x1d   : > { %471 = vst.msk [vmem:[#allocation2 + $0xb9] sm:$0x1] %vm445_vm1, %v5472_v1  ;;  %472 = vst.msk [vmem:[#allocation2 + $0xd1] sm:$0x1] %vm445_vm1, %v5472_v1  ;;  %v621_v38 = vmax.f32 %v589_v24, 0.0  ;;  %v626_v39 = vmax.f32 %v594_v25, 0.0  ;;  %v563_v50 = vmul.f32 %v4029_v2, %v524_v36  ;;  %v560_v51 = vmul.f32 %v4029_v2, %v521_v37 }
  0x1e   : > { %473 = vst.msk [vmem:[#allocation2 + $0xe9] sm:$0x1] %vm445_vm1, %v5472_v1  ;;  %474 = vst.msk [vmem:[#allocation2 + $0x101] sm:$0x1] %vm445_vm1, %v5472_v1  ;;  %v623_v40 = vmax.f32 %v591_v26, 0.0  ;;  %v526_v42 = vld [vmem:[%s4034_s30 + $0x80] sm:$0xff]  ;;  %v595_v53 = vadd.f32 %v4039_v3, %v556_v45  ;;  %v600_v54 = vadd.f32 %v4039_v3, %v561_v46  ;;  %v597_v58 = vadd.f32 %v4039_v3, %v558_v49 }
  0x1f   : > { %475 = vst.msk [vmem:[#allocation2 + $0x119] sm:$0x1] %vm445_vm1, %v5472_v1  ;;  %476 = vst.msk [vmem:[#allocation2 + $0x131] sm:$0x1] %vm445_vm1, %v5472_v1  ;;  %v628_v43 = vmax.f32 %v596_v34, 0.0  ;;  %v523_v47 = vld [vmem:[%s4034_s30 + $0x68] sm:$0xff]  ;;  %v565_v55 = vmul.f32 %v4029_v2, %v526_v42  ;;  %v602_v59 = vadd.f32 %v4039_v3, %v563_v50  ;;  %v599_v60 = vadd.f32 %v4039_v3, %v560_v51 }
  0x20   : > { %477 = vst.msk [vmem:[#allocation2 + $0x149] sm:$0x1] %vm445_vm1, %v5472_v1  ;;  %478 = vst.msk [vmem:[#allocation2 + $0x161] sm:$0x1] %vm445_vm1, %v5472_v1  ;;  %v625_v48 = vmax.f32 %v593_v41, 0.0  ;;  %v528_v56 = vld [vmem:[%s4034_s30 + $0x90] sm:$0xff]  ;;  %v562_v61 = vmul.f32 %v4029_v2, %v523_v47 }
  0x21   : > { %479 = vst.msk [vmem:[#allocation2 + $0x179] sm:$0x1] %vm445_vm1, %v5472_v1  ;;  %480 = vst.msk [vmem:[#allocation2 + $0x191] sm:$0x1] %vm445_vm1, %v5472_v1  ;;  %v525_v57 = vld [vmem:[%s4034_s30 + $0x78] sm:$0xff]  ;;  %v530_v62 = vld [vmem:[%s4034_s30 + $0xa0] sm:$0xff]  ;;  %v604_v7 = vadd.f32 %v4039_v3, %v565_v55  ;;  %v567_v16 = vmul.f32 %v4029_v2, %v528_v56 }
  0x22   : > { %440 = vst.msk [vmem:[#allocation2 + $0x10] sm:$0x3] %vm439_vm2, %v5472_v1  ;;  %444 = vst.msk [vmem:[#allocation2 + $0x1a8] sm:$0x3] %vm439_vm2, %v5472_v1  ;;  %v527_v63 = vld [vmem:[%s4034_s30 + $0x88] sm:$0xff]  ;;  %v532_v0 = vld [vmem:[%s4034_s30 + $0xb0] sm:$0xff]  ;;  %v601_v14 = vadd.f32 %v4039_v3, %v562_v61  ;;  %v564_v17 = vmul.f32 %v4029_v2, %v525_v57 }
  0x23   : > { %446 = vst.msk [vmem:[#allocation2] sm:$0x1] %vm445_vm1, %v5472_v1  ;;  %463 = vst.msk [vmem:[#allocation2 + $0x198] sm:$0x1] %vm445_vm1, %v5472_v1  ;;  %v630_v4 = vmax.f32 %v598_v52, 0.0  ;;  %v627_v5 = vmax.f32 %v595_v53, 0.0  ;;  %v566_v23 = vmul.f32 %v4029_v2, %v527_v63  ;;  %v571_v24 = vmul.f32 %v4029_v2, %v532_v0 }
  0x24   : > { %464 = vst.msk [vmem:[#allocation2 + $0x11] sm:$0x1] %vm445_vm1, %v5472_v1  ;;  %481 = vst.msk [vmem:[#allocation2 + $0x1a9] sm:$0x1] %vm445_vm1, %v5472_v1  ;;  %v632_v6 = vmax.f32 %v600_v54, 0.0  ;;  %v529_v8 = vld [vmem:[%s4034_s30 + $0x98] sm:$0xff]  ;;  %v606_v27 = vadd.f32 %v4039_v3, %v567_v16  ;;  %v603_v28 = vadd.f32 %v4039_v3, %v564_v17 }
  0x25   : > { %655 = vst.msk [vmem:[#allocation2 + $0x31] sm:$0xff] %vm436_vm0, %v622_v31  ;;  %653 = vst.msk [vmem:[#allocation2 + $0x19] sm:$0xff] %vm436_vm0, %v620_v32  ;;  %v686_v10 = vld [vmem:[#allocation2 + $0x8] sm:$0xff]  ;;  %v629_v11 = vmax.f32 %v597_v58, 0.0  ;;  %v634_v12 = vmax.f32 %v602_v59, 0.0  ;;  %v631_v13 = vmax.f32 %v599_v60, 0.0  ;;  %v568_v25 = vmul.f32 %v4029_v2, %v529_v8 }
  0x26   : > { %657 = vst.msk [vmem:[#allocation2 + $0x49] sm:$0xff] %vm436_vm0, %v624_v33  ;;  %654 = vst.msk [vmem:[#allocation2 + $0x21] sm:$0xff] %vm436_vm0, %v621_v38  ;;  %v636_v15 = vmax.f32 %v604_v7, 0.0  ;;  %v534_v19 = vld [vmem:[%s4034_s30 + $0xc0] sm:$0xff]  ;;  %v633_v22 = vmax.f32 %v601_v14, 0.0  ;;  %v531_v26 = vld [vmem:[%s4034_s30 + $0xa8] sm:$0xff]  ;;  %v605_v33 = vadd.f32 %v4039_v3, %v566_v23  ;;  %v610_v34 = vadd.f32 %v4039_v3, %v571_v24 }
  0x27   : > { %659 = vst.msk [vmem:[#allocation2 + $0x61] sm:$0xff] %vm436_vm0, %v626_v39  ;;  %656 = vst.msk [vmem:[#allocation2 + $0x39] sm:$0xff] %vm436_vm0, %v623_v40  ;;  %v536_v30 = vld [vmem:[%s4034_s30 + $0xd0] sm:$0xff]  ;;  %v607_v35 = vadd.f32 %v4039_v3, %v568_v25  ;;  %v573_v36 = vmul.f32 %v4029_v2, %v534_v19  ;;  %v533_v37 = vld [vmem:[%s4034_s30 + $0xb8] sm:$0xff]  ;;  %v638_v38 = vmax.f32 %v606_v27, 0.0  ;;  %v635_v39 = vmax.f32 %v603_v28, 0.0 }
  0x28   : > { %661 = vst.msk [vmem:[#allocation2 + $0x79] sm:$0xff] %vm436_vm0, %v628_v43  ;;  %658 = vst.msk [vmem:[#allocation2 + $0x51] sm:$0xff] %vm436_vm0, %v625_v48  ;;  %v570_v41 = vmul.f32 %v4029_v2, %v531_v26  ;;  %v538_v42 = vld [vmem:[%s4034_s30 + $0xe0] sm:$0xff]  ;;  %v535_v43 = vld [vmem:[%s4034_s30 + $0xc8] sm:$0xff]  ;;  %v637_v45 = vmax.f32 %v605_v33, 0.0  ;;  %v642_v46 = vmax.f32 %v610_v34, 0.0  ;;  %v575_v52 = vmul.f32 %v4029_v2, %v536_v30 }
  0x29   : > { %v750_v18 = vld [vmem:[#allocation2 + $0x9] sm:$0xff]  ;;  %718 = vst.msk [vmem:[#allocation4 + $0x8] sm:$0xff] %vm436_vm0, %v686_v10  ;;  %663 = vst.msk [vmem:[#allocation2 + $0x91] sm:$0xff] %vm436_vm0, %v630_v4  ;;  %v537_v44 = vld [vmem:[%s4034_s30 + $0xd8] sm:$0xff]  ;;  %v639_v47 = vmax.f32 %v607_v35, 0.0  ;;  %v612_v48 = vadd.f32 %v4039_v3, %v573_v36  ;;  %v572_v53 = vmul.f32 %v4029_v2, %v533_v37  ;;  %v577_v60 = vmul.f32 %v4029_v2, %v538_v42  ;;  %s3842_s19 = smov 20  }
  0x2a   : > { %815 = vrot.lane.b32.xlu0 %v750_v18, %s3838_s15  ;;  %v685_v9 = vld [vmem:[#allocation2] sm:$0xff]  ;;  %660 = vst.msk [vmem:[#allocation2 + $0x69] sm:$0xff] %vm436_vm0, %v627_v5  ;;  %665 = vst.msk [vmem:[#allocation2 + $0xa9] sm:$0xff] %vm436_vm0, %v632_v6  ;;  %v569_v18 = vmul.f32 %v4029_v2, %v530_v62  ;;  %v539_v49 = vld [vmem:[%s4034_s30 + $0xe8] sm:$0xff]  ;;  %v609_v51 = vadd.f32 %v4039_v3, %v570_v41  ;;  %v574_v61 = vmul.f32 %v4029_v2, %v535_v43  ;;  %s3843_s25 = smov 24   ;;  %vm2428_vm6 = vcmask 1043456  }
  0x2b   : > { %717 = vst.msk [vmem:[#allocation4] sm:$0xff] %vm436_vm0, %v685_v9  ;;  %662 = vst.msk [vmem:[#allocation2 + $0x81] sm:$0xff] %vm436_vm0, %v629_v11  ;;  %v644_v59 = vmax.f32 %v612_v48, 0.0  ;;  %v576_v62 = vmul.f32 %v4029_v2, %v537_v44  ;;  %v614_v0 = vadd.f32 %v4039_v3, %v575_v52  ;;  %v611_v4 = vadd.f32 %v4039_v3, %v572_v53  ;;  %s3846_s29 = smov 6   ;;  %s3848_s13 = smov 30  }
  0x2c   : > { %v4114_v20 = vld [vmem:[#allocation2 + $0x31] sm:$0xff]  ;;  %v4116_v21 = vld [vmem:[#allocation2 + $0x19] sm:$0xff]  ;;  %667 = vst.msk [vmem:[#allocation2 + $0xc1] sm:$0xff] %vm436_vm0, %v634_v12  ;;  %664 = vst.msk [vmem:[#allocation2 + $0x99] sm:$0xff] %vm436_vm0, %v631_v13  ;;  %v608_v29 = vadd.f32 %v4039_v3, %v569_v18  ;;  %v641_v63 = vmax.f32 %v609_v51, 0.0  ;;  %v578_v5 = vmul.f32 %v4029_v2, %v539_v49  ;;  %v616_v6 = vadd.f32 %v4039_v3, %v577_v60  ;;  %s3849_s14 = smov 36  }
  0x2d   : > { %817 = vrot.lane.b32.xlu1 %v4116_v21, %s3838_s15  ;;  %669 = vst.msk [vmem:[#allocation2 + $0xd9] sm:$0xff] %vm436_vm0, %v636_v15  ;;  %v4134_v31 = vld [vmem:[#allocation2 + $0x49] sm:$0xff]  ;;  %v4136_v32 = vld [vmem:[#allocation2 + $0x21] sm:$0xff]  ;;  %666 = vst.msk [vmem:[#allocation2 + $0xb1] sm:$0xff] %vm436_vm0, %v633_v22  ;;  %v613_v7 = vadd.f32 %v4039_v3, %v574_v61  ;;  %v615_v8 = vadd.f32 %v4039_v3, %v576_v62  ;;  %v646_v9 = vmax.f32 %v614_v0, 0.0  ;;  %v643_v10 = vmax.f32 %v611_v4, 0.0 }
  0x2e   : > { %821 = vrot.lane.b32.xlu0 %v4114_v20, %s3838_s15  ;;  %v640_v40 = vmax.f32 %v608_v29, 0.0  ;;  %v4150_v50 = vld [vmem:[#allocation2 + $0x30] sm:$0xff]  ;;  %671 = vst.msk [vmem:[#allocation2 + $0xf1] sm:$0xff] %vm436_vm0, %v638_v38  ;;  %668 = vst.msk [vmem:[#allocation2 + $0xc9] sm:$0xff] %vm436_vm0, %v635_v39  ;;  %v4164_v54 = vld [vmem:[#allocation2 + $0x18] sm:$0xff]  ;;  %v617_v11 = vadd.f32 %v4039_v3, %v578_v5  ;;  %v648_v14 = vmax.f32 %v616_v6, 0.0 }
  0x2f   : > { %721 = vst.msk [vmem:[#allocation4 + $0x20] sm:$0xff] %vm436_vm0, %v4150_v50  ;;  %v4166_v55 = vld [vmem:[#allocation2 + $0x48] sm:$0xff]  ;;  %v4168_v56 = vld [vmem:[#allocation2 + $0x20] sm:$0xff]  ;;  %670 = vst.msk [vmem:[#allocation2 + $0xe1] sm:$0xff] %vm436_vm0, %v637_v45  ;;  %v645_v15 = vmax.f32 %v613_v7, 0.0  ;;  %v647_v16 = vmax.f32 %v615_v8, 0.0 }
  0x30   : > { %673 = vst.msk [vmem:[#allocation2 + $0x109] sm:$0xff] %vm436_vm0, %v640_v40  ;;  %v4170_v57 = vld [vmem:[#allocation2 + $0x61] sm:$0xff]  ;;  %v4172_v58 = vld [vmem:[#allocation2 + $0x39] sm:$0xff]  ;;  %675 = vst.msk [vmem:[#allocation2 + $0x121] sm:$0xff] %vm436_vm0, %v642_v46  ;;  %v649_v17 = vmax.f32 %v617_v11, 0.0  ;;  %vm1488_vm7 = vcmask 162944  }
  0x31   : > { %819 = vrot.lane.b32.xlu1 %v4136_v32, %s3838_s15  ;;  %672 = vst.msk [vmem:[#allocation2 + $0xf9] sm:$0xff] %vm436_vm0, %v639_v47  ;;  %719 = vst.msk [vmem:[#allocation4 + $0x10] sm:$0xff] %vm436_vm0, %v4164_v54  ;;  %v4199_v12 = vld [vmem:[#allocation2 + $0x79] sm:$0xff]  ;;  %v4201_v13 = vld [vmem:[#allocation2 + $0x51] sm:$0xff]  ;;  %vm482_vm8 = vcmask 48128   ;;  %vm484_vm9 = vcmask 41984  }
  0x32   : > { %825 = vrot.lane.b32.xlu0 %v4134_v31, %s3838_s15  ;;  %723 = vst.msk [vmem:[#allocation4 + $0x30] sm:$0xff] %vm436_vm0, %v4166_v55  ;;  %720 = vst.msk [vmem:[#allocation4 + $0x18] sm:$0xff] %vm436_vm0, %v4168_v56  ;;  %v4205_v18 = vld [vmem:[#allocation2 + $0x60] sm:$0xff]  ;;  %v4207_v19 = vld [vmem:[#allocation2 + $0x38] sm:$0xff]  ;;  %vm489_vm10 = vcmask 40960   ;;  %vm1681_vm11 = vcmask 195744  }
  0x33   : > { %677 = vst.msk [vmem:[#allocation2 + $0x139] sm:$0xff] %vm436_vm0, %v644_v59  ;;  %674 = vst.msk [vmem:[#allocation2 + $0x111] sm:$0xff] %vm436_vm0, %v641_v63  ;;  %v4221_v22 = vld [vmem:[#allocation2 + $0x91] sm:$0xff]  ;;  %v4223_v23 = vld [vmem:[#allocation2 + $0x69] sm:$0xff]  ;;  %vm1875_vm12 = vcmask 228544   ;;  %vm2068_vm13 = vcmask 261344  }
  0x34   : > { %679 = vst.msk [vmem:[#allocation2 + $0x151] sm:$0xff] %vm436_vm0, %v646_v9  ;;  %676 = vst.msk [vmem:[#allocation2 + $0x129] sm:$0xff] %vm436_vm0, %v643_v10  ;;  %v4229_v24 = vld [vmem:[#allocation2 + $0x78] sm:$0xff]  ;;  %v4231_v25 = vld [vmem:[#allocation2 + $0x50] sm:$0xff]  ;;  %vm2261_vm14 = vcmask 294144   ;;  %vm2331_vm15 = vcmask 293888  }
  0x35   : > { %823 = vrot.lane.b32.xlu1 %v4172_v58, %s3838_s15  ;;  %681 = vst.msk [vmem:[#allocation2 + $0x169] sm:$0xff] %vm436_vm0, %v648_v14  ;;  %678 = vst.msk [vmem:[#allocation2 + $0x141] sm:$0xff] %vm436_vm0, %v645_v15  ;;  %v4233_v26 = vld [vmem:[#allocation2 + $0xa9] sm:$0xff]  ;;  %v4235_v27 = vld [vmem:[#allocation2 + $0x81] sm:$0xff]  ;;  %vm2840_vm1 = vcmask 97328   ;;  %vm2889_vm2 = vcmask 146528  }
  0x36   : > { %829 = vrot.lane.b32.xlu0 %v4170_v57, %s3838_s15  ;;  %680 = vst.msk [vmem:[#allocation2 + $0x159] sm:$0xff] %vm436_vm0, %v647_v16  ;;  %725 = vst.msk [vmem:[#allocation4 + $0x40] sm:$0xff] %vm436_vm0, %v4205_v18  ;;  %v4245_v28 = vld [vmem:[#allocation2 + $0xc1] sm:$0xff]  ;;  %v4247_v29 = vld [vmem:[#allocation2 + $0x99] sm:$0xff] }
  0x37   : > { %722 = vst.msk [vmem:[#allocation4 + $0x28] sm:$0xff] %vm436_vm0, %v4207_v19  ;;  %682 = vst.msk [vmem:[#allocation2 + $0x171] sm:$0xff] %vm436_vm0, %v649_v17  ;;  %v4249_v30 = vld [vmem:[#allocation2 + $0x90] sm:$0xff]  ;;  %v4253_v33 = vld [vmem:[#allocation2 + $0x68] sm:$0xff] }
  0x38   : > { %727 = vst.msk [vmem:[#allocation4 + $0x50] sm:$0xff] %vm436_vm0, %v4229_v24  ;;  %724 = vst.msk [vmem:[#allocation4 + $0x38] sm:$0xff] %vm436_vm0, %v4231_v25  ;;  %v4255_v34 = vld [vmem:[#allocation2 + $0xa8] sm:$0xff]  ;;  %v4257_v35 = vld [vmem:[#allocation2 + $0x80] sm:$0xff] }
  0x39   : > { %827 = vrot.lane.b32.xlu1 %v4201_v13, %s3838_s15  ;;  %729 = vst.msk [vmem:[#allocation4 + $0x60] sm:$0xff] %vm436_vm0, %v4249_v30  ;;  %v4259_v36 = vld [vmem:[#allocation2 + $0xd9] sm:$0xff]  ;;  %v4261_v37 = vld [vmem:[#allocation2 + $0xb1] sm:$0xff]  ;;  %726 = vst.msk [vmem:[#allocation4 + $0x48] sm:$0xff] %vm436_vm0, %v4253_v33 }
  0x3a   : > { %833 = vrot.lane.b32.xlu0 %v4199_v12, %s3838_s15  ;;  %731 = vst.msk [vmem:[#allocation4 + $0x70] sm:$0xff] %vm436_vm0, %v4255_v34  ;;  %728 = vst.msk [vmem:[#allocation4 + $0x58] sm:$0xff] %vm436_vm0, %v4257_v35  ;;  %v4269_v38 = vld [vmem:[#allocation2 + $0xc0] sm:$0xff]  ;;  %v4271_v39 = vld [vmem:[#allocation2 + $0x98] sm:$0xff] }
  0x3b   : > { %v4273_v40 = vld [vmem:[#allocation2 + $0xd8] sm:$0xff]  ;;  %733 = vst.msk [vmem:[#allocation4 + $0x80] sm:$0xff] %vm436_vm0, %v4269_v38  ;;  %730 = vst.msk [vmem:[#allocation4 + $0x68] sm:$0xff] %vm436_vm0, %v4271_v39  ;;  %v4285_v41 = vld [vmem:[#allocation2 + $0xb0] sm:$0xff] }
  0x3c   : > { %735 = vst.msk [vmem:[#allocation4 + $0x90] sm:$0xff] %vm436_vm0, %v4273_v40  ;;  %v4287_v42 = vld [vmem:[#allocation2 + $0xf0] sm:$0xff]  ;;  %v4289_v43 = vld [vmem:[#allocation2 + $0xc8] sm:$0xff]  ;;  %732 = vst.msk [vmem:[#allocation4 + $0x78] sm:$0xff] %vm436_vm0, %v4285_v41 }
  0x3d   : > { %831 = vrot.lane.b32.xlu1 %v4223_v23, %s3838_s15  ;;  %737 = vst.msk [vmem:[#allocation4 + $0xa0] sm:$0xff] %vm436_vm0, %v4287_v42  ;;  %734 = vst.msk [vmem:[#allocation4 + $0x88] sm:$0xff] %vm436_vm0, %v4289_v43  ;;  %v4297_v44 = vld [vmem:[#allocation2 + $0x108] sm:$0xff]  ;;  %v4299_v45 = vld [vmem:[#allocation2 + $0xe0] sm:$0xff] }
  0x3e   : > { %837 = vrot.lane.b32.xlu0 %v4221_v22, %s3838_s15  ;;  %v4301_v46 = vld [vmem:[#allocation2 + $0x120] sm:$0xff]  ;;  %739 = vst.msk [vmem:[#allocation4 + $0xb0] sm:$0xff] %vm436_vm0, %v4297_v44  ;;  %736 = vst.msk [vmem:[#allocation4 + $0x98] sm:$0xff] %vm436_vm0, %v4299_v45  ;;  %v4309_v47 = vld [vmem:[#allocation2 + $0xf8] sm:$0xff] }
  0x3f   : > { %741 = vst.msk [vmem:[#allocation4 + $0xc0] sm:$0xff] %vm436_vm0, %v4301_v46  ;;  %738 = vst.msk [vmem:[#allocation4 + $0xa8] sm:$0xff] %vm436_vm0, %v4309_v47  ;;  %v4317_v48 = vld [vmem:[#allocation2 + $0x138] sm:$0xff]  ;;  %v4321_v51 = vld [vmem:[#allocation2 + $0xc9] sm:$0xff] }
  0x40   : > { %v4319_v49 = vld [vmem:[#allocation2 + $0xf1] sm:$0xff]  ;;  %743 = vst.msk [vmem:[#allocation4 + $0xd0] sm:$0xff] %vm436_vm0, %v4317_v48  ;;  %v4335_v59 = vld [vmem:[#allocation2 + $0x109] sm:$0xff]  ;;  %v4337_v60 = vld [vmem:[#allocation2 + $0xe1] sm:$0xff] }
  0x41   : > { %835 = vrot.lane.b32.xlu1 %v4235_v27, %s3838_s15  ;;  %v4325_v52 = vld [vmem:[#allocation2 + $0x110] sm:$0xff]  ;;  %v4341_v61 = vld [vmem:[#allocation2 + $0x128] sm:$0xff]  ;;  %v4353_v0 = vld [vmem:[#allocation2 + $0xf9] sm:$0xff] }
  0x42   : > { %841 = vrot.lane.b32.xlu0 %v4233_v26, %s3838_s15  ;;  %740 = vst.msk [vmem:[#allocation4 + $0xb8] sm:$0xff] %vm436_vm0, %v4325_v52  ;;  %v4333_v53 = vld [vmem:[#allocation2 + $0x150] sm:$0xff]  ;;  %742 = vst.msk [vmem:[#allocation4 + $0xc8] sm:$0xff] %vm436_vm0, %v4341_v61  ;;  %v4349_v62 = vld [vmem:[#allocation2 + $0x121] sm:$0xff] }
  0x43   : > { %745 = vst.msk [vmem:[#allocation4 + $0xe0] sm:$0xff] %vm436_vm0, %v4333_v53  ;;  %v4351_v63 = vld [vmem:[#allocation2 + $0x168] sm:$0xff]  ;;  %v4357_v4 = vld [vmem:[#allocation2 + $0x140] sm:$0xff]  ;;  %v540_v5 = vld [vmem:[%s4034_s30 + $0xf0] sm:$0xff] }
  0x44   : > { %747 = vst.msk [vmem:[#allocation4 + $0xf0] sm:$0xff] %vm436_vm0, %v4351_v63  ;;  %744 = vst.msk [vmem:[#allocation4 + $0xd8] sm:$0xff] %vm436_vm0, %v4357_v4  ;;  %v579_v6 = vmul.f32 %v4029_v2, %v540_v5  ;;  %v775_v8 = vld [vmem:[#allocation2 + $0x139] sm:$0xff]  ;;  %v4368_v9 = vld [vmem:[#allocation2 + $0x111] sm:$0xff] }
  0x45   : > { %839 = vrot.lane.b32.xlu1 %v4247_v29, %s3838_s15  ;;  %5490 = vst [vmem:[#allocation8_spill] sm:$0xff] %v4368_v9  ;;  %v4370_v10 = vld [vmem:[#allocation2 + $0x158] sm:$0xff]  ;;  %v774_v15 = vld [vmem:[#allocation2 + $0x129] sm:$0xff] }
  0x46   : > { %845 = vrot.lane.b32.xlu0 %v4245_v28, %s3838_s15  ;;  %v618_v7 = vadd.f32 %v4039_v3, %v579_v6  ;;  %746 = vst.msk [vmem:[#allocation4 + $0xe8] sm:$0xff] %vm436_vm0, %v4370_v10  ;;  %v777_v14 = vld [vmem:[#allocation2 + $0x151] sm:$0xff] }
  0x47   : > { %v4378_v16 = vld [vmem:[#allocation2 + $0x170] sm:$0xff]  ;;  %v541_v17 = vld [vmem:[%s4034_s30 + $0xf8] sm:$0xff]  ;;  %s3844_s30 = smov 28  }
  0x48   : > { %v650_v11 = vmax.f32 %v618_v7, 0.0  ;;  %748 = vst.msk [vmem:[#allocation4 + $0xf8] sm:$0xff] %vm436_vm0, %v4378_v16  ;;  %v580_v5 = vmul.f32 %v4029_v2, %v541_v17  ;;  %v779_v7 = vld [vmem:[#allocation2 + $0x169] sm:$0xff]  ;;  %v4392_v2 = vld [vmem:[#allocation2 + $0x1a] sm:$0xff] }
  0x49   : > { %843 = vrot.lane.b32.xlu1 %v4261_v37, %s3838_s15  ;;  %v4404_v17 = vld [vmem:[#allocation2 + $0x22] sm:$0xff] }
  0x4a   : > { %849 = vrot.lane.b32.xlu0 %v4259_v36, %s3838_s15  ;;  %683 = vst.msk [vmem:[#allocation2 + $0x181] sm:$0xff] %vm436_vm0, %v650_v11  ;;  %v619_v6 = vadd.f32 %v4039_v3, %v580_v5  ;;  %v942_v11 = vld [vmem:[#allocation2 + $0x2] sm:$0xff]  ;;  %v4397_v3 = vld [vmem:[#allocation2 + $0x32] sm:$0xff]  ;;  %v4412_v5 = vld [vmem:[#allocation2 + $0x3a] sm:$0xff] }
  0x4b   : > { %5493 = vst [vmem:[#allocation11_spill] sm:$0xff] %v4412_v5 }
  0x4c   : > { %v651_v1 = vmax.f32 %v619_v6, 0.0  ;;  %v952_v6 = vld [vmem:[#allocation2 + $0x7a] sm:$0xff] }
  0x4d   : > { %847 = vrot.lane.b32.xlu1 %v4321_v51, %s3838_s15 }
  0x4e   : > { %853 = vrot.lane.b32.xlu0 %v4319_v49, %s3838_s15  ;;  %684 = vst.msk [vmem:[#allocation2 + $0x189] sm:$0xff] %vm436_vm0, %v651_v1  ;;  %v4402_v1 = vld [vmem:[#allocation2 + $0x4a] sm:$0xff]  ;;  %vm3233_vm0 = vcmask 1045504  }
  0x4f   : > { %5491 = vst [vmem:[#allocation9_spill] sm:$0xff] %v4402_v1 }
  0x51   : > { %851 = vrot.lane.b32.xlu1 %v4337_v60, %s3838_s15 }
  0x52   : > { %857 = vrot.lane.b32.xlu0 %v4335_v59, %s3838_s15 }
  0x55   : > { %855 = vrot.lane.b32.xlu1 %v4353_v0, %s3838_s15 }
  0x56   : > { %861 = vrot.lane.b32.xlu0 %v4349_v62, %s3838_s15 }
  0x59   : > { %859 = vrot.lane.b32.xlu1 %v4368_v9, %s3838_s15  ;;  %v778_v9 = vld [vmem:[#allocation2 + $0x159] sm:$0xff] }
  0x5a   : > { %865 = vrot.lane.b32.xlu0 %v775_v8, %s3838_s15  ;;  %v776_v8 = vld [vmem:[#allocation2 + $0x141] sm:$0xff] }
  0x5d   : > { %863 = vrot.lane.b32.xlu1 %v774_v15, %s3838_s15  ;;  %v943_v15 = vld [vmem:[#allocation2 + $0xa] sm:$0xff] }
  0x5e   : > { %869 = vrot.lane.b32.xlu0 %v777_v14, %s3838_s15  ;;  %v780_v14 = vld [vmem:[#allocation2 + $0x171] sm:$0xff] }
  0x61   : > { %867 = vrot.lane.b32.xlu1 %v776_v8, %s3838_s15  ;;  %v954_v8 = vld [vmem:[#allocation2 + $0x92] sm:$0xff] }
  0x62   : > { %873 = vrot.lane.b32.xlu0 %v779_v7, %s3838_s15  ;;  %v4418_v7 = vld [vmem:[#allocation2 + $0x52] sm:$0xff] }
  0x63   : > { %5494 = vst [vmem:[#allocation12_spill] sm:$0xff] %v4418_v7 }
  0x65   : > { %871 = vrot.lane.b32.xlu1 %v778_v9, %s3838_s15  ;;  %v4410_v9 = vld [vmem:[#allocation2 + $0x62] sm:$0xff] }
  0x66   : > { %1006 = vrot.lane.b32.xlu0 %v942_v11, %s3839_s16  ;;  %5492 = vst [vmem:[#allocation10_spill] sm:$0xff] %v4410_v9  ;;  %v4423_v11 = vld [vmem:[#allocation2 + $0x6a] sm:$0xff] }
  0x67   : > { %5495 = vst [vmem:[#allocation13_spill] sm:$0xff] %v4423_v11 }
  0x69   : > { %875 = vrot.lane.b32.xlu1 %v780_v14, %s3838_s15  ;;  %v956_v14 = vld [vmem:[#allocation2 + $0xaa] sm:$0xff]  ;;  %s3845_s15 = smov 32  }
  0x6a   : > { %1010 = vrot.lane.b32.xlu0 %v4392_v2, %s3839_s16 }
  0x6d   : > { %1008 = vrot.lane.b32.xlu1 %v943_v15, %s3839_s16  ;;  %v953_v15 = vld [vmem:[#allocation2 + $0x82] sm:$0xff] }
  0x6e   : > { %1014 = vrot.lane.b32.xlu0 %v4397_v3, %s3839_s16 }
  0x71   : > { %1012 = vrot.lane.b32.xlu1 %v4404_v17, %s3839_s16 }
  0x72   : > { %1018 = vrot.lane.b32.xlu0 %v4402_v1, %s3839_s16  ;;  %v955_v1 = vld [vmem:[#allocation2 + $0x9a] sm:$0xff] }
  0x75   : > { %1016 = vrot.lane.b32.xlu1 %v4412_v5, %s3839_s16 }
  0x76   : > { %1022 = vrot.lane.b32.xlu0 %v4410_v9, %s3839_s16  ;;  %v958_v9 = vld [vmem:[#allocation2 + $0xc2] sm:$0xff] }
  0x79   : > { %1020 = vrot.lane.b32.xlu1 %v4418_v7, %s3839_s16  ;;  %v957_v7 = vld [vmem:[#allocation2 + $0xb2] sm:$0xff] }
  0x7a   : > { %1026 = vrot.lane.b32.xlu0 %v952_v6, %s3839_s16  ;;  %v960_v6 = vld [vmem:[#allocation2 + $0xda] sm:$0xff] }
  0x7d   : > { %1024 = vrot.lane.b32.xlu1 %v4423_v11, %s3839_s16  ;;  %v959_v11 = vld [vmem:[#allocation2 + $0xca] sm:$0xff] }
  0x7e   : > { %1030 = vrot.lane.b32.xlu0 %v954_v8, %s3839_s16  ;;  %v962_v8 = vld [vmem:[#allocation2 + $0xf2] sm:$0xff] }
  0x81   : > { %1028 = vrot.lane.b32.xlu1 %v953_v15, %s3839_s16  ;;  %v961_v15 = vld [vmem:[#allocation2 + $0xe2] sm:$0xff] }
  0x82   : > { %1034 = vrot.lane.b32.xlu0 %v956_v14, %s3839_s16  ;;  %v4436_v14 = vld [vmem:[#allocation2 + $0x10a] sm:$0xff] }
  0x83   : > { %5496 = vst [vmem:[#allocation14_spill] sm:$0xff] %v4436_v14 }
  0x85   : > { %1032 = vrot.lane.b32.xlu1 %v955_v1, %s3839_s16  ;;  %v4441_v1 = vld [vmem:[#allocation2 + $0x122] sm:$0xff] }
  0x86   : > { %1038 = vrot.lane.b32.xlu0 %v958_v9, %s3839_s16  ;;  %5497 = vst [vmem:[#allocation15_spill] sm:$0xff] %v4441_v1  ;;  %v963_v9 = vld [vmem:[#allocation2 + $0xfa] sm:$0xff] }
  0x89   : > { %1036 = vrot.lane.b32.xlu1 %v957_v7, %s3839_s16  ;;  %v968_v7 = vld [vmem:[#allocation2 + $0x13a] sm:$0xff] }
  0x8a   : > { %1042 = vrot.lane.b32.xlu0 %v960_v6, %s3839_s16  ;;  %v814_v6 = vpop.permute.xlu0 %813 }
  0x8b   : > { %910 = vst.msk [vmem:[#allocation4] sm:$0xff] %vm909_vm3, %v814_v6  ;;  %v969_v6 = vld [vmem:[#allocation2 + $0x142] sm:$0xff] }
  0x8d   : > { %1040 = vrot.lane.b32.xlu1 %v959_v11, %s3839_s16  ;;  %v4447_v11 = vld [vmem:[#allocation2 + $0x112] sm:$0xff] }
  0x8e   : > { %1046 = vrot.lane.b32.xlu0 %v962_v8, %s3839_s16  ;;  %5498 = vst [vmem:[#allocation16_spill] sm:$0xff] %v4447_v11 }
  0x91   : > { %1044 = vrot.lane.b32.xlu1 %v961_v15, %s3839_s16  ;;  %v970_v15 = vld [vmem:[#allocation2 + $0x152] sm:$0xff] }
  0x92   : > { %1050 = vrot.lane.b32.xlu0 %v4436_v14, %s3839_s16  ;;  %v4453_v14 = vld [vmem:[#allocation2 + $0x12a] sm:$0xff] }
  0x95   : > { %1048 = vrot.lane.b32.xlu1 %v963_v9, %s3839_s16  ;;  %v972_v9 = vld [vmem:[#allocation2 + $0x16a] sm:$0xff] }
  0x96   : > { %1054 = vrot.lane.b32.xlu0 %v4441_v1, %s3839_s16 }
  0x99   : > { %1052 = vrot.lane.b32.xlu1 %v4447_v11, %s3839_s16 }
  0x9a   : > { %1058 = vrot.lane.b32.xlu0 %v968_v7, %s3839_s16  ;;  %v971_v7 = vld [vmem:[#allocation2 + $0x15a] sm:$0xff] }
  0x9c   : > { %v816_v8 = vpop.permute.xlu0 %815 }
  0x9d   : > { %911 = vst.msk [vmem:[#allocation4 + $0x8] sm:$0xff] %vm909_vm3, %v816_v8  ;;  %1056 = vrot.lane.b32.xlu1 %v4453_v14, %s3839_s16 }
  0x9e   : > { %1062 = vrot.lane.b32.xlu0 %v970_v15, %s3839_s16 }
  0x9f   : > { %v818_v5 = vpop.permute.xlu1 %817 }
  0xa0   : > { %v822_v1 = vpop.permute.xlu0 %821  ;;  %912 = vst.msk [vmem:[#allocation4 + $0x10] sm:$0xff] %vm909_vm3, %v818_v5 }
  0xa1   : > { %914 = vst.msk [vmem:[#allocation4 + $0x20] sm:$0xff] %vm909_vm3, %v822_v1  ;;  %1060 = vrot.lane.b32.xlu1 %v969_v6, %s3839_s16  ;;  %v973_v1 = vld [vmem:[#allocation2 + $0x172] sm:$0xff] }
  0xa2   : > { %1066 = vrot.lane.b32.xlu0 %v972_v9, %s3839_s16 }
  0xa3   : > { %v820_v11 = vpop.permute.xlu1 %819 }
  0xa4   : > { %v826_v8 = vpop.permute.xlu0 %825  ;;  %913 = vst.msk [vmem:[#allocation4 + $0x18] sm:$0xff] %vm909_vm3, %v820_v11 }
  0xa5   : > { %916 = vst.msk [vmem:[#allocation4 + $0x30] sm:$0xff] %vm909_vm3, %v826_v8  ;;  %1064 = vrot.lane.b32.xlu1 %v971_v7, %s3839_s16 }
  0xa6   : > { %1199 = vrot.lane.b32.xlu0 %v4164_v54, %s3840_s17 }
  0xa7   : > { %v824_v5 = vpop.permute.xlu1 %823 }
  0xa8   : > { %v830_v15 = vpop.permute.xlu0 %829  ;;  %915 = vst.msk [vmem:[#allocation4 + $0x28] sm:$0xff] %vm909_vm3, %v824_v5 }
  0xa9   : > { %918 = vst.msk [vmem:[#allocation4 + $0x40] sm:$0xff] %vm909_vm3, %v830_v15  ;;  %1068 = vrot.lane.b32.xlu1 %v973_v1, %s3839_s16  ;;  %s3637_s16 = sshll.u32 %s5510_s24, 6 }
  0xaa   : > { %1203 = vrot.lane.b32.xlu0 %v4150_v50, %s3840_s17  ;;  %s4792_s22 = scalar_lea.vmem %s5460_s1, %s3637_s16 }
  0xab   : > { %v828_v11 = vpop.permute.xlu1 %827 }
  0xac   : > { %v834_v9 = vpop.permute.xlu0 %833  ;;  %917 = vst.msk [vmem:[#allocation4 + $0x38] sm:$0xff] %vm909_vm3, %v828_v11 }
  0xad   : > { %920 = vst.msk [vmem:[#allocation4 + $0x50] sm:$0xff] %vm909_vm3, %v834_v9  ;;  %1201 = vrot.lane.b32.xlu1 %v4168_v56, %s3840_s17 }
  0xae   : > { %1207 = vrot.lane.b32.xlu0 %v4166_v55, %s3840_s17 }
  0xaf   : > { %v832_v6 = vpop.permute.xlu1 %831 }
  0xb0   : > { %v838_v54 = vpop.permute.xlu0 %837  ;;  %919 = vst.msk [vmem:[#allocation4 + $0x48] sm:$0xff] %vm909_vm3, %v832_v6 }
  0xb1   : > { %922 = vst.msk [vmem:[#allocation4 + $0x60] sm:$0xff] %vm909_vm3, %v838_v54  ;;  %1205 = vrot.lane.b32.xlu1 %v4207_v19, %s3840_s17 }
  0xb2   : > { %1211 = vrot.lane.b32.xlu0 %v4205_v18, %s3840_s17 }
  0xb3   : > { %v836_v8 = vpop.permute.xlu1 %835 }
  0xb4   : > { %v842_v7 = vpop.permute.xlu0 %841  ;;  %921 = vst.msk [vmem:[#allocation4 + $0x58] sm:$0xff] %vm909_vm3, %v836_v8 }
  0xb5   : > { %924 = vst.msk [vmem:[#allocation4 + $0x70] sm:$0xff] %vm909_vm3, %v842_v7  ;;  %1209 = vrot.lane.b32.xlu1 %v4231_v25, %s3840_s17 }
  0xb6   : > { %1215 = vrot.lane.b32.xlu0 %v4229_v24, %s3840_s17 }
  0xb7   : > { %v840_v1 = vpop.permute.xlu1 %839 }
  0xb8   : > { %v846_v56 = vpop.permute.xlu0 %845  ;;  %923 = vst.msk [vmem:[#allocation4 + $0x68] sm:$0xff] %vm909_vm3, %v840_v1 }
  0xb9   : > { %926 = vst.msk [vmem:[#allocation4 + $0x80] sm:$0xff] %vm909_vm3, %v846_v56  ;;  %1213 = vrot.lane.b32.xlu1 %v4253_v33, %s3840_s17 }
  0xba   : > { %1219 = vrot.lane.b32.xlu0 %v4249_v30, %s3840_s17 }
  0xbb   : > { %v844_v5 = vpop.permute.xlu1 %843 }
  0xbc   : > { %v850_v15 = vpop.permute.xlu0 %849  ;;  %925 = vst.msk [vmem:[#allocation4 + $0x78] sm:$0xff] %vm909_vm3, %v844_v5 }
  0xbd   : > { %928 = vst.msk [vmem:[#allocation4 + $0x90] sm:$0xff] %vm909_vm3, %v850_v15  ;;  %1217 = vrot.lane.b32.xlu1 %v4257_v35, %s3840_s17 }
  0xbe   : > { %1223 = vrot.lane.b32.xlu0 %v4255_v34, %s3840_s17 }
  0xbf   : > { %v848_v11 = vpop.permute.xlu1 %847 }
  0xc0   : > { %v854_v9 = vpop.permute.xlu0 %853  ;;  %927 = vst.msk [vmem:[#allocation4 + $0x88] sm:$0xff] %vm909_vm3, %v848_v11 }
  0xc1   : > { %930 = vst.msk [vmem:[#allocation4 + $0xa0] sm:$0xff] %vm909_vm3, %v854_v9  ;;  %1221 = vrot.lane.b32.xlu1 %v4271_v39, %s3840_s17 }
  0xc2   : > { %1227 = vrot.lane.b32.xlu0 %v4269_v38, %s3840_s17 }
  0xc3   : > { %v852_v6 = vpop.permute.xlu1 %851 }
  0xc4   : > { %v858_v54 = vpop.permute.xlu0 %857  ;;  %929 = vst.msk [vmem:[#allocation4 + $0x98] sm:$0xff] %vm909_vm3, %v852_v6 }
  0xc5   : > { %932 = vst.msk [vmem:[#allocation4 + $0xb0] sm:$0xff] %vm909_vm3, %v858_v54  ;;  %1225 = vrot.lane.b32.xlu1 %v4285_v41, %s3840_s17 }
  0xc6   : > { %1231 = vrot.lane.b32.xlu0 %v4273_v40, %s3840_s17 }
  0xc7   : > { %v856_v8 = vpop.permute.xlu1 %855 }
  0xc8   : > { %v862_v7 = vpop.permute.xlu0 %861  ;;  %931 = vst.msk [vmem:[#allocation4 + $0xa8] sm:$0xff] %vm909_vm3, %v856_v8 }
  0xc9   : > { %934 = vst.msk [vmem:[#allocation4 + $0xc0] sm:$0xff] %vm909_vm3, %v862_v7  ;;  %1229 = vrot.lane.b32.xlu1 %v4289_v43, %s3840_s17 }
  0xca   : > { %1235 = vrot.lane.b32.xlu0 %v4287_v42, %s3840_s17 }
  0xcb   : > { %v860_v56 = vpop.permute.xlu1 %859 }
  0xcc   : > { %v866_v38 = vpop.permute.xlu0 %865  ;;  %933 = vst.msk [vmem:[#allocation4 + $0xb8] sm:$0xff] %vm909_vm3, %v860_v56 }
  0xcd   : > { %936 = vst.msk [vmem:[#allocation4 + $0xd0] sm:$0xff] %vm909_vm3, %v866_v38  ;;  %1233 = vrot.lane.b32.xlu1 %v4299_v45, %s3840_s17 }
  0xce   : > { %1239 = vrot.lane.b32.xlu0 %v4297_v44, %s3840_s17 }
  0xcf   : > { %v864_v1 = vpop.permute.xlu1 %863 }
  0xd0   : > { %v870_v40 = vpop.permute.xlu0 %869  ;;  %935 = vst.msk [vmem:[#allocation4 + $0xc8] sm:$0xff] %vm909_vm3, %v864_v1 }
  0xd1   : > { %938 = vst.msk [vmem:[#allocation4 + $0xe0] sm:$0xff] %vm909_vm3, %v870_v40  ;;  %1237 = vrot.lane.b32.xlu1 %v4309_v47, %s3840_s17 }
  0xd2   : > { %1243 = vrot.lane.b32.xlu0 %v4301_v46, %s3840_s17 }
  0xd3   : > { %v868_v43 = vpop.permute.xlu1 %867 }
  0xd4   : > { %v874_v42 = vpop.permute.xlu0 %873  ;;  %937 = vst.msk [vmem:[#allocation4 + $0xd8] sm:$0xff] %vm909_vm3, %v868_v43 }
  0xd5   : > { %940 = vst.msk [vmem:[#allocation4 + $0xf0] sm:$0xff] %vm909_vm3, %v874_v42  ;;  %1241 = vrot.lane.b32.xlu1 %v4325_v52, %s3840_s17  ;;  %v1165_v52 = vld [vmem:[#allocation2 + $0x180] sm:$0xff] }
  0xd6   : > { %1247 = vrot.lane.b32.xlu0 %v4317_v48, %s3840_s17 }
  0xd7   : > { %v872_v45 = vpop.permute.xlu1 %871 }
  0xd8   : > { %v1007_v44 = vpop.permute.xlu0 %1006  ;;  %939 = vst.msk [vmem:[#allocation4 + $0xe8] sm:$0xff] %vm909_vm3, %v872_v45  ;;  %v2328_v45 = vld [vmem:[%s5463_s4 + $0x10] sm:$0xff] }
  0xd9   : > { %1103 = vst.msk [vmem:[#allocation4] sm:$0xff] %vm1102_vm4, %v1007_v44  ;;  %1245 = vrot.lane.b32.xlu1 %v4341_v61, %s3840_s17 }
  0xda   : > { %1251 = vrot.lane.b32.xlu0 %v4333_v53, %s3840_s17 }
  0xdb   : > { %v876_v15 = vpop.permute.xlu1 %875 }
  0xdc   : > { %v1011_v47 = vpop.permute.xlu0 %1010  ;;  %941 = vst.msk [vmem:[#allocation4 + $0xf8] sm:$0xff] %vm909_vm3, %v876_v15  ;;  %vm2938_vm3 = vcmask 195728  }
  0xdd   : > { %1105 = vst.msk [vmem:[#allocation4 + $0x10] sm:$0xff] %vm1102_vm4, %v1011_v47  ;;  %1249 = vrot.lane.b32.xlu1 %v4357_v4, %s3840_s17  ;;  %v2329_v47 = vld [vmem:[%s5463_s4 + $0x18] sm:$0xff] }
  0xde   : > { %1255 = vrot.lane.b32.xlu0 %v4351_v63, %s3840_s17  ;;  %v1166_v63 = vld [vmem:[#allocation2 + $0x188] sm:$0xff] }
  0xdf   : > { %v1009_v9 = vpop.permute.xlu1 %1008 }
  0xe0   : > { %v1015_v5 = vpop.permute.xlu0 %1014  ;;  %1104 = vst.msk [vmem:[#allocation4 + $0x8] sm:$0xff] %vm1102_vm4, %v1009_v9 }
  0xe1   : > { %1107 = vst.msk [vmem:[#allocation4 + $0x20] sm:$0xff] %vm1102_vm4, %v1015_v5  ;;  %1253 = vrot.lane.b32.xlu1 %v4370_v10, %s3840_s17 }
  0xe2   : > { %1259 = vrot.lane.b32.xlu0 %v1165_v52, %s3840_s17 }
  0xe3   : > { %v1013_v54 = vpop.permute.xlu1 %1012 }
  0xe4   : > { %v1019_v11 = vpop.permute.xlu0 %1018  ;;  %1106 = vst.msk [vmem:[#allocation4 + $0x18] sm:$0xff] %vm1102_vm4, %v1013_v54 }
  0xe5   : > { %1109 = vst.msk [vmem:[#allocation4 + $0x30] sm:$0xff] %vm1102_vm4, %v1019_v11  ;;  %1257 = vrot.lane.b32.xlu1 %v4378_v16, %s3840_s17  ;;  %v5500_v11 = vld [vmem:[#allocation11_spill] sm:$0xff] }
  0xe6   : > { %1392 = vrot.lane.b32.xlu0 %v4116_v21, %s3841_s18 }
  0xe7   : > { %v1017_v7 = vpop.permute.xlu1 %1016 }
  0xe8   : > { %v1023_v6 = vpop.permute.xlu0 %1022  ;;  %1108 = vst.msk [vmem:[#allocation4 + $0x28] sm:$0xff] %vm1102_vm4, %v1017_v7 }
  0xe9   : > { %1111 = vst.msk [vmem:[#allocation4 + $0x40] sm:$0xff] %vm1102_vm4, %v1023_v6  ;;  %1261 = vrot.lane.b32.xlu1 %v1166_v63, %s3840_s17  ;;  %v1911_v6 = vld [vmem:[#allocation2 + $0x51] sm:$0xff] }
  0xea   : > { %1396 = vrot.lane.b32.xlu0 %v4114_v20, %s3841_s18 }
  0xeb   : > { %v1021_v38 = vpop.permute.xlu1 %1020 }
  0xec   : > { %v1027_v8 = vpop.permute.xlu0 %1026  ;;  %1110 = vst.msk [vmem:[#allocation4 + $0x38] sm:$0xff] %vm1102_vm4, %v1021_v38 }
  0xed   : > { %1113 = vst.msk [vmem:[#allocation4 + $0x50] sm:$0xff] %vm1102_vm4, %v1027_v8  ;;  %1394 = vrot.lane.b32.xlu1 %v4136_v32, %s3841_s18 }
  0xee   : > { %1400 = vrot.lane.b32.xlu0 %v4134_v31, %s3841_s18 }
  0xef   : > { %v1025_v56 = vpop.permute.xlu1 %1024 }
  0xf0   : > { %v1031_v21 = vpop.permute.xlu0 %1030  ;;  %1112 = vst.msk [vmem:[#allocation4 + $0x48] sm:$0xff] %vm1102_vm4, %v1025_v56 }
  0xf1   : > { %1115 = vst.msk [vmem:[#allocation4 + $0x60] sm:$0xff] %vm1102_vm4, %v1031_v21  ;;  %1398 = vrot.lane.b32.xlu1 %v4172_v58, %s3841_s18 }
  0xf2   : > { %1404 = vrot.lane.b32.xlu0 %v4170_v57, %s3841_s18 }
  0xf3   : > { %v1029_v40 = vpop.permute.xlu1 %1028 }
  0xf4   : > { %v1035_v20 = vpop.permute.xlu0 %1034  ;;  %1114 = vst.msk [vmem:[#allocation4 + $0x58] sm:$0xff] %vm1102_vm4, %v1029_v40 }
  0xf5   : > { %1117 = vst.msk [vmem:[#allocation4 + $0x70] sm:$0xff] %vm1102_vm4, %v1035_v20  ;;  %1402 = vrot.lane.b32.xlu1 %v4201_v13, %s3841_s18 }
  0xf6   : > { %1408 = vrot.lane.b32.xlu0 %v4199_v12, %s3841_s18 }
  0xf7   : > { %v1033_v32 = vpop.permute.xlu1 %1032 }
  0xf8   : > { %v1039_v31 = vpop.permute.xlu0 %1038  ;;  %1116 = vst.msk [vmem:[#allocation4 + $0x68] sm:$0xff] %vm1102_vm4, %v1033_v32  ;;  %v1913_v32 = vld [vmem:[#allocation2 + $0x69] sm:$0xff] }
  0xf9   : > { %1119 = vst.msk [vmem:[#allocation4 + $0x80] sm:$0xff] %vm1102_vm4, %v1039_v31  ;;  %1406 = vrot.lane.b32.xlu1 %v4223_v23, %s3841_s18 }
  0xfa   : > { %1412 = vrot.lane.b32.xlu0 %v4221_v22, %s3841_s18 }
  0xfb   : > { %v1037_v58 = vpop.permute.xlu1 %1036 }
  0xfc   : > { %v1043_v57 = vpop.permute.xlu0 %1042  ;;  %1118 = vst.msk [vmem:[#allocation4 + $0x78] sm:$0xff] %vm1102_vm4, %v1037_v58 }
  0xfd   : > { %1121 = vst.msk [vmem:[#allocation4 + $0x90] sm:$0xff] %vm1102_vm4, %v1043_v57  ;;  %1410 = vrot.lane.b32.xlu1 %v4235_v27, %s3841_s18 }
  0xfe   : > { %1416 = vrot.lane.b32.xlu0 %v4233_v26, %s3841_s18 }
  0xff   : > { %v1041_v13 = vpop.permute.xlu1 %1040 }
 0x100   : > { %v1047_v12 = vpop.permute.xlu0 %1046  ;;  %1120 = vst.msk [vmem:[#allocation4 + $0x88] sm:$0xff] %vm1102_vm4, %v1041_v13 }
 0x101   : > { %1123 = vst.msk [vmem:[#allocation4 + $0xa0] sm:$0xff] %vm1102_vm4, %v1047_v12  ;;  %1414 = vrot.lane.b32.xlu1 %v4247_v29, %s3841_s18  ;;  %v1912_v12 = vld [vmem:[#allocation2 + $0x61] sm:$0xff] }
 0x102   : > { %1420 = vrot.lane.b32.xlu0 %v4245_v28, %s3841_s18 }
 0x103   : > { %v1045_v23 = vpop.permute.xlu1 %1044 }
 0x104   : > { %v1051_v22 = vpop.permute.xlu0 %1050  ;;  %1122 = vst.msk [vmem:[#allocation4 + $0x98] sm:$0xff] %vm1102_vm4, %v1045_v23 }
 0x105   : > { %1125 = vst.msk [vmem:[#allocation4 + $0xb0] sm:$0xff] %vm1102_vm4, %v1051_v22  ;;  %1418 = vrot.lane.b32.xlu1 %v4261_v37, %s3841_s18 }
 0x106   : > { %1424 = vrot.lane.b32.xlu0 %v4259_v36, %s3841_s18 }
 0x107   : > { %v1049_v27 = vpop.permute.xlu1 %1048 }
 0x108   : > { %v1055_v26 = vpop.permute.xlu0 %1054  ;;  %1124 = vst.msk [vmem:[#allocation4 + $0xa8] sm:$0xff] %vm1102_vm4, %v1049_v27 }
 0x109   : > { %1127 = vst.msk [vmem:[#allocation4 + $0xc0] sm:$0xff] %vm1102_vm4, %v1055_v26  ;;  %1422 = vrot.lane.b32.xlu1 %v4321_v51, %s3841_s18 }
 0x10a   : > { %1428 = vrot.lane.b32.xlu0 %v4319_v49, %s3841_s18 }
 0x10b   : > { %v1053_v29 = vpop.permute.xlu1 %1052 }
 0x10c   : > { %v1059_v28 = vpop.permute.xlu0 %1058  ;;  %1126 = vst.msk [vmem:[#allocation4 + $0xb8] sm:$0xff] %vm1102_vm4, %v1053_v29  ;;  %v5505_v29 = vld [vmem:[#allocation16_spill] sm:$0xff] }
 0x10d   : > { %1129 = vst.msk [vmem:[#allocation4 + $0xd0] sm:$0xff] %vm1102_vm4, %v1059_v28  ;;  %1426 = vrot.lane.b32.xlu1 %v4337_v60, %s3841_s18 }
 0x10e   : > { %1432 = vrot.lane.b32.xlu0 %v4335_v59, %s3841_s18  ;;  %v5499_v59 = vld [vmem:[#allocation8_spill] sm:$0xff] }
 0x10f   : > { %v1057_v37 = vpop.permute.xlu1 %1056 }
 0x110   : > { %v1063_v36 = vpop.permute.xlu0 %1062  ;;  %1128 = vst.msk [vmem:[#allocation4 + $0xc8] sm:$0xff] %vm1102_vm4, %v1057_v37 }
 0x111   : > { %1131 = vst.msk [vmem:[#allocation4 + $0xe0] sm:$0xff] %vm1102_vm4, %v1063_v36  ;;  %1430 = vrot.lane.b32.xlu1 %v4353_v0, %s3841_s18  ;;  %v2327_v0 = vld [vmem:[%s5463_s4 + $0x8] sm:$0xff] }
 0x112   : > { %1436 = vrot.lane.b32.xlu0 %v4349_v62, %s3841_s18  ;;  %v2326_v62 = vld [vmem:[%s5463_s4] sm:$0xff] }
 0x113   : > { %v1061_v51 = vpop.permute.xlu1 %1060  ;;  %v3775_v42 = vpack.c.bf16 %v2327_v0, %v2326_v62  ;;  %v5506_v36 = vld [vmem:[#allocation14_spill] sm:$0xff]  ;;  %v1914_v0 = vld [vmem:[#allocation2 + $0x79] sm:$0xff] }
 0x114   : > { %v1067_v49 = vpop.permute.xlu0 %1066  ;;  %1130 = vst.msk [vmem:[#allocation4 + $0xd8] sm:$0xff] %vm1102_vm4, %v1061_v51 }
 0x115   : > { %1133 = vst.msk [vmem:[#allocation4 + $0xf0] sm:$0xff] %vm1102_vm4, %v1067_v49  ;;  %1434 = vrot.lane.b32.xlu1 %v5499_v59, %s3841_s18  ;;  %3776 = vmatprep.subr.bf16.mxu0 %v3775_v42 }
 0x116   : > { %1587 = vrot.lane.b32.xlu0 %v4404_v17, %s3842_s19  ;;  %v1909_v17 = vld [vmem:[#allocation2 + $0x39] sm:$0xff]  ;;  %3795 = vmatprep.subr.bf16.mxu1 %v3775_v42 }
 0x117   : > { %v1065_v1 = vpop.permute.xlu1 %1064  ;;  %3778 = vmatpush3.bf16.msra.mxu0 %v3775_v42  ;;  %3798 = vmatpush3.bf16.msra.mxu1 %v3775_v42 }
 0x118   : > { %v1200_v60 = vpop.permute.xlu0 %1199  ;;  %1132 = vst.msk [vmem:[#allocation4 + $0xe8] sm:$0xff] %vm1102_vm4, %v1065_v1 }
 0x119   : > { %1296 = vst.msk [vmem:[#allocation4] sm:$0xff] %vm1295_vm5, %v1200_v60  ;;  %1585 = vrot.lane.b32.xlu1 %v4392_v2, %s3842_s19  ;;  %v1908_v2 = vld [vmem:[#allocation2 + $0x31] sm:$0xff]  ;;  %v1928_v60 = vld [vmem:[#allocation2 + $0x121] sm:$0xff] }
 0x11a   : > { %1781 = vrot.lane.b32.xlu0 %v4207_v19, %s3843_s25  ;;  %v3779_v19 = vpack.c.bf16 %v2329_v47, %v2328_v45 }
 0x11b   : > { %v1069_v44 = vpop.permute.xlu1 %1068 }
 0x11c   : > { %v1204_v43 = vpop.permute.xlu0 %1203  ;;  %1134 = vst.msk [vmem:[#allocation4 + $0xf8] sm:$0xff] %vm1102_vm4, %v1069_v44  ;;  %3780 = vmatprep.subr.bf16.mxu0 %v3779_v19  ;;  %3796 = vmatprep.subr.bf16.mxu1 %v3779_v19  ;;  %v1529_v44 = vld [vmem:[#allocation2 + $0x7a] sm:$0xff]  ;;  %vm2673_vm4 = vcmask 64512  }
 0x11d   : > { %1298 = vst.msk [vmem:[#allocation4 + $0x10] sm:$0xff] %vm1295_vm5, %v1204_v43  ;;  %1779 = vrot.lane.b32.xlu1 %v4150_v50, %s3843_s25  ;;  %3782 = vmatpush3.bf16.msra.mxu0 %v3779_v19  ;;  %v2330_v50 = vld [vmem:[%s5463_s4 + $0x20] sm:$0xf] }
 0x11e   : > { %1974 = vrot.lane.b32.xlu0 %v1909_v17, %s3844_s30  ;;  %3799 = vmatpush3.bf16.msra.mxu1 %v3779_v19  ;;  %v2108_v19 = vld [vmem:[#allocation2 + $0x82] sm:$0xff] }
 0x11f   : > { %v1202_v52 = vpop.permute.xlu1 %1201  ;;  %3699 = vmatprep.subr.msk.mxu0 %vm2428_vm6, %v2330_v50  ;;  %3797 = vmatprep.subr.msk.mxu1 %vm2428_vm6, %v2330_v50 }
 0x120   : > { %v1208_v15 = vpop.permute.xlu0 %1207  ;;  %1297 = vst.msk [vmem:[#allocation4 + $0x8] sm:$0xff] %vm1295_vm5, %v1202_v52 }
 0x121   : > { %1300 = vst.msk [vmem:[#allocation4 + $0x20] sm:$0xff] %vm1295_vm5, %v1208_v15  ;;  %1972 = vrot.lane.b32.xlu1 %v1908_v2, %s3844_s30  ;;  %3700 = vmatpush3.msk.msra.mxu0 %vm2428_vm6, %v2330_v50 }
 0x122   : > { %1589 = vrot.lane.b32.xlu0 %v4397_v3, %s3842_s19  ;;  %3800 = vmatpush3.msk.msra.mxu1 %vm2428_vm6, %v2330_v50  ;;  %vm3036_vm6 = vcmask 294128  }
 0x123   : > { %v1206_v9 = vpop.permute.xlu1 %1205 }
 0x124   : > { %v1212_v5 = vpop.permute.xlu0 %1211  ;;  %1299 = vst.msk [vmem:[#allocation4 + $0x18] sm:$0xff] %vm1295_vm5, %v1206_v9 }
 0x125   : > { %1302 = vst.msk [vmem:[#allocation4 + $0x30] sm:$0xff] %vm1295_vm5, %v1212_v5  ;;  %2165 = vrot.lane.b32.xlu1 %v4397_v3, %s3845_s15  ;;  %v1910_v3 = vld [vmem:[#allocation2 + $0x49] sm:$0xff] }
 0x126   : > { %1591 = vrot.lane.b32.xlu0 %v5500_v11, %s3842_s19 }
 0x127   : > { %v1210_v63 = vpop.permute.xlu1 %1209 }
 0x128   : > { %v1216_v54 = vpop.permute.xlu0 %1215  ;;  %1301 = vst.msk [vmem:[#allocation4 + $0x28] sm:$0xff] %vm1295_vm5, %v1210_v63  ;;  %v1916_v63 = vld [vmem:[#allocation2 + $0x91] sm:$0xff] }
 0x129   : > { %1304 = vst.msk [vmem:[#allocation4 + $0x40] sm:$0xff] %vm1295_vm5, %v1216_v54  ;;  %2167 = vrot.lane.b32.xlu1 %v5500_v11, %s3845_s15 }
 0x12a   : > { %1785 = vrot.lane.b32.xlu0 %v4231_v25, %s3843_s25  ;;  %v5501_v25 = vld [vmem:[#allocation9_spill] sm:$0xff] }
 0x12b   : > { %v1214_v8 = vpop.permute.xlu1 %1213 }
 0x12c   : > { %v1220_v7 = vpop.permute.xlu0 %1219  ;;  %1303 = vst.msk [vmem:[#allocation4 + $0x38] sm:$0xff] %vm1295_vm5, %v1214_v8 }
 0x12d   : > { %1306 = vst.msk [vmem:[#allocation4 + $0x50] sm:$0xff] %vm1295_vm5, %v1220_v7  ;;  %1783 = vrot.lane.b32.xlu1 %v4166_v55, %s3843_s25  ;;  %v5502_v55 = vld [vmem:[#allocation12_spill] sm:$0xff] }
 0x12e   : > { %1978 = vrot.lane.b32.xlu0 %v1911_v6, %s3844_s30  ;;  %v5508_v6 = vmov 0.0  }
 0x12f   : > { %v1218_v21 = vpop.permute.xlu1 %1217  ;;  %483 = vst.msk [vmem:[#allocation3] sm:$0xff] %vm482_vm8, %v5508_v6  ;;  %487 = vst.msk [vmem:[#allocation3 + $0x90] sm:$0xff] %vm482_vm8, %v5508_v6 }
 0x130   : > { %v1224_v38 = vpop.permute.xlu0 %1223  ;;  %1305 = vst.msk [vmem:[#allocation4 + $0x48] sm:$0xff] %vm1295_vm5, %v1218_v21 }
 0x131   : > { %1308 = vst.msk [vmem:[#allocation4 + $0x60] sm:$0xff] %vm1295_vm5, %v1224_v38  ;;  %1976 = vrot.lane.b32.xlu1 %v1910_v3, %s3844_s30  ;;  %v2729_v3 = vld [vmem:[%s4792_s22] sm:$0xff] }
 0x132   : > { %1593 = vrot.lane.b32.xlu0 %v5501_v25, %s3842_s19  ;;  %485 = vst.msk [vmem:[#allocation3 + $0x8] sm:$0x3] %vm484_vm9, %v5508_v6  ;;  %488 = vst.msk [vmem:[#allocation3 + $0x98] sm:$0x3] %vm484_vm9, %v5508_v6  ;;  %v4798_v38 = vld [vmem:[%s5464_s5] ss:$0 sm:$0xff] }
 0x133   : > { %v1222_v20 = vpop.permute.xlu1 %1221  ;;  %500 = vst.msk [vmem:[#allocation3 + $0x9] sm:$0x1] %vm489_vm10, %v5508_v6  ;;  %490 = vst.msk [vmem:[#allocation3] sm:$0x1] %vm489_vm10, %v5508_v6  ;;  %vm3135_vm9 = vcmask 392528  }
 0x134   : > { %v1228_v56 = vpop.permute.xlu0 %1227  ;;  %1307 = vst.msk [vmem:[#allocation4 + $0x58] sm:$0xff] %vm1295_vm5, %v1222_v20 }
 0x135   : > { %1310 = vst.msk [vmem:[#allocation4 + $0x70] sm:$0xff] %vm1295_vm5, %v1228_v56  ;;  %2169 = vrot.lane.b32.xlu1 %v5501_v25, %s3845_s15  ;;  %v2744_v56 = vmul.f32 %v4798_v38, %v2729_v3 }
 0x136   : > { %1595 = vrot.lane.b32.xlu0 %v5502_v55, %s3842_s19  ;;  %491 = vst.msk [vmem:[#allocation3 + $0x10] sm:$0x1] %vm489_vm10, %v5508_v6  ;;  %492 = vst.msk [vmem:[#allocation3 + $0x20] sm:$0x1] %vm489_vm10, %v5508_v6 }
 0x137   : > { %v1226_v31 = vpop.permute.xlu1 %1225  ;;  %493 = vst.msk [vmem:[#allocation3 + $0x30] sm:$0x1] %vm489_vm10, %v5508_v6  ;;  %494 = vst.msk [vmem:[#allocation3 + $0x40] sm:$0x1] %vm489_vm10, %v5508_v6 }
 0x138   : > { %v1232_v40 = vpop.permute.xlu0 %1231  ;;  %1309 = vst.msk [vmem:[#allocation4 + $0x68] sm:$0xff] %vm1295_vm5, %v1226_v31 }
 0x139   : > { %1312 = vst.msk [vmem:[#allocation4 + $0x80] sm:$0xff] %vm1295_vm5, %v1232_v40  ;;  %2171 = vrot.lane.b32.xlu1 %v5502_v55, %s3845_s15  ;;  %v2123_v55 = vld [vmem:[#allocation2 + $0x13a] sm:$0xff] }
 0x13a   : > { %1789 = vrot.lane.b32.xlu0 %v4253_v33, %s3843_s25  ;;  %v5503_v33 = vld [vmem:[#allocation10_spill] sm:$0xff]  ;;  %v1917_v40 = vld [vmem:[#allocation2 + $0x99] sm:$0xff]  ;;  %495 = vst.msk [vmem:[#allocation3 + $0x50] sm:$0x1] %vm489_vm10, %v5508_v6  ;;  %496 = vst.msk [vmem:[#allocation3 + $0x60] sm:$0x1] %vm489_vm10, %v5508_v6 }
 0x13b   : > { %v1230_v58 = vpop.permute.xlu1 %1229  ;;  %497 = vst.msk [vmem:[#allocation3 + $0x70] sm:$0x1] %vm489_vm10, %v5508_v6  ;;  %498 = vst.msk [vmem:[#allocation3 + $0x80] sm:$0x1] %vm489_vm10, %v5508_v6 }
 0x13c   : > { %v1236_v57 = vpop.permute.xlu0 %1235  ;;  %1311 = vst.msk [vmem:[#allocation4 + $0x78] sm:$0xff] %vm1295_vm5, %v1230_v58  ;;  %v1531_v58 = vld [vmem:[#allocation2 + $0x92] sm:$0xff] }
 0x13d   : > { %1314 = vst.msk [vmem:[#allocation4 + $0x90] sm:$0xff] %vm1295_vm5, %v1236_v57  ;;  %1787 = vrot.lane.b32.xlu1 %v4205_v18, %s3843_s25  ;;  %v5504_v18 = vld [vmem:[#allocation13_spill] sm:$0xff] }
 0x13e   : > { %1982 = vrot.lane.b32.xlu0 %v1913_v32, %s3844_s30  ;;  %499 = vst.msk [vmem:[#allocation3 + $0x90] sm:$0x1] %vm489_vm10, %v5508_v6  ;;  %501 = vst.msk [vmem:[#allocation3 + $0x19] sm:$0x1] %vm489_vm10, %v5508_v6 }
 0x13f   : > { %v1234_v22 = vpop.permute.xlu1 %1233  ;;  %502 = vst.msk [vmem:[#allocation3 + $0x29] sm:$0x1] %vm489_vm10, %v5508_v6  ;;  %503 = vst.msk [vmem:[#allocation3 + $0x39] sm:$0x1] %vm489_vm10, %v5508_v6 }
 0x140   : > { %v1240_v13 = vpop.permute.xlu0 %1239  ;;  %1313 = vst.msk [vmem:[#allocation4 + $0x88] sm:$0xff] %vm1295_vm5, %v1234_v22  ;;  %v2110_v22 = vld [vmem:[#allocation2 + $0x9a] sm:$0xff] }
 0x141   : > { %1316 = vst.msk [vmem:[#allocation4 + $0xa0] sm:$0xff] %vm1295_vm5, %v1240_v13  ;;  %1980 = vrot.lane.b32.xlu1 %v1912_v12, %s3844_s30 }
 0x142   : > { %1597 = vrot.lane.b32.xlu0 %v5503_v33, %s3842_s19  ;;  %504 = vst.msk [vmem:[#allocation3 + $0x49] sm:$0x1] %vm489_vm10, %v5508_v6  ;;  %505 = vst.msk [vmem:[#allocation3 + $0x59] sm:$0x1] %vm489_vm10, %v5508_v6 }
 0x143   : > { %v1238_v26 = vpop.permute.xlu1 %1237  ;;  %506 = vst.msk [vmem:[#allocation3 + $0x69] sm:$0x1] %vm489_vm10, %v5508_v6  ;;  %507 = vst.msk [vmem:[#allocation3 + $0x79] sm:$0x1] %vm489_vm10, %v5508_v6 }
 0x144   : > { %v1244_v23 = vpop.permute.xlu0 %1243  ;;  %1315 = vst.msk [vmem:[#allocation4 + $0x98] sm:$0xff] %vm1295_vm5, %v1238_v26 }
 0x145   : > { %1318 = vst.msk [vmem:[#allocation4 + $0xb0] sm:$0xff] %vm1295_vm5, %v1244_v23  ;;  %2173 = vrot.lane.b32.xlu1 %v5503_v33, %s3845_s15 }
 0x146   : > { %2175 = vrot.lane.b32.xlu0 %v5504_v18, %s3845_s15  ;;  %508 = vst.msk [vmem:[#allocation3 + $0x89] sm:$0x1] %vm489_vm10, %v5508_v6  ;;  %509 = vst.msk [vmem:[#allocation3 + $0x99] sm:$0x1] %vm489_vm10, %v5508_v6  ;;  %vm3184_vm10 = vcmask 441728  }
 0x147   : > { %v1242_v28 = vpop.permute.xlu1 %1241 }
 0x148   : > { %v1248_v27 = vpop.permute.xlu0 %1247  ;;  %1317 = vst.msk [vmem:[#allocation4 + $0xa8] sm:$0xff] %vm1295_vm5, %v1242_v28 }
 0x149   : > { %1320 = vst.msk [vmem:[#allocation4 + $0xc0] sm:$0xff] %vm1295_vm5, %v1248_v27  ;;  %1625 = vrot.lane.b32.xlu1 %v5506_v36, %s3842_s19  ;;  %v2124_v27 = vld [vmem:[#allocation2 + $0x142] sm:$0xff] }
 0x14a   : > { %1627 = vrot.lane.b32.xlu0 %v5505_v29, %s3842_s19 }
 0x14b   : > { %v1246_v49 = vpop.permute.xlu1 %1245 }
 0x14c   : > { %v1252_v37 = vpop.permute.xlu0 %1251  ;;  %1319 = vst.msk [vmem:[#allocation4 + $0xb8] sm:$0xff] %vm1295_vm5, %v1246_v49 }
 0x14d   : > { %1322 = vst.msk [vmem:[#allocation4 + $0xd0] sm:$0xff] %vm1295_vm5, %v1252_v37  ;;  %1599 = vrot.lane.b32.xlu1 %v5504_v18, %s3842_s19  ;;  %v2730_v37 = vld [vmem:[%s4792_s22 + $0x8] sm:$0xff] }
 0x14e   : > { %1819 = vrot.lane.b32.xlu0 %v4301_v46, %s3843_s25  ;;  %v1929_v46 = vld [vmem:[#allocation2 + $0x129] sm:$0xff] }
 0x14f   : > { %v1250_v59 = vpop.permute.xlu1 %1249 }
 0x150   : > { %v1256_v51 = vpop.permute.xlu0 %1255  ;;  %1321 = vst.msk [vmem:[#allocation4 + $0xc8] sm:$0xff] %vm1295_vm5, %v1250_v59  ;;  %v2745_v59 = vmul.f32 %v4798_v38, %v2730_v37  ;;  %v1921_v37 = vld [vmem:[#allocation2 + $0xc9] sm:$0xff] }
 0x151   : > { %1324 = vst.msk [vmem:[#allocation4 + $0xe0] sm:$0xff] %vm1295_vm5, %v1256_v51  ;;  %1791 = vrot.lane.b32.xlu1 %v4229_v24, %s3843_s25  ;;  %v1915_v24 = vld [vmem:[#allocation2 + $0x81] sm:$0xff] }
 0x152   : > { %1821 = vrot.lane.b32.xlu0 %v4341_v61, %s3843_s25 }
 0x153   : > { %v1254_v62 = vpop.permute.xlu1 %1253 }
 0x154   : > { %v1260_v1 = vpop.permute.xlu0 %1259  ;;  %1323 = vst.msk [vmem:[#allocation4 + $0xd8] sm:$0xff] %vm1295_vm5, %v1254_v62 }
 0x155   : > { %1326 = vst.msk [vmem:[#allocation4 + $0xf0] sm:$0xff] %vm1295_vm5, %v1260_v1  ;;  %1793 = vrot.lane.b32.xlu1 %v4257_v35, %s3843_s25  ;;  %v5507_v35 = vld [vmem:[#allocation15_spill] sm:$0xff] }
 0x156   : > { %2012 = vrot.lane.b32.xlu0 %v1928_v60, %s3844_s30  ;;  %v1918_v60 = vld [vmem:[#allocation2 + $0xa9] sm:$0xff] }
 0x157   : > { %v1258_v61 = vpop.permute.xlu1 %1257 }
 0x158   : > { %v1393_v42 = vpop.permute.xlu0 %1392  ;;  %1325 = vst.msk [vmem:[#allocation4 + $0xe8] sm:$0xff] %vm1295_vm5, %v1258_v61  ;;  %v1933_v61 = vld [vmem:[#allocation2 + $0x159] sm:$0xff] }
 0x159   : > { %1489 = vst.msk [vmem:[#allocation4] sm:$0xff] %vm1488_vm7, %v1393_v42  ;;  %1984 = vrot.lane.b32.xlu1 %v1914_v0, %s3844_s30 }
 0x15a   : > { %2014 = vrot.lane.b32.xlu0 %v1929_v46, %s3844_s30 }
 0x15b   : > { %v1262_v43 = vpop.permute.xlu1 %1261 }
 0x15c   : > { %v1397_v17 = vpop.permute.xlu0 %1396  ;;  %1327 = vst.msk [vmem:[#allocation4 + $0xf8] sm:$0xff] %vm1295_vm5, %v1262_v43  ;;  %vm2987_vm5 = vcmask 244928  }
 0x15d   : > { %1491 = vst.msk [vmem:[#allocation4 + $0x10] sm:$0xff] %vm1488_vm7, %v1397_v17  ;;  %1986 = vrot.lane.b32.xlu1 %v1915_v24, %s3844_s30 }
 0x15e   : > { %2205 = vrot.lane.b32.xlu0 %v5507_v35, %s3845_s15 }
 0x15f   : > { %v1395_v47 = vpop.permute.xlu1 %1394 }
 0x160   : > { %v1401_v45 = vpop.permute.xlu0 %1400  ;;  %1490 = vst.msk [vmem:[#allocation4 + $0x8] sm:$0xff] %vm1488_vm7, %v1395_v47 }
 0x161   : > { %1493 = vst.msk [vmem:[#allocation4 + $0x20] sm:$0xff] %vm1488_vm7, %v1401_v45  ;;  %2177 = vrot.lane.b32.xlu1 %v1529_v44, %s3845_s15 }
 0x162   : > { %1601 = vrot.lane.b32.xlu0 %v1529_v44, %s3842_s19 }
 0x163   : > { %v1399_v15 = vpop.permute.xlu1 %1398 }
 0x164   : > { %v1405_v2 = vpop.permute.xlu0 %1404  ;;  %1492 = vst.msk [vmem:[#allocation4 + $0x18] sm:$0xff] %vm1488_vm7, %v1399_v15 }
 0x165   : > { %1495 = vst.msk [vmem:[#allocation4 + $0x30] sm:$0xff] %vm1488_vm7, %v1405_v2  ;;  %1438 = vrot.lane.b32.xlu1 %v1929_v46, %s3841_s18  ;;  %v2731_v2 = vld [vmem:[%s4792_s22 + $0x10] sm:$0xff] }
 0x166   : > { %2179 = vrot.lane.b32.xlu0 %v2108_v19, %s3845_s15 }
 0x167   : > { %v1403_v50 = vpop.permute.xlu1 %1402 }
 0x168   : > { %v1409_v52 = vpop.permute.xlu0 %1408  ;;  %1494 = vst.msk [vmem:[#allocation4 + $0x28] sm:$0xff] %vm1488_vm7, %v1403_v50  ;;  %v2746_v50 = vmul.f32 %v4798_v38, %v2731_v2 }
 0x169   : > { %1497 = vst.msk [vmem:[#allocation4 + $0x40] sm:$0xff] %vm1488_vm7, %v1409_v52  ;;  %1629 = vrot.lane.b32.xlu1 %v5507_v35, %s3842_s19  ;;  %v1919_v35 = vld [vmem:[#allocation2 + $0xb1] sm:$0xff] }
 0x16a   : > { %1603 = vrot.lane.b32.xlu0 %v2108_v19, %s3842_s19  ;;  %v1533_v19 = vld [vmem:[#allocation2 + $0xaa] sm:$0xff] }
 0x16b   : > { %v1407_v9 = vpop.permute.xlu1 %1406 }
 0x16c   : > { %v1413_v5 = vpop.permute.xlu0 %1412  ;;  %1496 = vst.msk [vmem:[#allocation4 + $0x38] sm:$0xff] %vm1488_vm7, %v1407_v9  ;;  %v2112_v9 = vld [vmem:[#allocation2 + $0xb2] sm:$0xff] }
 0x16d   : > { %1499 = vst.msk [vmem:[#allocation4 + $0x50] sm:$0xff] %vm1488_vm7, %v1413_v5  ;;  %2207 = vrot.lane.b32.xlu1 %v4453_v14, %s3845_s15 }
 0x16e   : > { %1795 = vrot.lane.b32.xlu0 %v4249_v30, %s3843_s25 }
 0x16f   : > { %v1411_v54 = vpop.permute.xlu1 %1410 }
 0x170   : > { %v1417_v11 = vpop.permute.xlu0 %1416  ;;  %1498 = vst.msk [vmem:[#allocation4 + $0x48] sm:$0xff] %vm1488_vm7, %v1411_v54 }
 0x171   : > { %1501 = vst.msk [vmem:[#allocation4 + $0x60] sm:$0xff] %vm1488_vm7, %v1417_v11  ;;  %1631 = vrot.lane.b32.xlu1 %v4453_v14, %s3842_s19  ;;  %v1352_v14 = vld [vmem:[#allocation2 + $0x139] sm:$0xff] }
 0x172   : > { %1797 = vrot.lane.b32.xlu0 %v4271_v39, %s3843_s25 }
 0x173   : > { %v1415_v39 = vpop.permute.xlu1 %1414 }
 0x174   : > { %v1421_v30 = vpop.permute.xlu0 %1420  ;;  %1500 = vst.msk [vmem:[#allocation4 + $0x58] sm:$0xff] %vm1488_vm7, %v1415_v39 }
 0x175   : > { %1503 = vst.msk [vmem:[#allocation4 + $0x70] sm:$0xff] %vm1488_vm7, %v1421_v30  ;;  %1823 = vrot.lane.b32.xlu1 %v4317_v48, %s3843_s25  ;;  %v1931_v48 = vld [vmem:[#allocation2 + $0x141] sm:$0xff] }
 0x176   : > { %1988 = vrot.lane.b32.xlu0 %v1916_v63, %s3844_s30 }
 0x177   : > { %v1419_v8 = vpop.permute.xlu1 %1418 }
 0x178   : > { %v1425_v7 = vpop.permute.xlu0 %1424  ;;  %1502 = vst.msk [vmem:[#allocation4 + $0x68] sm:$0xff] %vm1488_vm7, %v1419_v8 }
 0x179   : > { %1505 = vst.msk [vmem:[#allocation4 + $0x80] sm:$0xff] %vm1488_vm7, %v1425_v7  ;;  %1825 = vrot.lane.b32.xlu1 %v4357_v4, %s3843_s25  ;;  %v4806_v4 = vld [vmem:[%s5465_s6] ss:$0 sm:$0xff] }
 0x17a   : > { %1440 = vrot.lane.b32.xlu0 %v1352_v14, %s3841_s18  ;;  %v2759_v20 = vadd.f32 %v4806_v4, %v2744_v56  ;;  %v2761_v5 = vadd.f32 %v4806_v4, %v2746_v50  ;;  %v2126_v7 = vld [vmem:[#allocation2 + $0x15a] sm:$0xff]  ;;  %v2734_v50 = vld [vmem:[%s4792_s22 + $0x28] sm:$0xff] }
 0x17b   : > { %v1423_v25 = vpop.permute.xlu1 %1422 }
 0x17c   : > { %v1429_v21 = vpop.permute.xlu0 %1428  ;;  %1504 = vst.msk [vmem:[#allocation4 + $0x78] sm:$0xff] %vm1488_vm7, %v1423_v25  ;;  %v2767_v57 = vmax.f32 %v2759_v20, 0.0  ;;  %v2769_v63 = vmax.f32 %v2761_v5, 0.0  ;;  %v1920_v20 = vld [vmem:[#allocation2 + $0xc1] sm:$0xff]  ;;  %v2749_v5 = vmul.f32 %v4798_v38, %v2734_v50  ;;  %v1938_v50 = vld [vmem:[#allocation2 + $0x199] sm:$0xff] }
 0x17d   : > { %1507 = vst.msk [vmem:[#allocation4 + $0x90] sm:$0xff] %vm1488_vm7, %v1429_v21  ;;  %2016 = vrot.lane.b32.xlu1 %v1352_v14, %s3844_s30  ;;  %v1727_v14 = vld [vmem:[#allocation2 + $0xc0] sm:$0xff]  ;;  %v1728_v21 = vld [vmem:[#allocation2 + $0xc8] sm:$0xff] }
 0x17e   : > { %2018 = vrot.lane.b32.xlu0 %v1931_v48, %s3844_s30  ;;  %2776 = vst.msk [vmem:[#allocation3 + $0x11] sm:$0xff] %vm482_vm8, %v2767_v57  ;;  %2778 = vst.msk [vmem:[#allocation3 + $0x31] sm:$0xff] %vm482_vm8, %v2769_v63  ;;  %v1356_v57 = vld [vmem:[#allocation2 + $0x169] sm:$0xff] }
 0x17f   : > { %v1427_v32 = vpop.permute.xlu1 %1426 }
 0x180   : > { %v1433_v31 = vpop.permute.xlu0 %1432  ;;  %1506 = vst.msk [vmem:[#allocation4 + $0x88] sm:$0xff] %vm1488_vm7, %v1427_v32 }
 0x181   : > { %1509 = vst.msk [vmem:[#allocation4 + $0xa0] sm:$0xff] %vm1488_vm7, %v1433_v31  ;;  %1990 = vrot.lane.b32.xlu1 %v1917_v40, %s3844_s30 }
 0x182   : > { %2209 = vrot.lane.b32.xlu0 %v2123_v55, %s3845_s15 }
 0x183   : > { %v1431_v13 = vpop.permute.xlu1 %1430 }
 0x184   : > { %v1437_v12 = vpop.permute.xlu0 %1436  ;;  %1508 = vst.msk [vmem:[#allocation4 + $0x98] sm:$0xff] %vm1488_vm7, %v1431_v13 }
 0x185   : > { %1511 = vst.msk [vmem:[#allocation4 + $0xb0] sm:$0xff] %vm1488_vm7, %v1437_v12  ;;  %2181 = vrot.lane.b32.xlu1 %v1531_v58, %s3845_s15  ;;  %v4873_v36 = vld [vmem:[#allocation3 + $0x10] sm:$0xff] }
 0x186   : > { %1605 = vrot.lane.b32.xlu0 %v1531_v58, %s3842_s19  ;;  %2793 = vst.msk [vmem:[#allocation5 + $0x8] sm:$0xff] %vm482_vm8, %v4873_v36  ;;  %v4940_v32 = vld [vmem:[#allocation3 + $0x30] sm:$0xff]  ;;  %v2732_v58 = vld [vmem:[%s4792_s22 + $0x18] sm:$0xff] }
 0x187   : > { %v1435_v23 = vpop.permute.xlu1 %1434  ;;  %2795 = vst.msk [vmem:[#allocation5 + $0x18] sm:$0xff] %vm482_vm8, %v4940_v32 }
 0x188   : > { %v1588_v33 = vpop.permute.xlu0 %1587  ;;  %1510 = vst.msk [vmem:[#allocation4 + $0xa8] sm:$0xff] %vm1488_vm7, %v1435_v23  ;;  %v2747_v23 = vmul.f32 %v4798_v38, %v2732_v58 }
 0x189   : > { %1683 = vst.msk [vmem:[#allocation4 + $0x8] sm:$0xff] %vm1681_vm11, %v1588_v33  ;;  %1442 = vrot.lane.b32.xlu1 %v1931_v48, %s3841_s18 }
 0x18a   : > { %2183 = vrot.lane.b32.xlu0 %v2110_v22, %s3845_s15 }
 0x18b   : > { %v1586_v18 = vpop.permute.xlu1 %1585 }
 0x18c   : > { %v1782_v26 = vpop.permute.xlu0 %1781  ;;  %1682 = vst.msk [vmem:[#allocation4] sm:$0xff] %vm1681_vm11, %v1586_v18  ;;  %v1935_v18 = vld [vmem:[#allocation2 + $0x171] sm:$0xff] }
 0x18d   : > { %1877 = vst.msk [vmem:[#allocation4 + $0x8] sm:$0xff] %vm1875_vm12, %v1782_v26  ;;  %1633 = vrot.lane.b32.xlu1 %v2123_v55, %s3842_s19  ;;  %v1741_v55 = vld [vmem:[#allocation2 + $0x168] sm:$0xff]  ;;  %v2762_v26 = vadd.f32 %v4806_v4, %v2747_v23 }
 0x18e   : > { %1607 = vrot.lane.b32.xlu0 %v2110_v22, %s3842_s19 }
 0x18f   : > { %v1780_v29 = vpop.permute.xlu1 %1779 }
 0x190   : > { %v1975_v28 = vpop.permute.xlu0 %1974  ;;  %1876 = vst.msk [vmem:[#allocation4] sm:$0xff] %vm1875_vm12, %v1780_v29  ;;  %v2770_v29 = vmax.f32 %v2762_v26, 0.0 }
 0x191   : > { %2070 = vst.msk [vmem:[#allocation4 + $0x8] sm:$0xff] %vm2068_vm13, %v1975_v28  ;;  %2211 = vrot.lane.b32.xlu1 %v2124_v27, %s3845_s15 }
 0x192   : > { %1799 = vrot.lane.b32.xlu0 %v4255_v34, %s3843_s25  ;;  %v2760_v34 = vadd.f32 %v4806_v4, %v2745_v59  ;;  %2779 = vst.msk [vmem:[#allocation3 + $0x41] sm:$0xff] %vm482_vm8, %v2770_v29  ;;  %v1535_v59 = vld [vmem:[#allocation2 + $0xc2] sm:$0xff] }
 0x193   : > { %v1973_v51 = vpop.permute.xlu1 %1972 }
 0x194   : > { %v1590_v49 = vpop.permute.xlu0 %1589  ;;  %2069 = vst.msk [vmem:[#allocation4] sm:$0xff] %vm2068_vm13, %v1973_v51  ;;  %v2768_v46 = vmax.f32 %v2760_v34, 0.0 }
 0x195   : > { %1684 = vst.msk [vmem:[#allocation4 + $0x10] sm:$0xff] %vm1681_vm11, %v1590_v49  ;;  %1635 = vrot.lane.b32.xlu1 %v2124_v27, %s3842_s19 }
 0x196   : > { %1801 = vrot.lane.b32.xlu0 %v4285_v41, %s3843_s25  ;;  %2777 = vst.msk [vmem:[#allocation3 + $0x21] sm:$0xff] %vm482_vm8, %v2768_v46  ;;  %v1354_v41 = vld [vmem:[#allocation2 + $0x151] sm:$0xff] }
 0x197   : > { %v2166_v62 = vpop.permute.xlu1 %2165 }
 0x198   : > { %v1592_v1 = vpop.permute.xlu0 %1591  ;;  %2262 = vst.msk [vmem:[#allocation4] sm:$0xff] %vm2261_vm14, %v2166_v62 }
 0x199   : > { %1685 = vst.msk [vmem:[#allocation4 + $0x18] sm:$0xff] %vm1681_vm11, %v1592_v1  ;;  %1827 = vrot.lane.b32.xlu1 %v4333_v53, %s3843_s25  ;;  %v2733_v1 = vld [vmem:[%s4792_s22 + $0x20] sm:$0xff]  ;;  %v4966_v62 = vld [vmem:[#allocation3 + $0x40] sm:$0xff] }
 0x19a   : > { %1992 = vrot.lane.b32.xlu0 %v1918_v60, %s3844_s30  ;;  %v2748_v46 = vmul.f32 %v4798_v38, %v2733_v1  ;;  %2796 = vst.msk [vmem:[#allocation5 + $0x20] sm:$0xff] %vm482_vm8, %v4966_v62 }
 0x19b   : > { %v2168_v42 = vpop.permute.xlu1 %2167 }
 0x19c   : > { %v1786_v0 = vpop.permute.xlu0 %1785  ;;  %2263 = vst.msk [vmem:[#allocation4 + $0x8] sm:$0xff] %vm2261_vm14, %v2168_v42 }
 0x19d   : > { %1879 = vst.msk [vmem:[#allocation4 + $0x18] sm:$0xff] %vm1875_vm12, %v1786_v0  ;;  %1829 = vrot.lane.b32.xlu1 %v4370_v10, %s3843_s25  ;;  %v4899_v53 = vld [vmem:[#allocation3 + $0x20] sm:$0xff]  ;;  %v2763_v0 = vadd.f32 %v4806_v4, %v2748_v46  ;;  %v2736_v46 = vld [vmem:[%s4792_s22 + $0x38] sm:$0xff] }
 0x19e   : > { %1444 = vrot.lane.b32.xlu0 %v1354_v41, %s3841_s18  ;;  %2794 = vst.msk [vmem:[#allocation5 + $0x10] sm:$0xff] %vm482_vm8, %v4899_v53  ;;  %v2125_v10 = vld [vmem:[#allocation2 + $0x152] sm:$0xff] }
 0x19f   : > { %v1784_v17 = vpop.permute.xlu1 %1783  ;;  %v2294_v43 = vld [vmem:[#allocation4] sm:$0xff] }
 0x1a0   : > { %v1979_v24 = vpop.permute.xlu0 %1978  ;;  %1878 = vst.msk [vmem:[#allocation4 + $0x10] sm:$0xff] %vm1875_vm12, %v1784_v17  ;;  %3701 = vmatprep.mubr.msk.f32.mxu0 %vm2331_vm15, %v2294_v43 }
 0x1a1   : > { %2072 = vst.msk [vmem:[#allocation4 + $0x18] sm:$0xff] %vm2068_vm13, %v1979_v24  ;;  %2020 = vrot.lane.b32.xlu1 %v1354_v41, %s3844_s30  ;;  %v2114_v41 = vld [vmem:[#allocation2 + $0xca] sm:$0xff]  ;;  %v2771_v24 = vmax.f32 %v2763_v0, 0.0  ;;  %v1745_v0 = vld [vmem:[#allocation2 + $0x198] sm:$0xff] }
 0x1a2   : > { %2022 = vrot.lane.b32.xlu0 %v1933_v61, %s3844_s30 }
 0x1a3   : > { %v1977_v45 = vpop.permute.xlu1 %1976  ;;  %v2295_v47 = vld [vmem:[#allocation4 + $0x8] sm:$0xff]  ;;  %2780 = vst.msk [vmem:[#allocation3 + $0x51] sm:$0xff] %vm482_vm8, %v2771_v24 }
 0x1a4   : > { %v1594_v44 = vpop.permute.xlu0 %1593  ;;  %2071 = vst.msk [vmem:[#allocation4 + $0x10] sm:$0xff] %vm2068_vm13, %v1977_v45  ;;  %3702 = vmatmul.mubr.msk.f32.vlgmr.msra.gmra.mrb[0].mxu0 %vm2331_vm15, %v2295_v47 }
 0x1a5   : > { %1686 = vst.msk [vmem:[#allocation4 + $0x20] sm:$0xff] %vm1681_vm11, %v1594_v44  ;;  %1994 = vrot.lane.b32.xlu1 %v1919_v35, %s3844_s30  ;;  %v2128_v35 = vld [vmem:[#allocation2 + $0x172] sm:$0xff] }
 0x1a6   : > { %2213 = vrot.lane.b32.xlu0 %v2125_v10, %s3845_s15 }
 0x1a7   : > { %v2170_v52 = vpop.permute.xlu1 %2169 }
 0x1a8   : > { %v1596_v15 = vpop.permute.xlu0 %1595  ;;  %2264 = vst.msk [vmem:[#allocation4 + $0x10] sm:$0xff] %vm2261_vm14, %v2170_v52 }
 0x1a9   : > { %1687 = vst.msk [vmem:[#allocation4 + $0x28] sm:$0xff] %vm1681_vm11, %v1596_v15  ;;  %2185 = vrot.lane.b32.xlu1 %v1533_v19, %s3845_s15 }
 0x1aa   : > { %1609 = vrot.lane.b32.xlu0 %v1533_v19, %s3842_s19  ;;  %v1730_v19 = vld [vmem:[#allocation2 + $0xe0] sm:$0xff] }
 0x1ab   : > { %v2172_v54 = vpop.permute.xlu1 %2171 }
 0x1ac   : > { %v1790_v11 = vpop.permute.xlu0 %1789  ;;  %2265 = vst.msk [vmem:[#allocation4 + $0x18] sm:$0xff] %vm2261_vm14, %v2172_v54  ;;  %v2764_v54 = vadd.f32 %v4806_v4, %v2749_v5 }
 0x1ad   : > { %1881 = vst.msk [vmem:[#allocation4 + $0x28] sm:$0xff] %vm1875_vm12, %v1790_v11  ;;  %1446 = vrot.lane.b32.xlu1 %v1933_v61, %s3841_s18  ;;  %v1743_v11 = vld [vmem:[#allocation2 + $0x180] sm:$0xff] }
 0x1ae   : > { %2187 = vrot.lane.b32.xlu0 %v2112_v9, %s3845_s15 }
 0x1af   : > { %v1788_v30 = vpop.permute.xlu1 %1787  ;;  %v2296_v39 = vld [vmem:[#allocation4 + $0x10] sm:$0xff] }
 0x1b0   : > { %v1983_v6 = vpop.permute.xlu0 %1982  ;;  %1880 = vst.msk [vmem:[#allocation4 + $0x20] sm:$0xff] %vm1875_vm12, %v1788_v30  ;;  %3704 = vmatprep.mubr.msk.f32.mxu0 %vm2331_vm15, %v2296_v39  ;;  %v2772_v39 = vmax.f32 %v2764_v54, 0.0  ;;  %v1924_v54 = vld [vmem:[#allocation2 + $0xf1] sm:$0xff] }
 0x1b1   : > { %2074 = vst.msk [vmem:[#allocation4 + $0x28] sm:$0xff] %vm2068_vm13, %v1983_v6  ;;  %1637 = vrot.lane.b32.xlu1 %v2125_v10, %s3842_s19  ;;  %v1729_v10 = vld [vmem:[#allocation2 + $0xd8] sm:$0xff] }
 0x1b2   : > { %1611 = vrot.lane.b32.xlu0 %v2112_v9, %s3842_s19  ;;  %v1922_v9 = vld [vmem:[#allocation2 + $0xd9] sm:$0xff]  ;;  %2781 = vst.msk [vmem:[#allocation3 + $0x61] sm:$0xff] %vm482_vm8, %v2772_v39  ;;  %v1939_v39 = vld [vmem:[#allocation2 + $0x1a1] sm:$0xff] }
 0x1b3   : > { %v1981_v48 = vpop.permute.xlu1 %1980  ;;  %v2297_v3 = vld [vmem:[#allocation4 + $0x18] sm:$0xff] }
 0x1b4   : > { %v1598_v8 = vpop.permute.xlu0 %1597  ;;  %2073 = vst.msk [vmem:[#allocation4 + $0x20] sm:$0xff] %vm2068_vm13, %v1981_v48  ;;  %3705 = vmatmul.mubr.msk.f32.gmra.mrb[2].mxu0 %vm2331_vm15, %v2297_v3  ;;  %v5006_v3 = vld [vmem:[#allocation3 + $0x50] sm:$0xff] }
 0x1b5   : > { %1688 = vst.msk [vmem:[#allocation4 + $0x30] sm:$0xff] %vm1681_vm11, %v1598_v8  ;;  %2215 = vrot.lane.b32.xlu1 %v2126_v7, %s3845_s15 }
 0x1b6   : > { %1803 = vrot.lane.b32.xlu0 %v1727_v14, %s3843_s25  ;;  %v1358_v14 = vld [vmem:[#allocation2 + $0x181] sm:$0xff]  ;;  %2797 = vst.msk [vmem:[#allocation5 + $0x28] sm:$0xff] %vm482_vm8, %v5006_v3 }
 0x1b7   : > { %v2174_v56 = vpop.permute.xlu1 %2173 }
 0x1b8   : > { %v2176_v25 = vpop.permute.xlu0 %2175  ;;  %2266 = vst.msk [vmem:[#allocation4 + $0x20] sm:$0xff] %vm2261_vm14, %v2174_v56 }
 0x1b9   : > { %2267 = vst.msk [vmem:[#allocation4 + $0x28] sm:$0xff] %vm2261_vm14, %v2176_v25  ;;  %1639 = vrot.lane.b32.xlu1 %v2126_v7, %s3842_s19  ;;  %v1744_v7 = vld [vmem:[#allocation2 + $0x188] sm:$0xff] }
 0x1ba   : > { %1805 = vrot.lane.b32.xlu0 %v1728_v21, %s3843_s25  ;;  %v1937_v21 = vld [vmem:[#allocation2 + $0x189] sm:$0xff] }
 0x1bb   : > { %v1626_v31 = vpop.permute.xlu1 %1625 }
 0x1bc   : > { %v1628_v40 = vpop.permute.xlu0 %1627  ;;  %1702 = vst.msk [vmem:[#allocation4 + $0xa0] sm:$0xff] %vm1681_vm11, %v1626_v31  ;;  %v1923_v31 = vld [vmem:[#allocation2 + $0xe1] sm:$0xff] }
 0x1bd   : > { %1703 = vst.msk [vmem:[#allocation4 + $0xa8] sm:$0xff] %vm1681_vm11, %v1628_v40  ;;  %1831 = vrot.lane.b32.xlu1 %v1741_v55, %s3843_s25  ;;  %v5015_v55 = vld [vmem:[#allocation3 + $0x60] sm:$0xff]  ;;  %v2129_v40 = vld [vmem:[#allocation2 + $0x182] sm:$0xff] }
 0x1be   : > { %1996 = vrot.lane.b32.xlu0 %v1920_v20, %s3844_s30  ;;  %2798 = vst.msk [vmem:[#allocation5 + $0x30] sm:$0xff] %vm482_vm8, %v5015_v55 }
 0x1bf   : > { %v1600_v13 = vpop.permute.xlu1 %1599  ;;  %v2298_v22 = vld [vmem:[#allocation4 + $0x20] sm:$0xff] }
 0x1c0   : > { %v1820_v12 = vpop.permute.xlu0 %1819  ;;  %v2299_v33 = vld [vmem:[#allocation4 + $0x28] sm:$0xff]  ;;  %1689 = vst.msk [vmem:[#allocation4 + $0x38] sm:$0xff] %vm1681_vm11, %v1600_v13  ;;  %3707 = vmatprep.mubr.msk.f32.mxu0 %vm2331_vm15, %v2298_v22  ;;  %v2784_v13 = vld [vmem:[#allocation3] sm:$0xff] }
 0x1c1   : > { %1896 = vst.msk [vmem:[#allocation4 + $0xa0] sm:$0xff] %vm1875_vm12, %v1820_v12  ;;  %1833 = vrot.lane.b32.xlu1 %v4378_v16, %s3843_s25  ;;  %3708 = vmatmul.mubr.msk.f32.gmra.mrb[4].mxu0 %vm2331_vm15, %v2299_v33  ;;  %v2127_v16 = vld [vmem:[#allocation2 + $0x16a] sm:$0xff]  ;;  %v1537_v33 = vld [vmem:[#allocation2 + $0xda] sm:$0xff] }
 0x1c2   : > { %1448 = vrot.lane.b32.xlu0 %v1356_v57, %s3841_s18  ;;  %v2735_v12 = vld [vmem:[%s4792_s22 + $0x30] sm:$0xff]  ;;  %2792 = vst.msk [vmem:[#allocation5] sm:$0xff] %vm482_vm8, %v2784_v13 }
 0x1c3   : > { %v1792_v28 = vpop.permute.xlu1 %1791  ;;  %v2750_v22 = vmul.f32 %v4798_v38, %v2735_v12  ;;  %v5095_v12 = vld [vmem:[#allocation3 + $0x21] sm:$0xff] }
 0x1c4   : > { %v1822_v27 = vpop.permute.xlu0 %1821  ;;  %1882 = vst.msk [vmem:[#allocation4 + $0x30] sm:$0xff] %vm1875_vm12, %v1792_v28  ;;  %v2116_v28 = vld [vmem:[#allocation2 + $0xe2] sm:$0xff] }
 0x1c5   : > { %1897 = vst.msk [vmem:[#allocation4 + $0xa8] sm:$0xff] %vm1875_vm12, %v1822_v27  ;;  %2024 = vrot.lane.b32.xlu1 %v1356_v57, %s3844_s30  ;;  %v2765_v23 = vadd.f32 %v4806_v4, %v2750_v22 }
 0x1c6   : > { %2026 = vrot.lane.b32.xlu0 %v1935_v18, %s3844_s30 }
 0x1c7   : > { %v1794_v51 = vpop.permute.xlu1 %1793  ;;  %v2773_v27 = vmax.f32 %v2765_v23, 0.0  ;;  %v2132_v23 = vld [vmem:[#allocation2 + $0x1a2] sm:$0xff] }
 0x1c8   : > { %v2013_v49 = vpop.permute.xlu0 %2012  ;;  %1883 = vst.msk [vmem:[#allocation4 + $0x38] sm:$0xff] %vm1875_vm12, %v1794_v51 }
 0x1c9   : > { %2089 = vst.msk [vmem:[#allocation4 + $0xa0] sm:$0xff] %vm2068_vm13, %v2013_v49  ;;  %1998 = vrot.lane.b32.xlu1 %v1921_v37, %s3844_s30  ;;  %v2800_v37 = vld [vmem:[#allocation3 + $0x1] sm:$0xff] }
 0x1ca   : > { %2217 = vrot.lane.b32.xlu0 %v2127_v16, %s3845_s15  ;;  %2782 = vst.msk [vmem:[#allocation3 + $0x71] sm:$0xff] %vm482_vm8, %v2773_v27 }
 0x1cb   : > { %v1985_v60 = vpop.permute.xlu1 %1984 }
 0x1cc   : > { %v2015_v34 = vpop.permute.xlu0 %2014  ;;  %2075 = vst.msk [vmem:[#allocation4 + $0x30] sm:$0xff] %vm2068_vm13, %v1985_v60 }
 0x1cd   : > { %2090 = vst.msk [vmem:[#allocation4 + $0xa8] sm:$0xff] %vm2068_vm13, %v2015_v34  ;;  %2189 = vrot.lane.b32.xlu1 %v1535_v59, %s3845_s15 }
 0x1ce   : > { %1613 = vrot.lane.b32.xlu0 %v1535_v59, %s3842_s19  ;;  %v2130_v59 = vld [vmem:[#allocation2 + $0x18a] sm:$0xff] }
 0x1cf   : > { %v1987_v61 = vpop.permute.xlu1 %1986 }
 0x1d0   : > { %v2206_v42 = vpop.permute.xlu0 %2205  ;;  %2076 = vst.msk [vmem:[#allocation4 + $0x38] sm:$0xff] %vm2068_vm13, %v1987_v61 }
 0x1d1   : > { %2282 = vst.msk [vmem:[#allocation4 + $0xa0] sm:$0xff] %vm2261_vm14, %v2206_v42  ;;  %1450 = vrot.lane.b32.xlu1 %v1935_v18, %s3841_s18 }
 0x1d2   : > { %2191 = vrot.lane.b32.xlu0 %v2114_v41, %s3845_s15 }
 0x1d3   : > { %v2178_v43 = vpop.permute.xlu1 %2177 }
 0x1d4   : > { %v1602_v17 = vpop.permute.xlu0 %1601  ;;  %2268 = vst.msk [vmem:[#allocation4 + $0x30] sm:$0xff] %vm2261_vm14, %v2178_v43 }
 0x1d5   : > { %1690 = vst.msk [vmem:[#allocation4 + $0x40] sm:$0xff] %vm1681_vm11, %v1602_v17  ;;  %1641 = vrot.lane.b32.xlu1 %v2127_v16, %s3842_s19 }
 0x1d6   : > { %1615 = vrot.lane.b32.xlu0 %v2114_v41, %s3842_s19  ;;  %v2751_v41 = vmul.f32 %v4798_v38, %v2736_v46  ;;  %v1731_v38 = vld [vmem:[#allocation2 + $0xf0] sm:$0xff] }
 0x1d7   : > { %v1439_v45 = vpop.permute.xlu1 %1438  ;;  %v1926_v46 = vld [vmem:[#allocation2 + $0x109] sm:$0xff] }
 0x1d8   : > { %v2180_v44 = vpop.permute.xlu0 %2179  ;;  %v2314_v47 = vld [vmem:[#allocation4 + $0xa0] sm:$0xff]  ;;  %1512 = vst.msk [vmem:[#allocation4 + $0xb8] sm:$0xff] %vm1488_vm7, %v1439_v45  ;;  %v2766_v42 = vadd.f32 %v4806_v4, %v2751_v41  ;;  %v5059_v45 = vld [vmem:[#allocation3 + $0x70] sm:$0xff] }
 0x1d9   : > { %2269 = vst.msk [vmem:[#allocation4 + $0x38] sm:$0xff] %vm2261_vm14, %v2180_v44  ;;  %3731 = vmatprep.mubr.msk.f32.mxu1 %vm2331_vm15, %v2314_v47  ;;  %2219 = vrot.lane.b32.xlu1 %v2128_v35, %s3845_s15  ;;  %v2801_v47 = vld [vmem:[#allocation3 + $0x11] sm:$0xff] }
 0x1da   : > { %1807 = vrot.lane.b32.xlu0 %v1729_v10, %s3843_s25  ;;  %v2774_v43 = vmax.f32 %v2766_v42, 0.0  ;;  %v2849_v10 = vld [vmem:[#allocation3 + $0x2] sm:$0xff]  ;;  %2799 = vst.msk [vmem:[#allocation5 + $0x38] sm:$0xff] %vm482_vm8, %v5059_v45 }
 0x1db   : > { %v1630_v15 = vpop.permute.xlu1 %1629  ;;  %v2300_v52 = vld [vmem:[#allocation4 + $0x30] sm:$0xff]  ;;  %v1734_v42 = vld [vmem:[#allocation2 + $0x110] sm:$0xff] }
 0x1dc   : > { %v1604_v2 = vpop.permute.xlu0 %1603  ;;  %1704 = vst.msk [vmem:[#allocation4 + $0xb0] sm:$0xff] %vm1681_vm11, %v1630_v15  ;;  %3710 = vmatprep.mubr.msk.f32.mxu0 %vm2331_vm15, %v2300_v52  ;;  %v1732_v52 = vld [vmem:[#allocation2 + $0xf8] sm:$0xff] }
 0x1dd   : > { %1691 = vst.msk [vmem:[#allocation4 + $0x48] sm:$0xff] %vm1681_vm11, %v1604_v2  ;;  %1643 = vrot.lane.b32.xlu1 %v2128_v35, %s3842_s19 }
 0x1de   : > { %1809 = vrot.lane.b32.xlu0 %v1730_v19, %s3843_s25  ;;  %2783 = vst.msk [vmem:[#allocation3 + $0x81] sm:$0xff] %vm482_vm8, %v2774_v43  ;;  %v1746_v19 = vld [vmem:[#allocation2 + $0x1a0] sm:$0xff] }
 0x1df   : > { %v2208_v6 = vpop.permute.xlu1 %2207 }
 0x1e0   : > { %v1796_v63 = vpop.permute.xlu0 %1795  ;;  %v2301_v30 = vld [vmem:[#allocation4 + $0x38] sm:$0xff]  ;;  %2283 = vst.msk [vmem:[#allocation4 + $0xa8] sm:$0xff] %vm2261_vm14, %v2208_v6 }
 0x1e1   : > { %1884 = vst.msk [vmem:[#allocation4 + $0x40] sm:$0xff] %vm1875_vm12, %v1796_v63  ;;  %3711 = vmatmul.mubr.msk.f32.gmra.mrb[6].mxu0 %vm2331_vm15, %v2301_v30  ;;  %1835 = vrot.lane.b32.xlu1 %v1743_v11, %s3843_s25  ;;  %v2850_v30 = vld [vmem:[#allocation3 + $0x12] sm:$0xff] }
 0x1e2   : > { %2000 = vrot.lane.b32.xlu0 %v1922_v9, %s3844_s30 }
 0x1e3   : > { %v1632_v48 = vpop.permute.xlu1 %1631 }
 0x1e4   : > { %v1798_v8 = vpop.permute.xlu0 %1797  ;;  %1705 = vst.msk [vmem:[#allocation4 + $0xb8] sm:$0xff] %vm1681_vm11, %v1632_v48  ;;  %v2131_v48 = vld [vmem:[#allocation2 + $0x19a] sm:$0xff] }
 0x1e5   : > { %1885 = vst.msk [vmem:[#allocation4 + $0x48] sm:$0xff] %vm1875_vm12, %v1798_v8  ;;  %1837 = vrot.lane.b32.xlu1 %v1744_v7, %s3843_s25  ;;  %v1925_v8 = vld [vmem:[#allocation2 + $0xf9] sm:$0xff] }
 0x1e6   : > { %1452 = vrot.lane.b32.xlu0 %v1358_v14, %s3841_s18 }
 0x1e7   : > { %v1824_v56 = vpop.permute.xlu1 %1823  ;;  %v2315_v20 = vld [vmem:[#allocation4 + $0xa8] sm:$0xff] }
 0x1e8   : > { %v1989_v25 = vpop.permute.xlu0 %1988  ;;  %1898 = vst.msk [vmem:[#allocation4 + $0xb0] sm:$0xff] %vm1875_vm12, %v1824_v56  ;;  %3732 = vmatmul.mubr.msk.f32.vlgmr.msra.gmra.mrb[0].mxu1 %vm2331_vm15, %v2315_v20 }
 0x1e9   : > { %2077 = vst.msk [vmem:[#allocation4 + $0x40] sm:$0xff] %vm2068_vm13, %v1989_v25  ;;  %2028 = vrot.lane.b32.xlu1 %v1358_v14, %s3844_s30 }
 0x1ea   : > { %2030 = vrot.lane.b32.xlu0 %v1937_v21, %s3844_s30 }
 0x1eb   : > { %v1826_v58 = vpop.permute.xlu1 %1825 }
 0x1ec   : > { %v1441_v57 = vpop.permute.xlu0 %1440  ;;  %1899 = vst.msk [vmem:[#allocation4 + $0xb8] sm:$0xff] %vm1875_vm12, %v1826_v58 }
 0x1ed   : > { %1513 = vst.msk [vmem:[#allocation4 + $0xc0] sm:$0xff] %vm1488_vm7, %v1441_v57  ;;  %2002 = vrot.lane.b32.xlu1 %v1923_v31, %s3844_s30 }
 0x1ee   : > { %2221 = vrot.lane.b32.xlu0 %v2129_v40, %s3845_s15 }
 0x1ef   : > { %v2017_v18 = vpop.permute.xlu1 %2016 }
 0x1f0   : > { %v2019_v26 = vpop.permute.xlu0 %2018  ;;  %2091 = vst.msk [vmem:[#allocation4 + $0xb0] sm:$0xff] %vm2068_vm13, %v2017_v18 }
 0x1f1   : > { %2092 = vst.msk [vmem:[#allocation4 + $0xb8] sm:$0xff] %vm2068_vm13, %v2019_v26  ;;  %2193 = vrot.lane.b32.xlu1 %v1537_v33, %s3845_s15 }
 0x1f2   : > { %1617 = vrot.lane.b32.xlu0 %v1537_v33, %s3842_s19 }
 0x1f3   : > { %v1991_v16 = vpop.permute.xlu1 %1990 }
 0x1f4   : > { %v2210_v29 = vpop.permute.xlu0 %2209  ;;  %2078 = vst.msk [vmem:[#allocation4 + $0x48] sm:$0xff] %vm2068_vm13, %v1991_v16 }
 0x1f5   : > { %2284 = vst.msk [vmem:[#allocation4 + $0xb0] sm:$0xff] %vm2261_vm14, %v2210_v29  ;;  %1454 = vrot.lane.b32.xlu1 %v1937_v21, %s3841_s18  ;;  %s3847_s18 = smov 18  }
 0x1f6   : > { %2195 = vrot.lane.b32.xlu0 %v2116_v28, %s3845_s15 }
 0x1f7   : > { %v2182_v51 = vpop.permute.xlu1 %2181 }
 0x1f8   : > { %v1606_v49 = vpop.permute.xlu0 %1605  ;;  %2270 = vst.msk [vmem:[#allocation4 + $0x40] sm:$0xff] %vm2261_vm14, %v2182_v51 }
 0x1f9   : > { %1692 = vst.msk [vmem:[#allocation4 + $0x50] sm:$0xff] %vm1681_vm11, %v1606_v49  ;;  %1645 = vrot.lane.b32.xlu1 %v2129_v40, %s3842_s19  ;;  %v2118_v40 = vld [vmem:[#allocation2 + $0xfa] sm:$0xff] }
 0x1fa   : > { %2816 = vrot.lane.b32.xlu0 %v2800_v37, %s3846_s29  ;;  %v5113_v37 = vld [vmem:[#allocation3 + $0x22] sm:$0xff] }
 0x1fb   : > { %v1443_v60 = vpop.permute.xlu1 %1442 }
 0x1fc   : > { %v2184_v34 = vpop.permute.xlu0 %2183  ;;  %v2316_v1 = vld [vmem:[#allocation4 + $0xb0] sm:$0xff]  ;;  %1514 = vst.msk [vmem:[#allocation4 + $0xc8] sm:$0xff] %vm1488_vm7, %v1443_v60 }
 0x1fd   : > { %2271 = vst.msk [vmem:[#allocation4 + $0x48] sm:$0xff] %vm2261_vm14, %v2184_v34  ;;  %3734 = vmatprep.mubr.msk.f32.mxu1 %vm2331_vm15, %v2316_v1  ;;  %2223 = vrot.lane.b32.xlu1 %v2130_v59, %s3845_s15  ;;  %v5121_v34 = vld [vmem:[#allocation3 + $0x31] sm:$0xff] }
 0x1fe   : > { %1647 = vrot.lane.b32.xlu0 %v2130_v59, %s3842_s19 }
 0x1ff   : > { %v1634_v24 = vpop.permute.xlu1 %1633  ;;  %v2302_v17 = vld [vmem:[#allocation4 + $0x40] sm:$0xff] }
 0x200   : > { %v1608_v61 = vpop.permute.xlu0 %1607  ;;  %1706 = vst.msk [vmem:[#allocation4 + $0xc0] sm:$0xff] %vm1681_vm11, %v1634_v24  ;;  %3713 = vmatprep.mubr.msk.f32.mxu0 %vm2331_vm15, %v2302_v17 }
 0x201   : > { %1693 = vst.msk [vmem:[#allocation4 + $0x58] sm:$0xff] %vm1681_vm11, %v1608_v61  ;;  %1619 = vrot.lane.b32.xlu1 %v2116_v28, %s3842_s19  ;;  %v1733_v28 = vld [vmem:[#allocation2 + $0x108] sm:$0xff] }
 0x202   : > { %1839 = vrot.lane.b32.xlu0 %v1745_v0, %s3843_s25 }
 0x203   : > { %v2212_v4 = vpop.permute.xlu1 %2211 }
 0x204   : > { %v1800_v35 = vpop.permute.xlu0 %1799  ;;  %v2303_v44 = vld [vmem:[#allocation4 + $0x48] sm:$0xff]  ;;  %2285 = vst.msk [vmem:[#allocation4 + $0xb8] sm:$0xff] %vm2261_vm14, %v2212_v4 }
 0x205   : > { %1886 = vst.msk [vmem:[#allocation4 + $0x50] sm:$0xff] %vm1875_vm12, %v1800_v35  ;;  %3714 = vmatmul.mubr.msk.f32.gmra.mrb[8].mxu0 %vm2331_vm15, %v2303_v44  ;;  %1811 = vrot.lane.b32.xlu1 %v1731_v38, %s3843_s25  ;;  %v2119_v38 = vld [vmem:[#allocation2 + $0x10a] sm:$0xff] }
 0x206   : > { %2865 = vrot.lane.b32.xlu0 %v2849_v10, %s3840_s17  ;;  %v1927_v44 = vld [vmem:[#allocation2 + $0x111] sm:$0xff] }
 0x207   : > { %v1636_v15 = vpop.permute.xlu1 %1635 }
 0x208   : > { %v1802_v2 = vpop.permute.xlu0 %1801  ;;  %1707 = vst.msk [vmem:[#allocation4 + $0xc8] sm:$0xff] %vm1681_vm11, %v1636_v15  ;;  %v3201_v15 = vld [vmem:[%s5466_s7] sm:$0xff] }
 0x209   : > { %1887 = vst.msk [vmem:[#allocation4 + $0x58] sm:$0xff] %vm1875_vm12, %v1802_v2  ;;  %2818 = vrot.lane.b32.xlu1 %v2801_v47, %s3846_s29 }
 0x20a   : > { %1841 = vrot.lane.b32.xlu0 %v1746_v19, %s3843_s25 }
 0x20b   : > { %v1828_v9 = vpop.permute.xlu1 %1827  ;;  %v2317_v11 = vld [vmem:[#allocation4 + $0xb8] sm:$0xff] }
 0x20c   : > { %v1993_v5 = vpop.permute.xlu0 %1992  ;;  %1900 = vst.msk [vmem:[#allocation4 + $0xc0] sm:$0xff] %vm1875_vm12, %v1828_v9  ;;  %3735 = vmatmul.mubr.msk.f32.gmra.mrb[2].mxu1 %vm2331_vm15, %v2317_v11  ;;  %v3203_v11 = vld [vmem:[%s5466_s7 + $0x10] sm:$0xff] }
 0x20d   : > { %2079 = vst.msk [vmem:[#allocation4 + $0x50] sm:$0xff] %vm2068_vm13, %v1993_v5  ;;  %1813 = vrot.lane.b32.xlu1 %v1732_v52, %s3843_s25  ;;  %v3202_v52 = vld [vmem:[%s5466_s7 + $0x8] sm:$0xff] }
 0x20e   : > { %2032 = vrot.lane.b32.xlu0 %v1938_v50, %s3844_s30 }
 0x20f   : > { %v1830_v6 = vpop.permute.xlu1 %1829 }
 0x210   : > { %v1445_v63 = vpop.permute.xlu0 %1444  ;;  %1901 = vst.msk [vmem:[#allocation4 + $0xc8] sm:$0xff] %vm1875_vm12, %v1830_v6  ;;  %v5178_v6 = vld [vmem:[#allocation3 + $0x41] sm:$0xff] }
 0x211   : > { %1515 = vst.msk [vmem:[#allocation4 + $0xd0] sm:$0xff] %vm1488_vm7, %v1445_v63  ;;  %2004 = vrot.lane.b32.xlu1 %v1924_v54, %s3844_s30  ;;  %v3204_v54 = vld [vmem:[%s5466_s7 + $0x18] sm:$0xff] }
 0x212   : > { %2914 = vrot.lane.b32.xlu0 %v4873_v36, %s3847_s18  ;;  %v2117_v36 = vld [vmem:[#allocation2 + $0xf2] sm:$0xff]  ;;  %v3787_v63 = vpack.c.bf16 %v3204_v54, %v3203_v11 }
 0x213   : > { %v2021_v7 = vpop.permute.xlu1 %2020 }
 0x214   : > { %v2023_v14 = vpop.permute.xlu0 %2022  ;;  %2093 = vst.msk [vmem:[#allocation4 + $0xc0] sm:$0xff] %vm2068_vm13, %v2021_v7  ;;  %v3206_v7 = vld [vmem:[%s5466_s7 + $0x28] sm:$0xff] }
 0x215   : > { %2094 = vst.msk [vmem:[#allocation4 + $0xc8] sm:$0xff] %vm2068_vm13, %v2023_v14  ;;  %2867 = vrot.lane.b32.xlu1 %v2850_v30, %s3840_s17  ;;  %v3205_v14 = vld [vmem:[%s5466_s7 + $0x20] sm:$0xff] }
 0x216   : > { %2034 = vrot.lane.b32.xlu0 %v1939_v39, %s3844_s30 }
 0x217   : > { %v1995_v25 = vpop.permute.xlu1 %1994 }
 0x218   : > { %v2214_v21 = vpop.permute.xlu0 %2213  ;;  %2080 = vst.msk [vmem:[#allocation4 + $0x58] sm:$0xff] %vm2068_vm13, %v1995_v25 }
 0x219   : > { %2286 = vst.msk [vmem:[#allocation4 + $0xc0] sm:$0xff] %vm2261_vm14, %v2214_v21  ;;  %2006 = vrot.lane.b32.xlu1 %v1925_v8, %s3844_s30  ;;  %v3791_v8 = vpack.c.bf16 %v3206_v7, %v3205_v14  ;;  %v3003_v7 = vld [vmem:[#allocation3 + $0x82] sm:$0xff] }
 0x21a   : > { %2225 = vrot.lane.b32.xlu0 %v2131_v48, %s3845_s15  ;;  %v2120_v48 = vld [vmem:[#allocation2 + $0x112] sm:$0xff] }
 0x21b   : > { %v2186_v20 = vpop.permute.xlu1 %2185 }
 0x21c   : > { %v1610_v56 = vpop.permute.xlu0 %1609  ;;  %2272 = vst.msk [vmem:[#allocation4 + $0x50] sm:$0xff] %vm2261_vm14, %v2186_v20  ;;  %v2805_v20 = vld [vmem:[#allocation3 + $0x51] sm:$0xff] }
 0x21d   : > { %1694 = vst.msk [vmem:[#allocation4 + $0x60] sm:$0xff] %vm1681_vm11, %v1610_v56  ;;  %2197 = vrot.lane.b32.xlu1 %v2117_v36, %s3845_s15  ;;  %v3207_v56 = vld [vmem:[%s5466_s7 + $0x30] sm:$0x3f] }
 0x21e   : > { %2963 = vrot.lane.b32.xlu0 %v2801_v47, %s3843_s25 }
 0x21f   : > { %v1447_v57 = vpop.permute.xlu1 %1446 }
 0x220   : > { %v2188_v31 = vpop.permute.xlu0 %2187  ;;  %v2318_v58 = vld [vmem:[#allocation4 + $0xc0] sm:$0xff]  ;;  %1516 = vst.msk [vmem:[#allocation4 + $0xd8] sm:$0xff] %vm1488_vm7, %v1447_v57 }
 0x221   : > { %2273 = vst.msk [vmem:[#allocation4 + $0x58] sm:$0xff] %vm2261_vm14, %v2188_v31  ;;  %3737 = vmatprep.mubr.msk.f32.mxu1 %vm2331_vm15, %v2318_v58  ;;  %2916 = vrot.lane.b32.xlu1 %v4899_v53, %s3847_s18  ;;  %v2999_v57 = vld [vmem:[#allocation3 + $0x42] sm:$0xff] }
 0x222   : > { %2199 = vrot.lane.b32.xlu0 %v2118_v40, %s3845_s15 }
 0x223   : > { %v1638_v22 = vpop.permute.xlu1 %1637  ;;  %v2304_v33 = vld [vmem:[#allocation4 + $0x50] sm:$0xff] }
 0x224   : > { %v1612_v13 = vpop.permute.xlu0 %1611  ;;  %1708 = vst.msk [vmem:[#allocation4 + $0xd0] sm:$0xff] %vm1681_vm11, %v1638_v22  ;;  %3716 = vmatprep.mubr.msk.f32.mxu0 %vm2331_vm15, %v2304_v33 }
 0x225   : > { %1695 = vst.msk [vmem:[#allocation4 + $0x68] sm:$0xff] %vm1681_vm11, %v1612_v13  ;;  %1621 = vrot.lane.b32.xlu1 %v2117_v36, %s3842_s19  ;;  %v2854_v13 = vld [vmem:[#allocation3 + $0x52] sm:$0xff] }
 0x226   : > { %2820 = vrot.lane.b32.xlu0 %v5095_v12, %s3846_s29 }
 0x227   : > { %v2216_v18 = vpop.permute.xlu1 %2215 }
 0x228   : > { %v1804_v26 = vpop.permute.xlu0 %1803  ;;  %v2305_v27 = vld [vmem:[#allocation4 + $0x58] sm:$0xff]  ;;  %2287 = vst.msk [vmem:[#allocation4 + $0xc8] sm:$0xff] %vm2261_vm14, %v2216_v18 }
 0x229   : > { %1888 = vst.msk [vmem:[#allocation4 + $0x60] sm:$0xff] %vm1875_vm12, %v1804_v26  ;;  %3717 = vmatmul.mubr.msk.f32.gmra.mrb[10].mxu0 %vm2331_vm15, %v2305_v27  ;;  %2227 = vrot.lane.b32.xlu1 %v2132_v23, %s3845_s15 }
 0x22a   : > { %3012 = vrot.lane.b32.xlu0 %v2850_v30, %s3848_s13 }
 0x22b   : > { %v1640_v16 = vpop.permute.xlu1 %1639 }
 0x22c   : > { %v1806_v29 = vpop.permute.xlu0 %1805  ;;  %1709 = vst.msk [vmem:[#allocation4 + $0xd8] sm:$0xff] %vm1681_vm11, %v1640_v16 }
 0x22d   : > { %1889 = vst.msk [vmem:[#allocation4 + $0x68] sm:$0xff] %vm1875_vm12, %v1806_v29  ;;  %2965 = vrot.lane.b32.xlu1 %v5095_v12, %s3843_s25 }
 0x22e   : > { %1815 = vrot.lane.b32.xlu0 %v1733_v28, %s3843_s25 }
 0x22f   : > { %v1832_v51 = vpop.permute.xlu1 %1831  ;;  %v2319_v59 = vld [vmem:[#allocation4 + $0xc8] sm:$0xff] }
 0x230   : > { %v1997_v49 = vpop.permute.xlu0 %1996  ;;  %1902 = vst.msk [vmem:[#allocation4 + $0xd0] sm:$0xff] %vm1875_vm12, %v1832_v51  ;;  %3738 = vmatmul.mubr.msk.f32.gmra.mrb[4].mxu1 %vm2331_vm15, %v2319_v59 }
 0x231   : > { %2081 = vst.msk [vmem:[#allocation4 + $0x60] sm:$0xff] %vm2068_vm13, %v1997_v49  ;;  %1623 = vrot.lane.b32.xlu1 %v2118_v40, %s3842_s19  ;;  %s3850_s19 = smov 42  }
 0x232   : > { %2869 = vrot.lane.b32.xlu0 %v5113_v37, %s3840_s17 }
 0x233   : > { %v1834_v1 = vpop.permute.xlu1 %1833 }
 0x234   : > { %v1449_v60 = vpop.permute.xlu0 %1448  ;;  %1903 = vst.msk [vmem:[#allocation4 + $0xd8] sm:$0xff] %vm1875_vm12, %v1834_v1 }
 0x235   : > { %1517 = vst.msk [vmem:[#allocation4 + $0xe0] sm:$0xff] %vm1488_vm7, %v1449_v60  ;;  %2822 = vrot.lane.b32.xlu1 %v5121_v34, %s3846_s29  ;;  %v2807_v60 = vld [vmem:[#allocation3 + $0x71] sm:$0xff] }
 0x236   : > { %3062 = vrot.lane.b32.xlu0 %v4899_v53, %s3849_s14  ;;  %v5139_v53 = vld [vmem:[#allocation3 + $0x32] sm:$0xff] }
 0x237   : > { %v2025_v0 = vpop.permute.xlu1 %2024 }
 0x238   : > { %v2027_v41 = vpop.permute.xlu0 %2026  ;;  %2095 = vst.msk [vmem:[#allocation4 + $0xd0] sm:$0xff] %vm2068_vm13, %v2025_v0 }
 0x239   : > { %2096 = vst.msk [vmem:[#allocation4 + $0xd8] sm:$0xff] %vm2068_vm13, %v2027_v41  ;;  %3014 = vrot.lane.b32.xlu1 %v5113_v37, %s3848_s13 }
 0x23a   : > { %2008 = vrot.lane.b32.xlu0 %v1926_v46, %s3844_s30 }
 0x23b   : > { %v1999_v24 = vpop.permute.xlu1 %1998 }
 0x23c   : > { %v2218_v61 = vpop.permute.xlu0 %2217  ;;  %2082 = vst.msk [vmem:[#allocation4 + $0x68] sm:$0xff] %vm2068_vm13, %v1999_v24 }
 0x23d   : > { %2288 = vst.msk [vmem:[#allocation4 + $0xd0] sm:$0xff] %vm2261_vm14, %v2218_v61  ;;  %1817 = vrot.lane.b32.xlu1 %v1734_v42, %s3843_s25  ;;  %v3001_v61 = vld [vmem:[#allocation3 + $0x62] sm:$0xff] }
 0x23e   : > { %2918 = vrot.lane.b32.xlu0 %v4940_v32, %s3847_s18 }
 0x23f   : > { %v2190_v43 = vpop.permute.xlu1 %2189 }
 0x240   : > { %v1614_v17 = vpop.permute.xlu0 %1613  ;;  %2274 = vst.msk [vmem:[#allocation4 + $0x60] sm:$0xff] %vm2261_vm14, %v2190_v43 }
 0x241   : > { %1696 = vst.msk [vmem:[#allocation4 + $0x70] sm:$0xff] %vm1681_vm11, %v1614_v17  ;;  %2871 = vrot.lane.b32.xlu1 %v5139_v53, %s3840_s17  ;;  %v2856_v17 = vld [vmem:[#allocation3 + $0x72] sm:$0xff] }
 0x242   : > { %3111 = vrot.lane.b32.xlu0 %v5095_v12, %s3850_s19 }
 0x243   : > { %v1451_v35 = vpop.permute.xlu1 %1450 }
 0x244   : > { %v2192_v10 = vpop.permute.xlu0 %2191  ;;  %v2320_v4 = vld [vmem:[#allocation4 + $0xd0] sm:$0xff]  ;;  %1518 = vst.msk [vmem:[#allocation4 + $0xe8] sm:$0xff] %vm1488_vm7, %v1451_v35 }
 0x245   : > { %2275 = vst.msk [vmem:[#allocation4 + $0x68] sm:$0xff] %vm2261_vm14, %v2192_v10  ;;  %3740 = vmatprep.mubr.msk.f32.mxu1 %vm2331_vm15, %v2320_v4  ;;  %3064 = vrot.lane.b32.xlu1 %v4940_v32, %s3849_s14  ;;  %v3783_v32 = vpack.c.bf16 %v3202_v52, %v3201_v15  ;;  %v2905_v4 = vld [vmem:[#allocation3 + $0x80] sm:$0xff] }
 0x246   : > { %2201 = vrot.lane.b32.xlu0 %v2119_v38, %s3845_s15 }
 0x247   : > { %v1642_v19 = vpop.permute.xlu1 %1641  ;;  %v2306_v2 = vld [vmem:[#allocation4 + $0x60] sm:$0xff]  ;;  %3784 = vmatprep.subr.bf16.mxu1 %v3783_v32 }
 0x248   : > { %v1616_v47 = vpop.permute.xlu0 %1615  ;;  %1710 = vst.msk [vmem:[#allocation4 + $0xe0] sm:$0xff] %vm1681_vm11, %v1642_v19  ;;  %3719 = vmatprep.mubr.msk.f32.mxu0 %vm2331_vm15, %v2306_v2  ;;  %3786 = vmatpush3.bf16.msra.mxu1 %v3783_v32 }
 0x249   : > { %1697 = vst.msk [vmem:[#allocation4 + $0x78] sm:$0xff] %vm1681_vm11, %v1616_v47  ;;  %2010 = vrot.lane.b32.xlu1 %v1927_v44, %s3844_s30  ;;  %s3851_s30 = smov 48   ;;  %3788 = vmatprep.subr.bf16.mxu1 %v3787_v63 }
 0x24a   : > { %2967 = vrot.lane.b32.xlu0 %v5121_v34, %s3843_s25 }
 0x24b   : > { %v2220_v5 = vpop.permute.xlu1 %2219 }
 0x24c   : > { %v1808_v50 = vpop.permute.xlu0 %1807  ;;  %v2307_v9 = vld [vmem:[#allocation4 + $0x68] sm:$0xff]  ;;  %2289 = vst.msk [vmem:[#allocation4 + $0xd8] sm:$0xff] %vm2261_vm14, %v2220_v5  ;;  %3790 = vmatpush3.bf16.msra.mxu1 %v3787_v63 }
 0x24d   : > { %1890 = vst.msk [vmem:[#allocation4 + $0x70] sm:$0xff] %vm1875_vm12, %v1808_v50  ;;  %3720 = vmatmul.mubr.msk.f32.gmra.mrb[12].mxu0 %vm2331_vm15, %v2307_v9  ;;  %2920 = vrot.lane.b32.xlu1 %v4966_v62, %s3847_s18  ;;  %v2954_v50 = vld [vmem:[#allocation3 + $0x81] sm:$0xff] }
 0x24e   : > { %3160 = vrot.lane.b32.xlu0 %v5113_v37, %s3851_s30  ;;  %3792 = vmatprep.subr.bf16.mxu1 %v3791_v8  ;;  %v5234_v37 = vld [vmem:[#allocation3 + $0x61] sm:$0xff] }
 0x24f   : > { %v1644_v39 = vpop.permute.xlu1 %1643 }
 0x250   : > { %v1810_v30 = vpop.permute.xlu0 %1809  ;;  %1711 = vst.msk [vmem:[#allocation4 + $0xe8] sm:$0xff] %vm1681_vm11, %v1644_v39  ;;  %3794 = vmatpush3.bf16.msra.mxu1 %v3791_v8 }
 0x251   : > { %1891 = vst.msk [vmem:[#allocation4 + $0x78] sm:$0xff] %vm1875_vm12, %v1810_v30  ;;  %3113 = vrot.lane.b32.xlu1 %v5121_v34, %s3850_s19  ;;  %3761 = vmatprep.subr.msk.mxu1 %vm3233_vm0, %v3207_v56 }
 0x252   : > { %2824 = vrot.lane.b32.xlu0 %v5178_v6, %s3846_s29 }
 0x253   : > { %v1836_v25 = vpop.permute.xlu1 %1835  ;;  %v2321_v36 = vld [vmem:[#allocation4 + $0xd8] sm:$0xff] }
 0x254   : > { %v2001_v21 = vpop.permute.xlu0 %2000  ;;  %1904 = vst.msk [vmem:[#allocation4 + $0xe0] sm:$0xff] %vm1875_vm12, %v1836_v25  ;;  %3741 = vmatmul.mubr.msk.f32.gmra.mrb[6].mxu1 %vm2331_vm15, %v2321_v36  ;;  %v3053_v25 = vld [vmem:[#allocation3 + $0x90] sm:$0xff] }
 0x255   : > { %2083 = vst.msk [vmem:[#allocation4 + $0x70] sm:$0xff] %vm2068_vm13, %v2001_v21  ;;  %2203 = vrot.lane.b32.xlu1 %v2120_v48, %s3845_s15  ;;  %3762 = vmatpush3.msk.msra.mxu1 %vm3233_vm0, %v3207_v56 }
 0x256   : > { %3016 = vrot.lane.b32.xlu0 %v5139_v53, %s3848_s13 }
 0x257   : > { %v1838_v31 = vpop.permute.xlu1 %1837 }
 0x258   : > { %v1453_v40 = vpop.permute.xlu0 %1452  ;;  %1905 = vst.msk [vmem:[#allocation4 + $0xe8] sm:$0xff] %vm1875_vm12, %v1838_v31 }
 0x259   : > { %1519 = vst.msk [vmem:[#allocation4 + $0xf0] sm:$0xff] %vm1488_vm7, %v1453_v40  ;;  %2969 = vrot.lane.b32.xlu1 %v5178_v6, %s3843_s25 }
 0x25a   : > { %2826 = vrot.lane.b32.xlu0 %v2805_v20, %s3846_s29 }
 0x25b   : > { %v2029_v12 = vpop.permute.xlu1 %2028 }
 0x25c   : > { %v2031_v58 = vpop.permute.xlu0 %2030  ;;  %2097 = vst.msk [vmem:[#allocation4 + $0xe0] sm:$0xff] %vm2068_vm13, %v2029_v12 }
 0x25d   : > { %2098 = vst.msk [vmem:[#allocation4 + $0xe8] sm:$0xff] %vm2068_vm13, %v2031_v58  ;;  %3162 = vrot.lane.b32.xlu1 %v5139_v53, %s3851_s30  ;;  %v3151_v58 = vld [vmem:[#allocation3 + $0x92] sm:$0xff] }
 0x25e   : > { %3018 = vrot.lane.b32.xlu0 %v2999_v57, %s3848_s13 }
 0x25f   : > { %v2003_v33 = vpop.permute.xlu1 %2002 }
 0x260   : > { %v2222_v22 = vpop.permute.xlu0 %2221  ;;  %2084 = vst.msk [vmem:[#allocation4 + $0x78] sm:$0xff] %vm2068_vm13, %v2003_v33 }
 0x261   : > { %2290 = vst.msk [vmem:[#allocation4 + $0xe0] sm:$0xff] %vm2261_vm14, %v2222_v22  ;;  %2873 = vrot.lane.b32.xlu1 %v2999_v57, %s3840_s17 }
 0x262   : > { %2875 = vrot.lane.b32.xlu0 %v2854_v13, %s3840_s17 }
 0x263   : > { %v2194_v26 = vpop.permute.xlu1 %2193 }
 0x264   : > { %v1618_v23 = vpop.permute.xlu0 %1617  ;;  %2276 = vst.msk [vmem:[#allocation4 + $0x70] sm:$0xff] %vm2261_vm14, %v2194_v26 }
 0x265   : > { %1698 = vst.msk [vmem:[#allocation4 + $0x80] sm:$0xff] %vm1681_vm11, %v1618_v23  ;;  %3066 = vrot.lane.b32.xlu1 %v4966_v62, %s3849_s14 }
 0x266   : > { %3068 = vrot.lane.b32.xlu0 %v5006_v3, %s3849_s14 }
 0x267   : > { %v1455_v27 = vpop.permute.xlu1 %1454 }
 0x268   : > { %v2196_v18 = vpop.permute.xlu0 %2195  ;;  %v2322_v28 = vld [vmem:[#allocation4 + $0xe0] sm:$0xff]  ;;  %1520 = vst.msk [vmem:[#allocation4 + $0xf8] sm:$0xff] %vm1488_vm7, %v1455_v27  ;;  %vm3086_vm7 = vcmask 343328  }
 0x269   : > { %2277 = vst.msk [vmem:[#allocation4 + $0x78] sm:$0xff] %vm2261_vm14, %v2196_v18  ;;  %3743 = vmatprep.mubr.msk.f32.mxu1 %vm2331_vm15, %v2322_v28  ;;  %2922 = vrot.lane.b32.xlu1 %v5006_v3, %s3847_s18 }
 0x26a   : > { %2924 = vrot.lane.b32.xlu0 %v5015_v55, %s3847_s18 }
 0x26b   : > { %v1646_v62 = vpop.permute.xlu1 %1645  ;;  %v2308_v16 = vld [vmem:[#allocation4 + $0x70] sm:$0xff] }
 0x26c   : > { %v2817_v29 = vpop.permute.xlu0 %2816  ;;  %1712 = vst.msk [vmem:[#allocation4 + $0xf0] sm:$0xff] %vm1681_vm11, %v1646_v62  ;;  %3722 = vmatprep.mubr.msk.f32.mxu0 %vm2331_vm15, %v2308_v16 }
 0x26d   : > { %2841 = vst.msk [vmem:[#allocation5] sm:$0xff] %vm2840_vm1, %v2817_v29  ;;  %3115 = vrot.lane.b32.xlu1 %v5178_v6, %s3850_s19 }
 0x26e   : > { %3117 = vrot.lane.b32.xlu0 %v2805_v20, %s3850_s19 }
 0x26f   : > { %v2224_v3 = vpop.permute.xlu1 %2223 }
 0x270   : > { %v1648_v49 = vpop.permute.xlu0 %1647  ;;  %v2309_v51 = vld [vmem:[#allocation4 + $0x78] sm:$0xff]  ;;  %2291 = vst.msk [vmem:[#allocation4 + $0xe8] sm:$0xff] %vm2261_vm14, %v2224_v3 }
 0x271   : > { %1713 = vst.msk [vmem:[#allocation4 + $0xf8] sm:$0xff] %vm1681_vm11, %v1648_v49  ;;  %3723 = vmatmul.mubr.msk.f32.gmra.mrb[14].mxu0 %vm2331_vm15, %v2309_v51  ;;  %2971 = vrot.lane.b32.xlu1 %v2805_v20, %s3843_s25  ;;  %v3102_v20 = vld [vmem:[#allocation3 + $0x91] sm:$0xff] }
 0x272   : > { %2828 = vrot.lane.b32.xlu0 %v5234_v37, %s3846_s29 }
 0x273   : > { %v1620_v59 = vpop.permute.xlu1 %1619 }
 0x274   : > { %v1840_v34 = vpop.permute.xlu0 %1839  ;;  %1699 = vst.msk [vmem:[#allocation4 + $0x88] sm:$0xff] %vm1681_vm11, %v1620_v59 }
 0x275   : > { %1906 = vst.msk [vmem:[#allocation4 + $0xf0] sm:$0xff] %vm1875_vm12, %v1840_v34  ;;  %3164 = vrot.lane.b32.xlu1 %v2999_v57, %s3851_s30 }
 0x276   : > { %3020 = vrot.lane.b32.xlu0 %v2854_v13, %s3848_s13 }
 0x277   : > { %v3703_v1 = vpop.f32.mrb[0].mxu0  ;;  %v1812_v46 = vpop.permute.xlu1 %1811  ;;  %v2323_v41 = vld [vmem:[#allocation4 + $0xe8] sm:$0xff] }
 0x278   : > { %1892 = vst.msk [vmem:[#allocation4 + $0x80] sm:$0xff] %vm1875_vm12, %v1812_v46  ;;  %v2866_v0 = vpop.permute.xlu0 %2865  ;;  %v2498_v42 = vpop.f32.mrb[1].mxu0  ;;  %3744 = vmatmul.mubr.msk.f32.gmra.mrb[8].mxu1 %vm2331_vm15, %v2323_v41 }
 0x279   : > { %2890 = vst.msk [vmem:[#allocation5] sm:$0xff] %vm2889_vm2, %v2866_v0  ;;  %2973 = vrot.lane.b32.xlu1 %v5234_v37, %s3843_s25 }
 0x27a   : > { %2830 = vrot.lane.b32.xlu0 %v2807_v60, %s3846_s29 }
 0x27b   : > { %v2819_v24 = vpop.permute.xlu1 %2818 }
 0x27c   : > { %2842 = vst.msk [vmem:[#allocation5 + $0x8] sm:$0xff] %vm2840_vm1, %v2819_v24  ;;  %v1842_v53 = vpop.permute.xlu0 %1841 }
 0x27d   : > { %1907 = vst.msk [vmem:[#allocation4 + $0xf8] sm:$0xff] %vm1875_vm12, %v1842_v53  ;;  %3166 = vrot.lane.b32.xlu1 %v2854_v13, %s3851_s30 }
 0x27e   : > { %3022 = vrot.lane.b32.xlu0 %v3001_v61, %s3848_s13 }
 0x27f   : > { %v1814_v43 = vpop.permute.xlu1 %1813 }
 0x280   : > { %1893 = vst.msk [vmem:[#allocation4 + $0x88] sm:$0xff] %vm1875_vm12, %v1814_v43  ;;  %v2033_v38 = vpop.permute.xlu0 %2032 }
 0x281   : > { %2099 = vst.msk [vmem:[#allocation4 + $0xf0] sm:$0xff] %vm2068_vm13, %v2033_v38  ;;  %2877 = vrot.lane.b32.xlu1 %v3001_v61, %s3840_s17 }
 0x282   : > { %2879 = vrot.lane.b32.xlu0 %v2856_v17, %s3840_s17 }
 0x283   : > { %v2005_v10 = vpop.permute.xlu1 %2004 }
 0x284   : > { %2085 = vst.msk [vmem:[#allocation4 + $0x80] sm:$0xff] %vm2068_vm13, %v2005_v10  ;;  %v2915_v35 = vpop.permute.xlu0 %2914 }
 0x285   : > { %2939 = vst.msk [vmem:[#allocation5] sm:$0xff] %vm2938_vm3, %v2915_v35  ;;  %3070 = vrot.lane.b32.xlu1 %v5015_v55, %s3849_s14 }
 0x286   : > { %3072 = vrot.lane.b32.xlu0 %v5059_v45, %s3849_s14 }
 0x287   : > { %v2868_v44 = vpop.permute.xlu1 %2867  ;;  %v3706_v47 = vpop.f32.mrb[2].mxu0 }
 0x288   : > { %2891 = vst.msk [vmem:[#allocation5 + $0x8] sm:$0xff] %vm2889_vm2, %v2868_v44  ;;  %v2658_v19 = vmax.f32 %v3703_v1, %v3706_v47  ;;  %v2035_v2 = vpop.permute.xlu0 %2034  ;;  %v2508_v15 = vpop.f32.mrb[3].mxu0 }
 0x289   : > { %2100 = vst.msk [vmem:[#allocation4 + $0xf8] sm:$0xff] %vm2068_vm13, %v2035_v2  ;;  %v2657_v52 = vmax.f32 %v2498_v42, %v2508_v15  ;;  %2926 = vrot.lane.b32.xlu1 %v5059_v45, %s3847_s18 }
 0x28a   : > { %2928 = vrot.lane.b32.xlu0 %v2905_v4, %s3847_s18  ;;  %2675 = vst.msk [vmem:[#allocation6 + $0x8] sm:$0xff] %vm2673_vm4, %v2658_v19 }
 0x28b   : > { %2674 = vst.msk [vmem:[#allocation6] sm:$0xff] %vm2673_vm4, %v2657_v52  ;;  %v2007_v55 = vpop.permute.xlu1 %2006 }
 0x28c   : > { %2086 = vst.msk [vmem:[#allocation4 + $0x88] sm:$0xff] %vm2068_vm13, %v2007_v55  ;;  %v2226_v32 = vpop.permute.xlu0 %2225 }
 0x28d   : > { %2292 = vst.msk [vmem:[#allocation4 + $0xf0] sm:$0xff] %vm2261_vm14, %v2226_v32  ;;  %3119 = vrot.lane.b32.xlu1 %v5234_v37, %s3850_s19 }
 0x28e   : > { %3121 = vrot.lane.b32.xlu0 %v2807_v60, %s3850_s19 }
 0x28f   : > { %v2198_v45 = vpop.permute.xlu1 %2197 }
 0x290   : > { %2278 = vst.msk [vmem:[#allocation4 + $0x80] sm:$0xff] %vm2261_vm14, %v2198_v45  ;;  %v2964_v5 = vpop.permute.xlu0 %2963 }
 0x291   : > { %2988 = vst.msk [vmem:[#allocation5] sm:$0xff] %vm2987_vm5, %v2964_v5  ;;  %2975 = vrot.lane.b32.xlu1 %v2807_v60, %s3843_s25 }
 0x292   : > { %2977 = vrot.lane.b32.xlu0 %v2954_v50, %s3843_s25 }
 0x293   : > { %v2917_v9 = vpop.permute.xlu1 %2916 }
 0x294   : > { %2940 = vst.msk [vmem:[#allocation5 + $0x8] sm:$0xff] %vm2938_vm3, %v2917_v9  ;;  %v2200_v11 = vpop.permute.xlu0 %2199  ;;  %v2324_v54 = vld [vmem:[#allocation4 + $0xf0] sm:$0xff]  ;;  %v3709_v63 = vpop.f32.mrb[4].mxu0 }
 0x295   : > { %2279 = vst.msk [vmem:[#allocation4 + $0x88] sm:$0xff] %vm2261_vm14, %v2200_v11  ;;  %3168 = vrot.lane.b32.xlu1 %v3001_v61, %s3851_s30  ;;  %v2518_v6 = vpop.f32.mrb[5].mxu0  ;;  %3746 = vmatprep.mubr.msk.f32.mxu1 %vm2331_vm15, %v2324_v54 }
 0x296   : > { %3170 = vrot.lane.b32.xlu0 %v2856_v17, %s3851_s30 }
 0x297   : > { %v1622_v30 = vpop.permute.xlu1 %1621  ;;  %v2310_v39 = vld [vmem:[#allocation4 + $0x80] sm:$0xff] }
 0x298   : > { %1700 = vst.msk [vmem:[#allocation4 + $0x90] sm:$0xff] %vm1681_vm11, %v1622_v30  ;;  %v2821_v14 = vpop.permute.xlu0 %2820  ;;  %3725 = vmatprep.mubr.msk.f32.mxu0 %vm2331_vm15, %v2310_v39 }
 0x299   : > { %2843 = vst.msk [vmem:[#allocation5 + $0x10] sm:$0xff] %vm2840_vm1, %v2821_v14  ;;  %3024 = vrot.lane.b32.xlu1 %v2856_v17, %s3848_s13 }
 0x29a   : > { %3074 = vrot.lane.b32.xlu0 %v2905_v4, %s3849_s14 }
 0x29b   : > { %v2228_v8 = vpop.permute.xlu1 %2227 }
 0x29c   : > { %2293 = vst.msk [vmem:[#allocation4 + $0xf8] sm:$0xff] %vm2261_vm14, %v2228_v8  ;;  %v3013_v48 = vpop.permute.xlu0 %3012  ;;  %v2311_v21 = vld [vmem:[#allocation4 + $0x88] sm:$0xff] }
 0x29d   : > { %3037 = vst.msk [vmem:[#allocation5] sm:$0xff] %vm3036_vm6, %v3013_v48  ;;  %3026 = vrot.lane.b32.xlu1 %v3003_v7, %s3848_s13  ;;  %3726 = vmatmul.mubr.msk.f32.gmra.mrb[16].mxu0 %vm2331_vm15, %v2311_v21 }
 0x29e   : > { %3123 = vrot.lane.b32.xlu0 %v2954_v50, %s3850_s19 }
 0x29f   : > { %v2966_v36 = vpop.permute.xlu1 %2965 }
 0x2a0   : > { %2989 = vst.msk [vmem:[#allocation5 + $0x8] sm:$0xff] %vm2987_vm5, %v2966_v36  ;;  %v1816_v56 = vpop.permute.xlu0 %1815 }
 0x2a1   : > { %1894 = vst.msk [vmem:[#allocation4 + $0x90] sm:$0xff] %vm1875_vm12, %v1816_v56  ;;  %3076 = vrot.lane.b32.xlu1 %v3053_v25, %s3849_s14 }
 0x2a2   : > { %3172 = vrot.lane.b32.xlu0 %v3003_v7, %s3851_s30 }
 0x2a3   : > { %v1624_v40 = vpop.permute.xlu1 %1623  ;;  %v2325_v31 = vld [vmem:[#allocation4 + $0xf8] sm:$0xff] }
 0x2a4   : > { %1701 = vst.msk [vmem:[#allocation4 + $0x98] sm:$0xff] %vm1681_vm11, %v1624_v40  ;;  %v2870_v57 = vpop.permute.xlu0 %2869  ;;  %3747 = vmatmul.mubr.msk.f32.gmra.mrb[10].mxu1 %vm2331_vm15, %v2325_v31  ;;  %vm3208_vm11 = vcmask 441344  }
 0x2a5   : > { %2892 = vst.msk [vmem:[#allocation5 + $0x10] sm:$0xff] %vm2889_vm2, %v2870_v57  ;;  %3125 = vrot.lane.b32.xlu1 %v3102_v20, %s3850_s19 }
 0x2a7   : > { %v2823_v12 = vpop.permute.xlu1 %2822 }
 0x2a8   : > { %2844 = vst.msk [vmem:[#allocation5 + $0x18] sm:$0xff] %vm2840_vm1, %v2823_v12  ;;  %v3063_v13 = vpop.permute.xlu0 %3062 }
 0x2a9   : > { %3087 = vst.msk [vmem:[#allocation5] sm:$0xff] %vm3086_vm7, %v3063_v13  ;;  %3174 = vrot.lane.b32.xlu1 %v3151_v58, %s3851_s30  ;;  %s435_s30 = scalar_lea.vmem %s5471_s12, %s3637_s16 }
 0x2ab   : > { %v3015_v22 = vpop.permute.xlu1 %3014 }
 0x2ac   : > { %3038 = vst.msk [vmem:[#allocation5 + $0x8] sm:$0xff] %vm3036_vm6, %v3015_v22  ;;  %v2009_v33 = vpop.permute.xlu0 %2008 }
 0x2ad   : > { %2087 = vst.msk [vmem:[#allocation4 + $0x90] sm:$0xff] %vm2068_vm13, %v2009_v33 }
 0x2af   : > { %v1818_v23 = vpop.permute.xlu1 %1817 }
 0x2b0   : > { %1895 = vst.msk [vmem:[#allocation4 + $0x98] sm:$0xff] %vm1875_vm12, %v1818_v23  ;;  %v2919_v26 = vpop.permute.xlu0 %2918 }
 0x2b1   : > { %2941 = vst.msk [vmem:[#allocation5 + $0x10] sm:$0xff] %vm2938_vm3, %v2919_v26 }
 0x2b3   : > { %v2872_v18 = vpop.permute.xlu1 %2871 }
 0x2b4   : > { %v3712_v27 = vpop.f32.mrb[6].mxu0  ;;  %2893 = vst.msk [vmem:[#allocation5 + $0x18] sm:$0xff] %vm2889_vm2, %v2872_v18  ;;  %v3112_v62 = vpop.permute.xlu0 %3111 }
 0x2b5   : > { %v2660_v28 = vmax.f32 %v3709_v63, %v3712_v27  ;;  %v2528_v29 = vpop.f32.mrb[7].mxu0  ;;  %3136 = vst.msk [vmem:[#allocation5] sm:$0xff] %vm3135_vm9, %v3112_v62 }
 0x2b6   : > { %v2659_v16 = vmax.f32 %v2518_v6, %v2528_v29 }
 0x2b7   : > { %2677 = vst.msk [vmem:[#allocation6 + $0x18] sm:$0xff] %vm2673_vm4, %v2660_v28  ;;  %v3065_v37 = vpop.permute.xlu1 %3064 }
 0x2b8   : > { %2676 = vst.msk [vmem:[#allocation6 + $0x10] sm:$0xff] %vm2673_vm4, %v2659_v16  ;;  %v2202_v3 = vpop.permute.xlu0 %2201 }
 0x2b9   : > { %3088 = vst.msk [vmem:[#allocation5 + $0x8] sm:$0xff] %vm3086_vm7, %v3065_v37 }
 0x2ba   : > { %2280 = vst.msk [vmem:[#allocation4 + $0x90] sm:$0xff] %vm2261_vm14, %v2202_v3 }
 0x2bb   : > { %v3733_v49 = vpop.f32.mrb[0].mxu1  ;;  %v2011_v51 = vpop.permute.xlu1 %2010 }
 0x2bc   : > { %2088 = vst.msk [vmem:[#allocation4 + $0x98] sm:$0xff] %vm2068_vm13, %v2011_v51  ;;  %v2968_v59 = vpop.permute.xlu0 %2967  ;;  %v2598_v34 = vpop.f32.mrb[1].mxu1 }
 0x2bd   : > { %2990 = vst.msk [vmem:[#allocation5 + $0x10] sm:$0xff] %vm2987_vm5, %v2968_v59 }
 0x2bf   : > { %v2921_v60 = vpop.permute.xlu1 %2920 }
 0x2c0   : > { %2942 = vst.msk [vmem:[#allocation5 + $0x18] sm:$0xff] %vm2938_vm3, %v2921_v60  ;;  %v3161_v1 = vpop.permute.xlu0 %3160 }
 0x2c1   : > { %v2312_v46 = vld [vmem:[#allocation4 + $0x90] sm:$0xff]  ;;  %3185 = vst.msk [vmem:[#allocation5] sm:$0xff] %vm3184_vm10, %v3161_v1 }
 0x2c2   : > { %3728 = vmatprep.mubr.msk.f32.mxu0 %vm2331_vm15, %v2312_v46 }
 0x2c3   : > { %v3114_v41 = vpop.permute.xlu1 %3113 }
 0x2c4   : > { %3137 = vst.msk [vmem:[#allocation5 + $0x8] sm:$0xff] %vm3135_vm9, %v3114_v41  ;;  %v2825_v0 = vpop.permute.xlu0 %2824 }
 0x2c5   : > { %2845 = vst.msk [vmem:[#allocation5 + $0x20] sm:$0xff] %vm2840_vm1, %v2825_v0 }
 0x2c7   : > { %v2204_v42 = vpop.permute.xlu1 %2203 }
 0x2c8   : > { %2281 = vst.msk [vmem:[#allocation4 + $0x98] sm:$0xff] %vm2261_vm14, %v2204_v42  ;;  %v3017_v61 = vpop.permute.xlu0 %3016  ;;  %v3193_v24 = vld [vmem:[#allocation5] sm:$0xff] }
 0x2c9   : > { %3039 = vst.msk [vmem:[#allocation5 + $0x10] sm:$0xff] %vm3036_vm6, %v3017_v61  ;;  %3763 = vmatprep.mubr.msk.f32.mxu1 %vm3208_vm11, %v3193_v24 }
 0x2cb   : > { %v2970_v53 = vpop.permute.xlu1 %2969 }
 0x2cc   : > { %2991 = vst.msk [vmem:[#allocation5 + $0x18] sm:$0xff] %vm2987_vm5, %v2970_v53  ;;  %v2827_v17 = vpop.permute.xlu0 %2826 }
 0x2cd   : > { %2846 = vst.msk [vmem:[#allocation5 + $0x28] sm:$0xff] %vm2840_vm1, %v2827_v17 }
 0x2cf   : > { %v3163_v43 = vpop.permute.xlu1 %3162  ;;  %v2313_v38 = vld [vmem:[#allocation4 + $0x98] sm:$0xff] }
 0x2d0   : > { %3186 = vst.msk [vmem:[#allocation5 + $0x8] sm:$0xff] %vm3184_vm10, %v3163_v43  ;;  %v3019_v10 = vpop.permute.xlu0 %3018  ;;  %3729 = vmatmul.mubr.msk.f32.gmra.mrb[18].mxu0 %vm2331_vm15, %v2313_v38 }
 0x2d1   : > { %3040 = vst.msk [vmem:[#allocation5 + $0x18] sm:$0xff] %vm3036_vm6, %v3019_v10 }
 0x2d3   : > { %v2874_v35 = vpop.permute.xlu1 %2873 }
 0x2d4   : > { %2894 = vst.msk [vmem:[#allocation5 + $0x20] sm:$0xff] %vm2889_vm2, %v2874_v35  ;;  %v2876_v4 = vpop.permute.xlu0 %2875 }
 0x2d5   : > { %2895 = vst.msk [vmem:[#allocation5 + $0x28] sm:$0xff] %vm2889_vm2, %v2876_v4 }
 0x2d7   : > { %v3067_v44 = vpop.permute.xlu1 %3066  ;;  %v3194_v47 = vld [vmem:[#allocation5 + $0x8] sm:$0xff] }
 0x2d8   : > { %v3715_v19 = vpop.f32.mrb[8].mxu0  ;;  %3089 = vst.msk [vmem:[#allocation5 + $0x10] sm:$0xff] %vm3086_vm7, %v3067_v44  ;;  %v3069_v2 = vpop.permute.xlu0 %3068  ;;  %3764 = vmatmul.mubr.msk.f32.vlgmr.msra.gmra.mrb[12].mxu1 %vm3208_vm11, %v3194_v47 }
 0x2d9   : > { %v2538_v15 = vpop.f32.mrb[9].mxu0  ;;  %3090 = vst.msk [vmem:[#allocation5 + $0x18] sm:$0xff] %vm3086_vm7, %v3069_v2 }
 0x2db   : > { %v2923_v52 = vpop.permute.xlu1 %2922 }
 0x2dc   : > { %2943 = vst.msk [vmem:[#allocation5 + $0x20] sm:$0xff] %vm2938_vm3, %v2923_v52  ;;  %v2925_v55 = vpop.permute.xlu0 %2924 }
 0x2dd   : > { %2944 = vst.msk [vmem:[#allocation5 + $0x28] sm:$0xff] %vm2938_vm3, %v2925_v55 }
 0x2df   : > { %v3736_v32 = vpop.f32.mrb[2].mxu1  ;;  %v3116_v50 = vpop.permute.xlu1 %3115 }
 0x2e0   : > { %v2668_v45 = vmax.f32 %v3733_v49, %v3736_v32  ;;  %3138 = vst.msk [vmem:[#allocation5 + $0x10] sm:$0xff] %vm3135_vm9, %v3116_v50  ;;  %v3118_v5 = vpop.permute.xlu0 %3117  ;;  %v2608_v9 = vpop.f32.mrb[3].mxu1 }
 0x2e1   : > { %3139 = vst.msk [vmem:[#allocation5 + $0x18] sm:$0xff] %vm3135_vm9, %v3118_v5  ;;  %v2667_v11 = vmax.f32 %v2598_v34, %v2608_v9  ;;  %v2692_v9 = vld [vmem:[#allocation6 + $0x10] ss:$2 sm:$0xff] }
 0x2e2   : > { %2685 = vst.msk [vmem:[#allocation6 + $0x58] sm:$0xff] %vm2673_vm4, %v2668_v45 }
 0x2e3   : > { %2684 = vst.msk [vmem:[#allocation6 + $0x50] sm:$0xff] %vm2673_vm4, %v2667_v11  ;;  %v2972_v54 = vpop.permute.xlu1 %2971  ;;  %v2708_v11 = vld [vmem:[#allocation6 + $0x11] ss:$2 sm:$0xff] }
 0x2e4   : > { %2992 = vst.msk [vmem:[#allocation5 + $0x20] sm:$0xff] %vm2987_vm5, %v2972_v54  ;;  %v2829_v63 = vpop.permute.xlu0 %2828  ;;  %v2690_v54 = vld [vmem:[#allocation6] ss:$2 sm:$0xff] }
 0x2e5   : > { %2847 = vst.msk [vmem:[#allocation5 + $0x30] sm:$0xff] %vm2840_vm1, %v2829_v63  ;;  %v2706_v63 = vld [vmem:[#allocation6 + $0x1] ss:$2 sm:$0xff] }
 0x2e7   : > { %v3165_v6 = vpop.permute.xlu1 %3164 }
 0x2e8   : > { %3187 = vst.msk [vmem:[#allocation5 + $0x10] sm:$0xff] %vm3184_vm10, %v3165_v6  ;;  %v3021_v30 = vpop.permute.xlu0 %3020  ;;  %v2722_v6 = vmax.f32 %v2692_v9, %v2708_v11 }
 0x2e9   : > { %3041 = vst.msk [vmem:[#allocation5 + $0x20] sm:$0xff] %vm3036_vm6, %v3021_v30 }
 0x2eb   : > { %v2974_v39 = vpop.permute.xlu1 %2973 }
 0x2ec   : > { %2993 = vst.msk [vmem:[#allocation5 + $0x28] sm:$0xff] %vm2987_vm5, %v2974_v39  ;;  %v2831_v14 = vpop.permute.xlu0 %2830  ;;  %v5391_v39 = vld [vmem:[%s5467_s8] ss:$0 sm:$0xff] }
 0x2ed   : > { %2848 = vst.msk [vmem:[#allocation5 + $0x38] sm:$0xff] %vm2840_vm1, %v2831_v14  ;;  %v2721_v14 = vmax.f32 %v2690_v54, %v2706_v63 }
 0x2ef   : > { %v3167_v7 = vpop.permute.xlu1 %3166  ;;  %v3195_v8 = vld [vmem:[#allocation5 + $0x10] sm:$0xff] }
 0x2f0   : > { %3188 = vst.msk [vmem:[#allocation5 + $0x18] sm:$0xff] %vm3184_vm10, %v3167_v7  ;;  %v3023_v48 = vpop.permute.xlu0 %3022  ;;  %3766 = vmatprep.mubr.msk.f32.mxu1 %vm3208_vm11, %v3195_v8 }
 0x2f1   : > { %3042 = vst.msk [vmem:[#allocation5 + $0x28] sm:$0xff] %vm3036_vm6, %v3023_v48  ;;  %v5396_v48 = vld [vmem:[%s5468_s9] ss:$0 sm:$0xff] }
 0x2f3   : > { %v2878_v21 = vpop.permute.xlu1 %2877 }
 0x2f4   : > { %2896 = vst.msk [vmem:[#allocation5 + $0x30] sm:$0xff] %vm2889_vm2, %v2878_v21  ;;  %v2880_v25 = vpop.permute.xlu0 %2879 }
 0x2f5   : > { %2897 = vst.msk [vmem:[#allocation5 + $0x38] sm:$0xff] %vm2889_vm2, %v2880_v25 }
 0x2f7   : > { %v3071_v36 = vpop.permute.xlu1 %3070  ;;  %v3196_v56 = vld [vmem:[#allocation5 + $0x18] sm:$0xff] }
 0x2f8   : > { %3091 = vst.msk [vmem:[#allocation5 + $0x20] sm:$0xff] %vm3086_vm7, %v3071_v36  ;;  %v3073_v20 = vpop.permute.xlu0 %3072  ;;  %3767 = vmatmul.mubr.msk.f32.gmra.mrb[14].mxu1 %vm3208_vm11, %v3196_v56 }
 0x2f9   : > { %3092 = vst.msk [vmem:[#allocation5 + $0x28] sm:$0xff] %vm3086_vm7, %v3073_v20 }
 0x2fb   : > { %v2927_v40 = vpop.permute.xlu1 %2926 }
 0x2fc   : > { %v3718_v31 = vpop.f32.mrb[10].mxu0  ;;  %2945 = vst.msk [vmem:[#allocation5 + $0x30] sm:$0xff] %vm2938_vm3, %v2927_v40  ;;  %v2929_v58 = vpop.permute.xlu0 %2928  ;;  %v5405_v40 = vld [vmem:[%s5469_s10] ss:$0 sm:$0xff] }
 0x2fd   : > { %v2662_v57 = vmax.f32 %v3715_v19, %v3718_v31  ;;  %v2548_v12 = vpop.f32.mrb[11].mxu0  ;;  %2946 = vst.msk [vmem:[#allocation5 + $0x38] sm:$0xff] %vm2938_vm3, %v2929_v58 }
 0x2fe   : > { %v2661_v13 = vmax.f32 %v2538_v15, %v2548_v12 }
 0x2ff   : > { %2679 = vst.msk [vmem:[#allocation6 + $0x28] sm:$0xff] %vm2673_vm4, %v2662_v57  ;;  %v3120_v22 = vpop.permute.xlu1 %3119 }
 0x300   : > { %2678 = vst.msk [vmem:[#allocation6 + $0x20] sm:$0xff] %vm2673_vm4, %v2661_v13  ;;  %v3122_v33 = vpop.permute.xlu0 %3121 }
 0x301   : > { %3140 = vst.msk [vmem:[#allocation5 + $0x20] sm:$0xff] %vm3135_vm9, %v3120_v22  ;;  %3141 = vst.msk [vmem:[#allocation5 + $0x28] sm:$0xff] %vm3135_vm9, %v3122_v33  ;;  %v3852_v33 = vmov 0  }
 0x302   : > { %3826 = vset.pattern.permute.xlu0 %v3852_v33  ;;  %3825 = vset.pattern.permute.xlu1 %v3852_v33  ;;  %v3633_v33 = vld [vmem:[#allocation7] ss:$0 sm:$0xff] }
 0x303   : > { %v3739_v23 = vpop.f32.mrb[4].mxu1  ;;  %v2976_v26 = vpop.permute.xlu1 %2975 }
 0x304   : > { %2994 = vst.msk [vmem:[#allocation5 + $0x30] sm:$0xff] %vm2987_vm5, %v2976_v26  ;;  %v2978_v18 = vpop.permute.xlu0 %2977  ;;  %v2618_v27 = vpop.f32.mrb[5].mxu1 }
 0x305   : > { %2995 = vst.msk [vmem:[#allocation5 + $0x38] sm:$0xff] %vm2987_vm5, %v2978_v18 }
 0x307   : > { %v3169_v28 = vpop.permute.xlu1 %3168  ;;  %v2694_v18 = vld [vmem:[#allocation6 + $0x20] ss:$2 sm:$0xff] }
 0x308   : > { %3189 = vst.msk [vmem:[#allocation5 + $0x20] sm:$0xff] %vm3184_vm10, %v3169_v28  ;;  %v3171_v62 = vpop.permute.xlu0 %3170 }
 0x309   : > { %3190 = vst.msk [vmem:[#allocation5 + $0x28] sm:$0xff] %vm3184_vm10, %v3171_v62 }
 0x30b   : > { %v3025_v29 = vpop.permute.xlu1 %3024 }
 0x30c   : > { %3043 = vst.msk [vmem:[#allocation5 + $0x30] sm:$0xff] %vm3036_vm6, %v3025_v29  ;;  %v3075_v16 = vpop.permute.xlu0 %3074 }
 0x30d   : > { %3093 = vst.msk [vmem:[#allocation5 + $0x30] sm:$0xff] %vm3086_vm7, %v3075_v16 }
 0x30f   : > { %v3027_v37 = vpop.permute.xlu1 %3026  ;;  %v3197_v3 = vld [vmem:[#allocation5 + $0x20] sm:$0xff] }
 0x310   : > { %3044 = vst.msk [vmem:[#allocation5 + $0x38] sm:$0xff] %vm3036_vm6, %v3027_v37  ;;  %3769 = vmatprep.mubr.msk.f32.mxu1 %vm3208_vm11, %v3197_v3  ;;  %v3198_v49 = vld [vmem:[#allocation5 + $0x28] sm:$0xff]  ;;  %v3124_v51 = vpop.permute.xlu0 %3123 }
 0x311   : > { %3770 = vmatmul.mubr.msk.f32.gmra.mrb[16].mxu1 %vm3208_vm11, %v3198_v49  ;;  %3142 = vst.msk [vmem:[#allocation5 + $0x30] sm:$0xff] %vm3135_vm9, %v3124_v51 }
 0x313   : > { %v3077_v59 = vpop.permute.xlu1 %3076 }
 0x314   : > { %3094 = vst.msk [vmem:[#allocation5 + $0x38] sm:$0xff] %vm3086_vm7, %v3077_v59  ;;  %v3173_v34 = vpop.permute.xlu0 %3172 }
 0x315   : > { %3191 = vst.msk [vmem:[#allocation5 + $0x30] sm:$0xff] %vm3184_vm10, %v3173_v34 }
 0x317   : > { %v3126_v60 = vpop.permute.xlu1 %3125 }
 0x318   : > { %3143 = vst.msk [vmem:[#allocation5 + $0x38] sm:$0xff] %vm3135_vm9, %v3126_v60 }
 0x31b   : > { %v3175_v1 = vpop.permute.xlu1 %3174 }
 0x31c   : > { %3192 = vst.msk [vmem:[#allocation5 + $0x38] sm:$0xff] %vm3184_vm10, %v3175_v1  ;;  %v3199_v46 = vld [vmem:[#allocation5 + $0x30] sm:$0xff] }
 0x31d   : > { %3772 = vmatprep.mubr.msk.f32.mxu1 %vm3208_vm11, %v3199_v46 }
 0x320   : > { %v3721_v41 = vpop.f32.mrb[12].mxu0 }
 0x321   : > { %v2558_v0 = vpop.f32.mrb[13].mxu0 }
 0x323   : > { %v3200_v42 = vld [vmem:[#allocation5 + $0x38] sm:$0xff] }
 0x324   : > { %3773 = vmatmul.mubr.msk.f32.gmra.mrb[18].mxu1 %vm3208_vm11, %v3200_v42 }
 0x327   : > { %v3742_v61 = vpop.f32.mrb[6].mxu1 }
 0x328   : > { %v2670_v24 = vmax.f32 %v3739_v23, %v3742_v61  ;;  %v2628_v53 = vpop.f32.mrb[7].mxu1  ;;  %v2700_v61 = vld [vmem:[#allocation6 + $0x50] ss:$2 sm:$0xff] }
 0x329   : > { %v2669_v17 = vmax.f32 %v2618_v27, %v2628_v53  ;;  %v2710_v27 = vld [vmem:[#allocation6 + $0x21] ss:$2 sm:$0xff] }
 0x32a   : > { %2687 = vst.msk [vmem:[#allocation6 + $0x68] sm:$0xff] %vm2673_vm4, %v2670_v24  ;;  %v2723_v29 = vmax.f32 %v2694_v18, %v2710_v27  ;;  %v2716_v24 = vld [vmem:[#allocation6 + $0x51] ss:$2 sm:$0xff] }
 0x32b   : > { %2686 = vst.msk [vmem:[#allocation6 + $0x60] sm:$0xff] %vm2673_vm4, %v2669_v17 }
 0x332   : > { %v2702_v54 = vld [vmem:[#allocation6 + $0x60] ss:$2 sm:$0xff]  ;;  %v2718_v63 = vld [vmem:[#allocation6 + $0x61] ss:$2 sm:$0xff] }
 0x344   : > { %v3724_v43 = vpop.f32.mrb[14].mxu0 }
 0x345   : > { %v2664_v38 = vmax.f32 %v3721_v41, %v3724_v43  ;;  %v2568_v10 = vpop.f32.mrb[15].mxu0  ;;  %v2726_v43 = vmax.f32 %v2700_v61, %v2716_v24 }
 0x346   : > { %v2663_v35 = vmax.f32 %v2558_v0, %v2568_v10 }
 0x347   : > { %2681 = vst.msk [vmem:[#allocation6 + $0x38] sm:$0xff] %vm2673_vm4, %v2664_v38 }
 0x348   : > { %2680 = vst.msk [vmem:[#allocation6 + $0x30] sm:$0xff] %vm2673_vm4, %v2663_v35 }
 0x34b   : > { %v3745_v4 = vpop.f32.mrb[8].mxu1 }
 0x34c   : > { %v2638_v44 = vpop.f32.mrb[9].mxu1 }
 0x34f   : > { %v2696_v23 = vld [vmem:[#allocation6 + $0x30] ss:$2 sm:$0xff]  ;;  %v2712_v26 = vld [vmem:[#allocation6 + $0x31] ss:$2 sm:$0xff] }
 0x350   : > { %v2724_v28 = vmax.f32 %v2696_v23, %v2712_v26 }
 0x370   : > { %v3727_v47 = vpop.f32.mrb[16].mxu0 }
 0x371   : > { %v2578_v19 = vpop.f32.mrb[17].mxu0 }
 0x377   : > { %v3748_v2 = vpop.f32.mrb[10].mxu1 }
 0x378   : > { %v2672_v15 = vmax.f32 %v3745_v4, %v3748_v2  ;;  %v2648_v52 = vpop.f32.mrb[11].mxu1 }
 0x379   : > { %v2671_v55 = vmax.f32 %v2638_v44, %v2648_v52 }
 0x37a   : > { %2689 = vst.msk [vmem:[#allocation6 + $0x78] sm:$0xff] %vm2673_vm4, %v2672_v15 }
 0x37b   : > { %2688 = vst.msk [vmem:[#allocation6 + $0x70] sm:$0xff] %vm2673_vm4, %v2671_v55 }
 0x382   : > { %v2704_v9 = vld [vmem:[#allocation6 + $0x70] ss:$2 sm:$0xff]  ;;  %v2720_v11 = vld [vmem:[#allocation6 + $0x71] ss:$2 sm:$0xff] }
 0x3a3   : > { %v3730_v32 = vpop.f32.mrb[18].mxu0 }
 0x3a4   : > { %v2666_v50 = vmax.f32 %v3727_v47, %v3730_v32  ;;  %v2588_v45 = vpop.f32.mrb[19].mxu0 }
 0x3a5   : > { %v2665_v5 = vmax.f32 %v2578_v19, %v2588_v45 }
 0x3a6   : > { %2683 = vst.msk [vmem:[#allocation6 + $0x48] sm:$0xff] %vm2673_vm4, %v2666_v50 }
 0x3a7   : > { %2682 = vst.msk [vmem:[#allocation6 + $0x40] sm:$0xff] %vm2673_vm4, %v2665_v5 }
 0x3ab   : > { %v3765_v30 = vpop.f32.mrb[12].mxu1 }
 0x3ac   : > { %v3343_v7 = vadd.f32 %v3765_v30, %v2722_v6  ;;  %v3303_v8 = vpop.f32.mrb[13].mxu1  ;;  %v2728_v6 = vmax.f32 %v2704_v9, %v2720_v11 }
 0x3ad   : > { %v3342_v21 = vadd.f32 %v3303_v8, %v2721_v14  ;;  %v2727_v14 = vmax.f32 %v2702_v54, %v2718_v63 }
 0x3ae   : > { %v3358_v25 = vmul.f32 %v5391_v39, %v3343_v7  ;;  %v2698_v53 = vld [vmem:[#allocation6 + $0x40] ss:$2 sm:$0xff]  ;;  %v2714_v17 = vld [vmem:[#allocation6 + $0x41] ss:$2 sm:$0xff] }
 0x3af   : > { %v3357_v36 = vmul.f32 %v5391_v39, %v3342_v21  ;;  %v2725_v10 = vmax.f32 %v2698_v53, %v2714_v17  ;;  %v3445_v53 = vld [vmem:[%s4792_s22 + $0x18] sm:$0xff] }
 0x3b0   : > { %v3373_v56 = vadd.f32 %v5396_v48, %v3358_v25 }
 0x3b1   : > { %v3372_v20 = vadd.f32 %v5396_v48, %v3357_v36 }
 0x3b2   : > { %v3381_v31 = vmax.f32 %v3373_v56, 0.0 }
 0x3b3   : > { %v3380_v57 = vmax.f32 %v3372_v20, 0.0 }
 0x3b4   : > { %v3396_v58 = vmul.f32 %v5405_v40, %v3381_v31 }
 0x3b5   : > { %v3395_v12 = vmul.f32 %v5405_v40, %v3380_v57 }
 0x3b6   : > { %v3406_v13 = vsel %vm2673_vm4, %v3396_v58, 0.0 }
 0x3b7   : > { %3407 = vadd.xlane.f32.xlu1 %v3406_v13  ;;  %v3403_v22 = vsel %vm2673_vm4, %v3395_v12, 0.0 }
 0x3b8   : > { %3404 = vadd.xlane.f32.xlu0 %v3403_v22 }
 0x3cb   : > { %v3768_v62 = vpop.f32.mrb[14].mxu1 }
 0x3cc   : > { %v3345_v16 = vadd.f32 %v3768_v62, %v2724_v28  ;;  %v3313_v37 = vpop.f32.mrb[15].mxu1 }
 0x3cd   : > { %v3344_v3 = vadd.f32 %v3313_v37, %v2723_v29 }
 0x3ce   : > { %v3360_v49 = vmul.f32 %v5391_v39, %v3345_v16 }
 0x3cf   : > { %v3359_v51 = vmul.f32 %v5391_v39, %v3344_v3 }
 0x3d0   : > { %v3375_v59 = vadd.f32 %v5396_v48, %v3360_v49 }
 0x3d1   : > { %v3374_v34 = vadd.f32 %v5396_v48, %v3359_v51 }
 0x3d2   : > { %v3383_v60 = vmax.f32 %v3375_v59, 0.0 }
 0x3d3   : > { %v3382_v1 = vmax.f32 %v3374_v34, 0.0  ;;  %v3443_v34 = vld [vmem:[%s4792_s22 + $0x8] sm:$0xff] }
 0x3d4   : > { %v3398_v0 = vmul.f32 %v5405_v40, %v3383_v60  ;;  %v3442_v60 = vld [vmem:[%s4792_s22] sm:$0xff] }
 0x3d5   : > { %v3397_v46 = vmul.f32 %v5405_v40, %v3382_v1 }
 0x3d6   : > { %v3412_v42 = vsel %vm2673_vm4, %v3398_v0, 0.0 }
 0x3d7   : > { %v3409_v41 = vsel %vm2673_vm4, %v3397_v46, 0.0 }
 0x3d8   : > { %3410 = vadd.xlane.f32.xlu0 %v3409_v41 }
 0x3dc   : > { %3413 = vadd.xlane.f32.xlu0 %v3412_v42  ;;  %v3444_v42 = vld [vmem:[%s4792_s22 + $0x10] sm:$0xff] }
 0x3e4   : > { %v3771_v38 = vpop.f32.mrb[16].mxu1 }
 0x3e5   : > { %v3347_v35 = vadd.f32 %v3771_v38, %v2726_v43  ;;  %v3323_v4 = vpop.f32.mrb[17].mxu1  ;;  %v3446_v38 = vld [vmem:[%s4792_s22 + $0x20] sm:$0xff] }
 0x3e6   : > { %v3346_v44 = vadd.f32 %v3323_v4, %v2725_v10  ;;  %v3447_v4 = vld [vmem:[%s4792_s22 + $0x28] sm:$0xff] }
 0x3e7   : > { %v3362_v47 = vmul.f32 %v5391_v39, %v3347_v35 }
 0x3e8   : > { %v3361_v19 = vmul.f32 %v5391_v39, %v3346_v44 }
 0x3e9   : > { %v3377_v2 = vadd.f32 %v5396_v48, %v3362_v47 }
 0x3ea   : > { %v3376_v15 = vadd.f32 %v5396_v48, %v3361_v19 }
 0x3eb   : > { %v3385_v52 = vmax.f32 %v3377_v2, 0.0  ;;  %v3827_v2 = vld [vmem:[%s4792_s22 + $0x30] sm:$0xff] }
 0x3ec   : > { %v3384_v55 = vmax.f32 %v3376_v15, 0.0 }
 0x3ed   : > { %v3400_v32 = vmul.f32 %v5405_v40, %v3385_v52 }
 0x3ee   : > { %v3399_v50 = vmul.f32 %v5405_v40, %v3384_v55  ;;  %v3828_v55 = vld [vmem:[%s4792_s22 + $0x38] sm:$0xff] }
 0x3ef   : > { %v3418_v45 = vsel %vm2673_vm4, %v3400_v32, 0.0 }
 0x3f0   : > { %3419 = vadd.xlane.f32.xlu0 %v3418_v45  ;;  %v3415_v5 = vsel %vm2673_vm4, %v3399_v50, 0.0 }
 0x3f1   : > { %3416 = vadd.xlane.f32.xlu1 %v3415_v5 }
 0x3f7   : > { %v3774_v30 = vpop.f32.mrb[18].mxu1 }
 0x3f8   : > { %v3349_v7 = vadd.f32 %v3774_v30, %v2728_v6  ;;  %v3333_v8 = vpop.f32.mrb[19].mxu1 }
 0x3f9   : > { %v3348_v21 = vadd.f32 %v3333_v8, %v2727_v14 }
 0x3fa   : > { %v3364_v25 = vmul.f32 %v5391_v39, %v3349_v7 }
 0x3fb   : > { %v3363_v36 = vmul.f32 %v5391_v39, %v3348_v21 }
 0x3fc   : > { %v3379_v56 = vadd.f32 %v5396_v48, %v3364_v25 }
 0x3fd   : > { %v3378_v20 = vadd.f32 %v5396_v48, %v3363_v36 }
 0x3fe   : > { %v3387_v31 = vmax.f32 %v3379_v56, 0.0 }
 0x3ff   : > { %v3386_v57 = vmax.f32 %v3378_v20, 0.0 }
 0x400   : > { %v3402_v58 = vmul.f32 %v5405_v40, %v3387_v31 }
 0x401   : > { %v3401_v12 = vmul.f32 %v5405_v40, %v3386_v57 }
 0x402   : > { %v3424_v13 = vsel %vm2673_vm4, %v3402_v58, 0.0 }
 0x403   : > { %3425 = vadd.xlane.f32.xlu0 %v3424_v13  ;;  %v3421_v22 = vsel %vm2673_vm4, %v3401_v12, 0.0 }
 0x404   : > { %3422 = vadd.xlane.f32.xlu1 %v3421_v22 }
 0x444   : > { %v3408_v23 = vpop.xlane.xlu1 %3407 }
 0x445   : > { %v3435_v26 = vadd.f32 %v3633_v33, %v3408_v23  ;;  %v3405_v39 = vpop.xlane.xlu0 %3404 }
 0x446   : > { %v3434_v18 = vadd.f32 %v3633_v33, %v3405_v39 }
 0x447   : > { %3457 = vperm.xlu0 %3826, %v3435_v26  }
 0x448   : > { %3452 = vperm.xlu1 %3825, %v3434_v18  }
 0x465   : > { %v3411_v48 = vpop.xlane.xlu0 %3410 }
 0x466   : > { %v3436_v27 = vadd.f32 %v3633_v33, %v3411_v48 }
 0x468   : > { %3462 = vperm.xlu1 %3825, %v3436_v27  }
 0x469   : > { %v3414_v28 = vpop.xlane.xlu0 %3413 }
 0x46a   : > { %v3437_v40 = vadd.f32 %v3633_v33, %v3414_v28 }
 0x46c   : > { %3467 = vperm.xlu1 %3825, %v3437_v40  }
 0x47d   : > { %v3420_v16 = vpop.xlane.xlu0 %3419 }
 0x47e   : > { %v3417_v62 = vpop.xlane.xlu1 %3416  ;;  %v3439_v37 = vadd.f32 %v3633_v33, %v3420_v16 }
 0x47f   : > { %v3438_v29 = vadd.f32 %v3633_v33, %v3417_v62 }
 0x481   : > { %3472 = vperm.xlu1 %3825, %v3438_v29  }
 0x485   : > { %3477 = vperm.xlu1 %3825, %v3439_v37  }
 0x490   : > { %v3426_v51 = vpop.xlane.xlu0 %3425 }
 0x491   : > { %v3423_v3 = vpop.xlane.xlu1 %3422  ;;  %v3441_v59 = vadd.f32 %v3633_v33, %v3426_v51 }
 0x492   : > { %v3440_v49 = vadd.f32 %v3633_v33, %v3423_v3 }
 0x494   : > { %3482 = vperm.xlu1 %3825, %v3440_v49  }
 0x498   : > { %3487 = vperm.xlu1 %3825, %v3441_v59  }
 0x4c6   : > { %v3458_v1 = vpop.permute.xlu0 %3457 }
 0x4c7   : > { %v3491_v46 = vmul.f32 %v3458_v1, %v3443_v34  ;;  %v3453_v41 = vpop.permute.xlu1 %3452 }
 0x4c8   : > { %v3490_v0 = vmul.f32 %v3453_v41, %v3442_v60 }
 0x4c9   : > { %3499 = vst.msk [vmem:[%s435_s30 + $0x8] sm:$0xff] %vm482_vm8, %v3491_v46 }
 0x4ca   : > { %3498 = vst.msk [vmem:[%s435_s30] sm:$0xff] %vm482_vm8, %v3490_v0 }
 0x4e7   : > { %v3463_v61 = vpop.permute.xlu1 %3462 }
 0x4e8   : > { %v3492_v24 = vmul.f32 %v3463_v61, %v3444_v42 }
 0x4ea   : > { %3500 = vst.msk [vmem:[%s435_s30 + $0x10] sm:$0xff] %vm482_vm8, %v3492_v24 }
 0x4eb   : > { %v3468_v17 = vpop.permute.xlu1 %3467 }
 0x4ec   : > { %v3493_v43 = vmul.f32 %v3468_v17, %v3445_v53 }
 0x4ee   : > { %3501 = vst.msk [vmem:[%s435_s30 + $0x18] sm:$0xff] %vm482_vm8, %v3493_v43 }
 0x500   : > { %v3473_v10 = vpop.permute.xlu1 %3472 }
 0x501   : > { %v3494_v35 = vmul.f32 %v3473_v10, %v3446_v38 }
 0x503   : > { %3502 = vst.msk [vmem:[%s435_s30 + $0x20] sm:$0xff] %vm482_vm8, %v3494_v35 }
 0x504   : > { %v3478_v44 = vpop.permute.xlu1 %3477 }
 0x505   : > { %v3495_v47 = vmul.f32 %v3478_v44, %v3447_v4 }
 0x507   : > { %3503 = vst.msk [vmem:[%s435_s30 + $0x28] sm:$0xff] %vm482_vm8, %v3495_v47 }
 0x513   : > { %v3483_v19 = vpop.permute.xlu1 %3482 }
 0x514   : > { %v3496_v15 = vmul.f32 %v3827_v2, %v3483_v19 }
 0x516   : > { %3504 = vst.msk [vmem:[%s435_s30 + $0x30] sm:$0xff] %vm482_vm8, %v3496_v15 }
 0x517   : > { %v3488_v52 = vpop.permute.xlu1 %3487 }
 0x518   : > { %v3497_v32 = vmul.f32 %v3828_v55, %v3488_v52 }
 0x51a   : > { %3505 = vst.msk [vmem:[%s435_s30 + $0x38] sm:$0xff] %vm482_vm8, %v3497_v32 }
 0x51b PF: > { %s24_s23 = sadd.s32 1, %s3835_s23  }
 0x51c   : > { %p21_p4 = scmp.ge.s32.totalorder %s24_s23, 4  }
 0x51e   :  { %23 = sbr.rel (!%p21_p4) target bundleno = 3 (0x3), region = 122 }

</bundles_post_ra>
